<compile_context>
chip_gen: v7x
topology: tpu7x:2x2x1
jax: 0.10.0
libtpu: 0.0.40
codegen_flags: <defaults>
</compile_context>

<pallas_src>
import jax
import jax.numpy as jnp
from jax.experimental import pallas as pl
from jax.experimental.pallas import tpu as pltpu


def _round_up(x, m):
    return ((x + m - 1) // m) * m


def _build_shift_plan(weights, dilation_series):
    """Group the 3x3 taps of all branches by their (dh, dw) spatial shift.

    weights[i]: (L, C, 3, 3) PyTorch OIHW.
    Returns:
      plan: tuple of (dw, (dh, ...)) -- taps grouped by lane shift dw; the g-th
            matmul in the kernel (row-major over this plan) uses w_g[g].
      w_g:  (G, L, C) per-shift summed weights, C on the lane axis.
    """
    taps = {}
    for wi, d in zip(weights, dilation_series):
        d = int(d)
        for kh in range(3):
            for kw in range(3):
                shift = ((kh - 1) * d, (kw - 1) * d)
                t = wi[:, :, kh, kw]                      # (L, C)
                taps[shift] = t if shift not in taps else taps[shift] + t
    by_dw = {}
    for (dh, dw), t in taps.items():
        by_dw.setdefault(dw, []).append((dh, t))
    plan, w_list = [], []
    for dw in sorted(by_dw):
        dhs = []
        for dh, t in sorted(by_dw[dw], key=lambda p: p[0]):
            dhs.append(dh)
            w_list.append(t)
        plan.append((dw, tuple(dhs)))
    return tuple(plan), jnp.stack(w_list, axis=0)          # (G, L, C)


def _make_kernel(plan, *, max_pad, Wp, H, n_k, use_rot):
    M = H * Wp                                   # output spatial extent (incl. gutters)
    rot_len = (H + 2 * max_pad) * Wp

    def kernel(x_ref, w_ref, b_ref, o_ref, acc_ref, *rot):
        # x_ref:  (1, C_tile, Hp*Wp)  zero-padded, spatially flattened channel slab
        # w_ref:  (G, L, C_tile)      per-shift summed weights, C_tile on lanes
        # b_ref:  (L, 1)              summed branch biases (f32)
        # o_ref:  (1, L, H*Wp)        lane-dense transposed output tile
        # acc_ref:(L, H*Wp) f32       persistent accumulator across the C (k) axis
        # rot:    optional (C_tile, rot_len) scratch for dw-deduped lane rotates
        k = pl.program_id(1)

        @pl.when(k == 0)
        def _init():                             # bias folded into the accumulator init
            acc_ref[...] = jnp.broadcast_to(b_ref[...], acc_ref.shape)

        g = 0
        for dw, dhs in plan:                     # unrolled at trace time; static offsets
            rotate = use_rot and (dw % 128 != 0)
            if rotate:
                # One lane-rotate per distinct dw: after this copy every per-dh
                # slice below starts at a multiple of Wp (a multiple of 128).
                rot[0][...] = x_ref[0, :, Wp + dw:Wp + dw + rot_len]
            for dh in dhs:
                if rotate:
                    s = (max_pad + dh) * Wp
                    xs = rot[0][:, s:s + M]
                else:
                    s = (1 + max_pad + dh) * Wp + dw
                    xs = x_ref[0, :, s:s + M]
                acc_ref[...] += jnp.dot(w_ref[g], xs,
                                        preferred_element_type=jnp.float32)
                g += 1

        @pl.when(k == n_k - 1)
        def _store():
            o_ref[0] = acc_ref[...].astype(o_ref.dtype)

    return kernel


def classifier_module_pallas(x_nchw, weights, biases, dilation_series,
                             padding_series, *, compute_dtype=None,
                             lane_align=None, c_tile=256):
    """Forward pass of Classifier_Module.

    x_nchw:  (N, C, H, W); weights[i]: (L, C, 3, 3) OIHW; biases[i]: (L,).
    compute_dtype: matmul operand dtype (jnp.bfloat16 recommended for
                   production); accumulation is always f32.
    lane_align: force/forbid rounding the padded row stride to 128 lanes
                (None = auto, only when the extra gutter cost is <50%).
    """
    assert list(dilation_series) == list(padding_series), \
        "Classifier_Module in AVS uses padding == dilation ('same' output)."
    N, C, H, W = x_nchw.shape
    L = weights[0].shape[0]
    max_pad = int(max(padding_series))
    cdtype = jnp.dtype(compute_dtype) if compute_dtype is not None else x_nchw.dtype

    # Padded row stride.  128-aligning it makes every per-row tap offset lane-
    # aligned and output stores unmasked, at the price of extra gutter columns;
    # only do it automatically when that waste stays small (review item 3 + 10).
    Wp_raw = W + 2 * max_pad
    Wp_128 = _round_up(Wp_raw, 128)
    if lane_align is None:
        lane_align = Wp_128 <= 1.5 * Wp_raw
    Wp = Wp_128 if lane_align else Wp_raw
    Hp = H + 2 * max_pad + 2                     # one slack zero row top & bottom
    flat_len = Hp * Wp
    M = H * Wp
    rot_len = (H + 2 * max_pad) * Wp

    # Channel (contraction) tiling so production C never needs a full-C block.
    if C <= c_tile:
        C_tile, C_padded = C, C
    else:
        C_tile = c_tile                          # multiple of 128 (weight lane dim)
        C_padded = _round_up(C, C_tile)
    n_k = C_padded // C_tile

    # Zero-pad once (halo rows/cols + zero channels) and flatten spatial dims.
    # TODO(synk): build the halo in-kernel via make_async_copy at production
    # sizes to avoid this extra padded-copy HBM round trip.
    x_pad = jnp.pad(
        x_nchw,
        ((0, 0), (0, C_padded - C),
         (1 + max_pad, max_pad + 1), (max_pad, Wp - W - max_pad)))
    x_flat = x_pad.reshape(N, C_padded, flat_len).astype(cdtype)

    # Group taps by shift; the centre tap of every branch fuses into one matmul.
    plan, w_g = _build_shift_plan(weights, dilation_series)
    if C_padded != C:
        w_g = jnp.pad(w_g, ((0, 0), (0, 0), (0, C_padded - C)))
    w_g = w_g.astype(cdtype)
    G = w_g.shape[0]
    # Every branch adds its bias once per output element -> sum them.
    b_sum = jnp.sum(jnp.stack(biases, axis=0), axis=0)
    b_sum = b_sum.astype(jnp.float32).reshape(L, 1)

    use_rot = (Wp % 128 == 0) and any(dw % 128 != 0 for dw, _ in plan)
    kernel = _make_kernel(plan, max_pad=max_pad, Wp=Wp, H=H, n_k=n_k,
                          use_rot=use_rot)

    scratch = [pltpu.VMEM((L, M), jnp.float32)]
    if use_rot:
        scratch.append(pltpu.VMEM((C_tile, rot_len), cdtype))

    # Explicit scoped-VMEM budget: double-buffered blocks + scratch (+20%),
    # clipped to v7x's 64 MiB physical VMEM.
    isz = jnp.dtype(cdtype).itemsize
    osz = jnp.dtype(x_nchw.dtype).itemsize
    est = (2 * C_tile * flat_len * isz + 2 * G * L * C_tile * isz
           + 2 * L * M * osz + _round_up(L, 8) * M * 4
           + (C_tile * rot_len * isz if use_rot else 0))
    vmem_limit = int(min(max(est * 1.2, 32 * 2**20), 64 * 2**20))

    out_wide = pl.pallas_call(
        kernel,
        out_shape=jax.ShapeDtypeStruct((N, L, M), x_nchw.dtype),
        grid=(N, n_k),
        in_specs=[
            pl.BlockSpec((1, C_tile, flat_len), lambda n, k: (n, k, 0)),
            pl.BlockSpec((G, L, C_tile), lambda n, k: (0, 0, k)),
            pl.BlockSpec((L, 1), lambda n, k: (0, 0)),
        ],
        out_specs=pl.BlockSpec((1, L, M), lambda n, k: (n, 0, 0)),
        scratch_shapes=scratch,
        compiler_params=pltpu.CompilerParams(
            dimension_semantics=("parallel", "arbitrary"),
            vmem_limit_bytes=vmem_limit),
    )(x_flat, w_g, b_sum)

    # Strip the gutter columns; pure reshape + slice (output is already NCHW-ordered).
    return out_wide.reshape(N, L, H, Wp)[:, :, :, max_pad:max_pad + W]


def _reference_nchw(x, weights, biases, dilations, paddings):
    out = None
    for wi, bi, d, p in zip(weights, biases, dilations, paddings):
        y = jax.lax.conv_general_dilated(
            x, wi, window_strides=(1, 1),
            padding=[(p, p), (p, p)],
            rhs_dilation=(d, d),
            dimension_numbers=("NCHW", "OIHW", "NCHW"),
            precision=jax.lax.Precision.HIGHEST,
        ) + bi[None, :, None, None]
        out = y if out is None else out + y
    return out


if __name__ == "__main__":
    key = jax.random.PRNGKey(0)

    def make_case(k, N, C, H, W, NoLabels, dilation_series):
        n_br = len(dilation_series)
        keys = jax.random.split(k, 1 + 2 * n_br)
        x = jax.random.normal(keys[0], (N, C, H, W), dtype=jnp.float32)
        weights, biases = [], []
        for i in range(n_br):
            # m.weight.data.normal_(0, 0.01)
            weights.append(0.01 * jax.random.normal(
                keys[1 + 2 * i], (NoLabels, C, 3, 3), dtype=jnp.float32))
            biases.append(0.1 * jax.random.normal(
                keys[2 + 2 * i], (NoLabels,), dtype=jnp.float32))
        return x, weights, biases

    k1, k2 = jax.random.split(key)

    # Case 1: module-sized toy shapes (matches the spec's forward); auto layout.
    dil1 = [1, 2, 3, 6]
    x1, w1, b1 = make_case(k1, 2, 4, 16, 16, 3, dil1)
    out1 = jax.block_until_ready(classifier_module_pallas(x1, w1, b1, dil1, dil1))
    ref1 = _reference_nchw(x1, w1, b1, dil1, dil1)
    assert out1.shape == (2, 3, 16, 16)
    assert jnp.allclose(out1, ref1, atol=1e-4, rtol=1e-4), \
        float(jnp.max(jnp.abs(out1 - ref1)))

    # Case 2: exercises the C-reduction grid axis (C > c_tile, channel padding)
    # and the 128-aligned row stride + dw-deduped lane-rotate scratch path.
    dil2 = [1, 3]
    x2, w2, b2 = make_case(k2, 1, 320, 8, 8, 3, dil2)
    out2 = jax.block_until_ready(
        classifier_module_pallas(x2, w2, b2, dil2, dil2,
                                 lane_align=True, c_tile=256))
    ref2 = _reference_nchw(x2, w2, b2, dil2, dil2)
    assert out2.shape == (1, 3, 8, 8)
    assert jnp.allclose(out2, ref2, atol=1e-3, rtol=1e-3), \
        float(jnp.max(jnp.abs(out2 - ref2)))

    # Case 3: bf16 operands (production path), f32 accumulation.
    out3 = jax.block_until_ready(
        classifier_module_pallas(x1, w1, b1, dil1, dil1,
                                 compute_dtype=jnp.bfloat16))
    assert jnp.allclose(out3, ref1, atol=1e-2, rtol=5e-2), \
        float(jnp.max(jnp.abs(out3 - ref1)))

    print("KERNEL_OK")
</pallas_src>

<mosaic_0001>
module attributes {stable_mosaic.version = 11 : i64} {
  func.func @kernel(%arg0: i32, %arg1: i32, %arg2: memref<1x4x840xf32, #tpu.memory_space<vmem>>, %arg3: memref<33x3x4xf32, #tpu.memory_space<vmem>>, %arg4: memref<3x1xf32, #tpu.memory_space<vmem>>, %arg5: memref<1x3x448xf32, #tpu.memory_space<vmem>>, %arg6: memref<3x448xf32, #tpu.memory_space<vmem>>) attributes {dimension_semantics = [#tpu.dimension_semantics<parallel>, #tpu.dimension_semantics<arbitrary>], iteration_bounds = array<i64: 2, 1>, scalar_prefetch = 0 : i64, scratch_operands = 1 : i64, tpu.core_type = #tpu.core_type<tc>, window_params = [{transform_indices = @transform_0, window_bounds = array<i64: 1, 4, 840>}, {transform_indices = @transform_1, window_bounds = array<i64: 33, 3, 4>}, {pipeline_mode = #tpu.pipeline_mode<synchronous>, transform_indices = @transform_2, window_bounds = array<i64: 3, 1>}, {transform_indices = @transform_3, window_bounds = array<i64: 1, 3, 448>}]} {
    %c0_i32 = arith.constant 0 : i32
    %0 = arith.cmpi eq, %arg1, %c0_i32 : i32
    %1 = arith.extui %0 : i1 to i32
    %c0_i32_0 = arith.constant 0 : i32
    %2 = arith.cmpi ne, %1, %c0_i32_0 : i32
    scf.if %2 {
      %c0_301 = arith.constant 0 : index
      %c0_302 = arith.constant 0 : index
      %270 = vector.load %arg4[%c0_301, %c0_302] : memref<3x1xf32, #tpu.memory_space<vmem>>, vector<3x1xf32>
      %271 = vector.shape_cast %270 : vector<3x1xf32> to vector<3x1xf32>
      %272 = vector.broadcast %271 : vector<3x1xf32> to vector<3x448xf32>
      %c0_303 = arith.constant 0 : index
      %c0_304 = arith.constant 0 : index
      %273 = vector.load %arg6[%c0_303, %c0_304] : memref<3x448xf32, #tpu.memory_space<vmem>>, vector<3x448xf32>
      tpu.vector_store %arg6[%c0_303, %c0_304], %272 {strides = array<i32>} : memref<3x448xf32, #tpu.memory_space<vmem>>, vector<3x448xf32>,
    } else {
    }
    %c0 = arith.constant 0 : index
    %c0_1 = arith.constant 0 : index
    %c22 = arith.constant 22 : index
    %3 = vector.load %arg2[%c0, %c0_1, %c22] : memref<1x4x840xf32, #tpu.memory_space<vmem>>, vector<1x4x448xf32>
    %4 = vector.shape_cast %3 : vector<1x4x448xf32> to vector<4x448xf32>
    %c0_2 = arith.constant 0 : index
    %c0_3 = arith.constant 0 : index
    %5 = vector.load %arg6[%c0_2, %c0_3] : memref<3x448xf32, #tpu.memory_space<vmem>>, vector<3x448xf32>
    %c0_4 = arith.constant 0 : index
    %c0_5 = arith.constant 0 : index
    %c0_6 = arith.constant 0 : index
    %6 = vector.load %arg3[%c0_4, %c0_5, %c0_6] : memref<33x3x4xf32, #tpu.memory_space<vmem>>, vector<1x3x4xf32>
    %7 = vector.shape_cast %6 : vector<1x3x4xf32> to vector<3x4xf32>
    %cst = arith.constant dense<0.000000e+00> : vector<3x448xf32>
    %8 = tpu.matmul %7, %4, %cst {dimension_numbers = #tpu.dot_dimension_numbers<[1], [0], [0], [1], [0, 0, 1, 1], [], []>} : vector<3x4xf32>, vector<4x448xf32>, vector<3x448xf32> -> vector<3x448xf32>
    %9 = arith.addf %5, %8 : vector<3x448xf32>
    %c0_7 = arith.constant 0 : index
    %c0_8 = arith.constant 0 : index
    %10 = vector.load %arg6[%c0_7, %c0_8] : memref<3x448xf32, #tpu.memory_space<vmem>>, vector<3x448xf32>
    tpu.vector_store %arg6[%c0_7, %c0_8], %9 {strides = array<i32>} : memref<3x448xf32, #tpu.memory_space<vmem>>, vector<3x448xf32>,
    %c0_9 = arith.constant 0 : index
    %c0_10 = arith.constant 0 : index
    %c190 = arith.constant 190 : index
    %11 = vector.load %arg2[%c0_9, %c0_10, %c190] : memref<1x4x840xf32, #tpu.memory_space<vmem>>, vector<1x4x448xf32>
    %12 = vector.shape_cast %11 : vector<1x4x448xf32> to vector<4x448xf32>
    %c0_11 = arith.constant 0 : index
    %c0_12 = arith.constant 0 : index
    %13 = vector.load %arg6[%c0_11, %c0_12] : memref<3x448xf32, #tpu.memory_space<vmem>>, vector<3x448xf32>
    %c1 = arith.constant 1 : index
    %c0_13 = arith.constant 0 : index
    %c0_14 = arith.constant 0 : index
    %14 = vector.load %arg3[%c1, %c0_13, %c0_14] : memref<33x3x4xf32, #tpu.memory_space<vmem>>, vector<1x3x4xf32>
    %15 = vector.shape_cast %14 : vector<1x3x4xf32> to vector<3x4xf32>
    %cst_15 = arith.constant dense<0.000000e+00> : vector<3x448xf32>
    %16 = tpu.matmul %15, %12, %cst_15 {dimension_numbers = #tpu.dot_dimension_numbers<[1], [0], [0], [1], [0, 0, 1, 1], [], []>} : vector<3x4xf32>, vector<4x448xf32>, vector<3x448xf32> -> vector<3x448xf32>
    %17 = arith.addf %13, %16 : vector<3x448xf32>
    %c0_16 = arith.constant 0 : index
    %c0_17 = arith.constant 0 : index
    %18 = vector.load %arg6[%c0_16, %c0_17] : memref<3x448xf32, #tpu.memory_space<vmem>>, vector<3x448xf32>
    tpu.vector_store %arg6[%c0_16, %c0_17], %17 {strides = array<i32>} : memref<3x448xf32, #tpu.memory_space<vmem>>, vector<3x448xf32>,
    %c0_18 = arith.constant 0 : index
    %c0_19 = arith.constant 0 : index
    %c358 = arith.constant 358 : index
    %19 = vector.load %arg2[%c0_18, %c0_19, %c358] : memref<1x4x840xf32, #tpu.memory_space<vmem>>, vector<1x4x448xf32>
    %20 = vector.shape_cast %19 : vector<1x4x448xf32> to vector<4x448xf32>
    %c0_20 = arith.constant 0 : index
    %c0_21 = arith.constant 0 : index
    %21 = vector.load %arg6[%c0_20, %c0_21] : memref<3x448xf32, #tpu.memory_space<vmem>>, vector<3x448xf32>
    %c2 = arith.constant 2 : index
    %c0_22 = arith.constant 0 : index
    %c0_23 = arith.constant 0 : index
    %22 = vector.load %arg3[%c2, %c0_22, %c0_23] : memref<33x3x4xf32, #tpu.memory_space<vmem>>, vector<1x3x4xf32>
    %23 = vector.shape_cast %22 : vector<1x3x4xf32> to vector<3x4xf32>
    %cst_24 = arith.constant dense<0.000000e+00> : vector<3x448xf32>
    %24 = tpu.matmul %23, %20, %cst_24 {dimension_numbers = #tpu.dot_dimension_numbers<[1], [0], [0], [1], [0, 0, 1, 1], [], []>} : vector<3x4xf32>, vector<4x448xf32>, vector<3x448xf32> -> vector<3x448xf32>
    %25 = arith.addf %21, %24 : vector<3x448xf32>
    %c0_25 = arith.constant 0 : index
    %c0_26 = arith.constant 0 : index
    %26 = vector.load %arg6[%c0_25, %c0_26] : memref<3x448xf32, #tpu.memory_space<vmem>>, vector<3x448xf32>
    tpu.vector_store %arg6[%c0_25, %c0_26], %25 {strides = array<i32>} : memref<3x448xf32, #tpu.memory_space<vmem>>, vector<3x448xf32>,
    %c0_27 = arith.constant 0 : index
    %c0_28 = arith.constant 0 : index
    %c109 = arith.constant 109 : index
    %27 = vector.load %arg2[%c0_27, %c0_28, %c109] : memref<1x4x840xf32, #tpu.memory_space<vmem>>, vector<1x4x448xf32>
    %28 = vector.shape_cast %27 : vector<1x4x448xf32> to vector<4x448xf32>
    %c0_29 = arith.constant 0 : index
    %c0_30 = arith.constant 0 : index
    %29 = vector.load %arg6[%c0_29, %c0_30] : memref<3x448xf32, #tpu.memory_space<vmem>>, vector<3x448xf32>
    %c3 = arith.constant 3 : index
    %c0_31 = arith.constant 0 : index
    %c0_32 = arith.constant 0 : index
    %30 = vector.load %arg3[%c3, %c0_31, %c0_32] : memref<33x3x4xf32, #tpu.memory_space<vmem>>, vector<1x3x4xf32>
    %31 = vector.shape_cast %30 : vector<1x3x4xf32> to vector<3x4xf32>
    %cst_33 = arith.constant dense<0.000000e+00> : vector<3x448xf32>
    %32 = tpu.matmul %31, %28, %cst_33 {dimension_numbers = #tpu.dot_dimension_numbers<[1], [0], [0], [1], [0, 0, 1, 1], [], []>} : vector<3x4xf32>, vector<4x448xf32>, vector<3x448xf32> -> vector<3x448xf32>
    %33 = arith.addf %29, %32 : vector<3x448xf32>
    %c0_34 = arith.constant 0 : index
    %c0_35 = arith.constant 0 : index
    %34 = vector.load %arg6[%c0_34, %c0_35] : memref<3x448xf32, #tpu.memory_space<vmem>>, vector<3x448xf32>
    tpu.vector_store %arg6[%c0_34, %c0_35], %33 {strides = array<i32>} : memref<3x448xf32, #tpu.memory_space<vmem>>, vector<3x448xf32>,
    %c0_36 = arith.constant 0 : index
    %c0_37 = arith.constant 0 : index
    %c193 = arith.constant 193 : index
    %35 = vector.load %arg2[%c0_36, %c0_37, %c193] : memref<1x4x840xf32, #tpu.memory_space<vmem>>, vector<1x4x448xf32>
    %36 = vector.shape_cast %35 : vector<1x4x448xf32> to vector<4x448xf32>
    %c0_38 = arith.constant 0 : index
    %c0_39 = arith.constant 0 : index
    %37 = vector.load %arg6[%c0_38, %c0_39] : memref<3x448xf32, #tpu.memory_space<vmem>>, vector<3x448xf32>
    %c4 = arith.constant 4 : index
    %c0_40 = arith.constant 0 : index
    %c0_41 = arith.constant 0 : index
    %38 = vector.load %arg3[%c4, %c0_40, %c0_41] : memref<33x3x4xf32, #tpu.memory_space<vmem>>, vector<1x3x4xf32>
    %39 = vector.shape_cast %38 : vector<1x3x4xf32> to vector<3x4xf32>
    %cst_42 = arith.constant dense<0.000000e+00> : vector<3x448xf32>
    %40 = tpu.matmul %39, %36, %cst_42 {dimension_numbers = #tpu.dot_dimension_numbers<[1], [0], [0], [1], [0, 0, 1, 1], [], []>} : vector<3x4xf32>, vector<4x448xf32>, vector<3x448xf32> -> vector<3x448xf32>
    %41 = arith.addf %37, %40 : vector<3x448xf32>
    %c0_43 = arith.constant 0 : index
    %c0_44 = arith.constant 0 : index
    %42 = vector.load %arg6[%c0_43, %c0_44] : memref<3x448xf32, #tpu.memory_space<vmem>>, vector<3x448xf32>
    tpu.vector_store %arg6[%c0_43, %c0_44], %41 {strides = array<i32>} : memref<3x448xf32, #tpu.memory_space<vmem>>, vector<3x448xf32>,
    %c0_45 = arith.constant 0 : index
    %c0_46 = arith.constant 0 : index
    %c277 = arith.constant 277 : index
    %43 = vector.load %arg2[%c0_45, %c0_46, %c277] : memref<1x4x840xf32, #tpu.memory_space<vmem>>, vector<1x4x448xf32>
    %44 = vector.shape_cast %43 : vector<1x4x448xf32> to vector<4x448xf32>
    %c0_47 = arith.constant 0 : index
    %c0_48 = arith.constant 0 : index
    %45 = vector.load %arg6[%c0_47, %c0_48] : memref<3x448xf32, #tpu.memory_space<vmem>>, vector<3x448xf32>
    %c5 = arith.constant 5 : index
    %c0_49 = arith.constant 0 : index
    %c0_50 = arith.constant 0 : index
    %46 = vector.load %arg3[%c5, %c0_49, %c0_50] : memref<33x3x4xf32, #tpu.memory_space<vmem>>, vector<1x3x4xf32>
    %47 = vector.shape_cast %46 : vector<1x3x4xf32> to vector<3x4xf32>
    %cst_51 = arith.constant dense<0.000000e+00> : vector<3x448xf32>
    %48 = tpu.matmul %47, %44, %cst_51 {dimension_numbers = #tpu.dot_dimension_numbers<[1], [0], [0], [1], [0, 0, 1, 1], [], []>} : vector<3x4xf32>, vector<4x448xf32>, vector<3x448xf32> -> vector<3x448xf32>
    %49 = arith.addf %45, %48 : vector<3x448xf32>
    %c0_52 = arith.constant 0 : index
    %c0_53 = arith.constant 0 : index
    %50 = vector.load %arg6[%c0_52, %c0_53] : memref<3x448xf32, #tpu.memory_space<vmem>>, vector<3x448xf32>
    tpu.vector_store %arg6[%c0_52, %c0_53], %49 {strides = array<i32>} : memref<3x448xf32, #tpu.memory_space<vmem>>, vector<3x448xf32>,
    %c0_54 = arith.constant 0 : index
    %c0_55 = arith.constant 0 : index
    %c138 = arith.constant 138 : index
    %51 = vector.load %arg2[%c0_54, %c0_55, %c138] : memref<1x4x840xf32, #tpu.memory_space<vmem>>, vector<1x4x448xf32>
    %52 = vector.shape_cast %51 : vector<1x4x448xf32> to vector<4x448xf32>
    %c0_56 = arith.constant 0 : index
    %c0_57 = arith.constant 0 : index
    %53 = vector.load %arg6[%c0_56, %c0_57] : memref<3x448xf32, #tpu.memory_space<vmem>>, vector<3x448xf32>
    %c6 = arith.constant 6 : index
    %c0_58 = arith.constant 0 : index
    %c0_59 = arith.constant 0 : index
    %54 = vector.load %arg3[%c6, %c0_58, %c0_59] : memref<33x3x4xf32, #tpu.memory_space<vmem>>, vector<1x3x4xf32>
    %55 = vector.shape_cast %54 : vector<1x3x4xf32> to vector<3x4xf32>
    %cst_60 = arith.constant dense<0.000000e+00> : vector<3x448xf32>
    %56 = tpu.matmul %55, %52, %cst_60 {dimension_numbers = #tpu.dot_dimension_numbers<[1], [0], [0], [1], [0, 0, 1, 1], [], []>} : vector<3x4xf32>, vector<4x448xf32>, vector<3x448xf32> -> vector<3x448xf32>
    %57 = arith.addf %53, %56 : vector<3x448xf32>
    %c0_61 = arith.constant 0 : index
    %c0_62 = arith.constant 0 : index
    %58 = vector.load %arg6[%c0_61, %c0_62] : memref<3x448xf32, #tpu.memory_space<vmem>>, vector<3x448xf32>
    tpu.vector_store %arg6[%c0_61, %c0_62], %57 {strides = array<i32>} : memref<3x448xf32, #tpu.memory_space<vmem>>, vector<3x448xf32>,
    %c0_63 = arith.constant 0 : index
    %c0_64 = arith.constant 0 : index
    %c194 = arith.constant 194 : index
    %59 = vector.load %arg2[%c0_63, %c0_64, %c194] : memref<1x4x840xf32, #tpu.memory_space<vmem>>, vector<1x4x448xf32>
    %60 = vector.shape_cast %59 : vector<1x4x448xf32> to vector<4x448xf32>
    %c0_65 = arith.constant 0 : index
    %c0_66 = arith.constant 0 : index
    %61 = vector.load %arg6[%c0_65, %c0_66] : memref<3x448xf32, #tpu.memory_space<vmem>>, vector<3x448xf32>
    %c7 = arith.constant 7 : index
    %c0_67 = arith.constant 0 : index
    %c0_68 = arith.constant 0 : index
    %62 = vector.load %arg3[%c7, %c0_67, %c0_68] : memref<33x3x4xf32, #tpu.memory_space<vmem>>, vector<1x3x4xf32>
    %63 = vector.shape_cast %62 : vector<1x3x4xf32> to vector<3x4xf32>
    %cst_69 = arith.constant dense<0.000000e+00> : vector<3x448xf32>
    %64 = tpu.matmul %63, %60, %cst_69 {dimension_numbers = #tpu.dot_dimension_numbers<[1], [0], [0], [1], [0, 0, 1, 1], [], []>} : vector<3x4xf32>, vector<4x448xf32>, vector<3x448xf32> -> vector<3x448xf32>
    %65 = arith.addf %61, %64 : vector<3x448xf32>
    %c0_70 = arith.constant 0 : index
    %c0_71 = arith.constant 0 : index
    %66 = vector.load %arg6[%c0_70, %c0_71] : memref<3x448xf32, #tpu.memory_space<vmem>>, vector<3x448xf32>
    tpu.vector_store %arg6[%c0_70, %c0_71], %65 {strides = array<i32>} : memref<3x448xf32, #tpu.memory_space<vmem>>, vector<3x448xf32>,
    %c0_72 = arith.constant 0 : index
    %c0_73 = arith.constant 0 : index
    %c250 = arith.constant 250 : index
    %67 = vector.load %arg2[%c0_72, %c0_73, %c250] : memref<1x4x840xf32, #tpu.memory_space<vmem>>, vector<1x4x448xf32>
    %68 = vector.shape_cast %67 : vector<1x4x448xf32> to vector<4x448xf32>
    %c0_74 = arith.constant 0 : index
    %c0_75 = arith.constant 0 : index
    %69 = vector.load %arg6[%c0_74, %c0_75] : memref<3x448xf32, #tpu.memory_space<vmem>>, vector<3x448xf32>
    %c8 = arith.constant 8 : index
    %c0_76 = arith.constant 0 : index
    %c0_77 = arith.constant 0 : index
    %70 = vector.load %arg3[%c8, %c0_76, %c0_77] : memref<33x3x4xf32, #tpu.memory_space<vmem>>, vector<1x3x4xf32>
    %71 = vector.shape_cast %70 : vector<1x3x4xf32> to vector<3x4xf32>
    %cst_78 = arith.constant dense<0.000000e+00> : vector<3x448xf32>
    %72 = tpu.matmul %71, %68, %cst_78 {dimension_numbers = #tpu.dot_dimension_numbers<[1], [0], [0], [1], [0, 0, 1, 1], [], []>} : vector<3x4xf32>, vector<4x448xf32>, vector<3x448xf32> -> vector<3x448xf32>
    %73 = arith.addf %69, %72 : vector<3x448xf32>
    %c0_79 = arith.constant 0 : index
    %c0_80 = arith.constant 0 : index
    %74 = vector.load %arg6[%c0_79, %c0_80] : memref<3x448xf32, #tpu.memory_space<vmem>>, vector<3x448xf32>
    tpu.vector_store %arg6[%c0_79, %c0_80], %73 {strides = array<i32>} : memref<3x448xf32, #tpu.memory_space<vmem>>, vector<3x448xf32>,
    %c0_81 = arith.constant 0 : index
    %c0_82 = arith.constant 0 : index
    %c167 = arith.constant 167 : index
    %75 = vector.load %arg2[%c0_81, %c0_82, %c167] : memref<1x4x840xf32, #tpu.memory_space<vmem>>, vector<1x4x448xf32>
    %76 = vector.shape_cast %75 : vector<1x4x448xf32> to vector<4x448xf32>
    %c0_83 = arith.constant 0 : index
    %c0_84 = arith.constant 0 : index
    %77 = vector.load %arg6[%c0_83, %c0_84] : memref<3x448xf32, #tpu.memory_space<vmem>>, vector<3x448xf32>
    %c9 = arith.constant 9 : index
    %c0_85 = arith.constant 0 : index
    %c0_86 = arith.constant 0 : index
    %78 = vector.load %arg3[%c9, %c0_85, %c0_86] : memref<33x3x4xf32, #tpu.memory_space<vmem>>, vector<1x3x4xf32>
    %79 = vector.shape_cast %78 : vector<1x3x4xf32> to vector<3x4xf32>
    %cst_87 = arith.constant dense<0.000000e+00> : vector<3x448xf32>
    %80 = tpu.matmul %79, %76, %cst_87 {dimension_numbers = #tpu.dot_dimension_numbers<[1], [0], [0], [1], [0, 0, 1, 1], [], []>} : vector<3x4xf32>, vector<4x448xf32>, vector<3x448xf32> -> vector<3x448xf32>
    %81 = arith.addf %77, %80 : vector<3x448xf32>
    %c0_88 = arith.constant 0 : index
    %c0_89 = arith.constant 0 : index
    %82 = vector.load %arg6[%c0_88, %c0_89] : memref<3x448xf32, #tpu.memory_space<vmem>>, vector<3x448xf32>
    tpu.vector_store %arg6[%c0_88, %c0_89], %81 {strides = array<i32>} : memref<3x448xf32, #tpu.memory_space<vmem>>, vector<3x448xf32>,
    %c0_90 = arith.constant 0 : index
    %c0_91 = arith.constant 0 : index
    %c195 = arith.constant 195 : index
    %83 = vector.load %arg2[%c0_90, %c0_91, %c195] : memref<1x4x840xf32, #tpu.memory_space<vmem>>, vector<1x4x448xf32>
    %84 = vector.shape_cast %83 : vector<1x4x448xf32> to vector<4x448xf32>
    %c0_92 = arith.constant 0 : index
    %c0_93 = arith.constant 0 : index
    %85 = vector.load %arg6[%c0_92, %c0_93] : memref<3x448xf32, #tpu.memory_space<vmem>>, vector<3x448xf32>
    %c10 = arith.constant 10 : index
    %c0_94 = arith.constant 0 : index
    %c0_95 = arith.constant 0 : index
    %86 = vector.load %arg3[%c10, %c0_94, %c0_95] : memref<33x3x4xf32, #tpu.memory_space<vmem>>, vector<1x3x4xf32>
    %87 = vector.shape_cast %86 : vector<1x3x4xf32> to vector<3x4xf32>
    %cst_96 = arith.constant dense<0.000000e+00> : vector<3x448xf32>
    %88 = tpu.matmul %87, %84, %cst_96 {dimension_numbers = #tpu.dot_dimension_numbers<[1], [0], [0], [1], [0, 0, 1, 1], [], []>} : vector<3x4xf32>, vector<4x448xf32>, vector<3x448xf32> -> vector<3x448xf32>
    %89 = arith.addf %85, %88 : vector<3x448xf32>
    %c0_97 = arith.constant 0 : index
    %c0_98 = arith.constant 0 : index
    %90 = vector.load %arg6[%c0_97, %c0_98] : memref<3x448xf32, #tpu.memory_space<vmem>>, vector<3x448xf32>
    tpu.vector_store %arg6[%c0_97, %c0_98], %89 {strides = array<i32>} : memref<3x448xf32, #tpu.memory_space<vmem>>, vector<3x448xf32>,
    %c0_99 = arith.constant 0 : index
    %c0_100 = arith.constant 0 : index
    %c223 = arith.constant 223 : index
    %91 = vector.load %arg2[%c0_99, %c0_100, %c223] : memref<1x4x840xf32, #tpu.memory_space<vmem>>, vector<1x4x448xf32>
    %92 = vector.shape_cast %91 : vector<1x4x448xf32> to vector<4x448xf32>
    %c0_101 = arith.constant 0 : index
    %c0_102 = arith.constant 0 : index
    %93 = vector.load %arg6[%c0_101, %c0_102] : memref<3x448xf32, #tpu.memory_space<vmem>>, vector<3x448xf32>
    %c11 = arith.constant 11 : index
    %c0_103 = arith.constant 0 : index
    %c0_104 = arith.constant 0 : index
    %94 = vector.load %arg3[%c11, %c0_103, %c0_104] : memref<33x3x4xf32, #tpu.memory_space<vmem>>, vector<1x3x4xf32>
    %95 = vector.shape_cast %94 : vector<1x3x4xf32> to vector<3x4xf32>
    %cst_105 = arith.constant dense<0.000000e+00> : vector<3x448xf32>
    %96 = tpu.matmul %95, %92, %cst_105 {dimension_numbers = #tpu.dot_dimension_numbers<[1], [0], [0], [1], [0, 0, 1, 1], [], []>} : vector<3x4xf32>, vector<4x448xf32>, vector<3x448xf32> -> vector<3x448xf32>
    %97 = arith.addf %93, %96 : vector<3x448xf32>
    %c0_106 = arith.constant 0 : index
    %c0_107 = arith.constant 0 : index
    %98 = vector.load %arg6[%c0_106, %c0_107] : memref<3x448xf32, #tpu.memory_space<vmem>>, vector<3x448xf32>
    tpu.vector_store %arg6[%c0_106, %c0_107], %97 {strides = array<i32>} : memref<3x448xf32, #tpu.memory_space<vmem>>, vector<3x448xf32>,
    %c0_108 = arith.constant 0 : index
    %c0_109 = arith.constant 0 : index
    %c28 = arith.constant 28 : index
    %99 = vector.load %arg2[%c0_108, %c0_109, %c28] : memref<1x4x840xf32, #tpu.memory_space<vmem>>, vector<1x4x448xf32>
    %100 = vector.shape_cast %99 : vector<1x4x448xf32> to vector<4x448xf32>
    %c0_110 = arith.constant 0 : index
    %c0_111 = arith.constant 0 : index
    %101 = vector.load %arg6[%c0_110, %c0_111] : memref<3x448xf32, #tpu.memory_space<vmem>>, vector<3x448xf32>
    %c12 = arith.constant 12 : index
    %c0_112 = arith.constant 0 : index
    %c0_113 = arith.constant 0 : index
    %102 = vector.load %arg3[%c12, %c0_112, %c0_113] : memref<33x3x4xf32, #tpu.memory_space<vmem>>, vector<1x3x4xf32>
    %103 = vector.shape_cast %102 : vector<1x3x4xf32> to vector<3x4xf32>
    %cst_114 = arith.constant dense<0.000000e+00> : vector<3x448xf32>
    %104 = tpu.matmul %103, %100, %cst_114 {dimension_numbers = #tpu.dot_dimension_numbers<[1], [0], [0], [1], [0, 0, 1, 1], [], []>} : vector<3x4xf32>, vector<4x448xf32>, vector<3x448xf32> -> vector<3x448xf32>
    %105 = arith.addf %101, %104 : vector<3x448xf32>
    %c0_115 = arith.constant 0 : index
    %c0_116 = arith.constant 0 : index
    %106 = vector.load %arg6[%c0_115, %c0_116] : memref<3x448xf32, #tpu.memory_space<vmem>>, vector<3x448xf32>
    tpu.vector_store %arg6[%c0_115, %c0_116], %105 {strides = array<i32>} : memref<3x448xf32, #tpu.memory_space<vmem>>, vector<3x448xf32>,
    %c0_117 = arith.constant 0 : index
    %c0_118 = arith.constant 0 : index
    %c112 = arith.constant 112 : index
    %107 = vector.load %arg2[%c0_117, %c0_118, %c112] : memref<1x4x840xf32, #tpu.memory_space<vmem>>, vector<1x4x448xf32>
    %108 = vector.shape_cast %107 : vector<1x4x448xf32> to vector<4x448xf32>
    %c0_119 = arith.constant 0 : index
    %c0_120 = arith.constant 0 : index
    %109 = vector.load %arg6[%c0_119, %c0_120] : memref<3x448xf32, #tpu.memory_space<vmem>>, vector<3x448xf32>
    %c13 = arith.constant 13 : index
    %c0_121 = arith.constant 0 : index
    %c0_122 = arith.constant 0 : index
    %110 = vector.load %arg3[%c13, %c0_121, %c0_122] : memref<33x3x4xf32, #tpu.memory_space<vmem>>, vector<1x3x4xf32>
    %111 = vector.shape_cast %110 : vector<1x3x4xf32> to vector<3x4xf32>
    %cst_123 = arith.constant dense<0.000000e+00> : vector<3x448xf32>
    %112 = tpu.matmul %111, %108, %cst_123 {dimension_numbers = #tpu.dot_dimension_numbers<[1], [0], [0], [1], [0, 0, 1, 1], [], []>} : vector<3x4xf32>, vector<4x448xf32>, vector<3x448xf32> -> vector<3x448xf32>
    %113 = arith.addf %109, %112 : vector<3x448xf32>
    %c0_124 = arith.constant 0 : index
    %c0_125 = arith.constant 0 : index
    %114 = vector.load %arg6[%c0_124, %c0_125] : memref<3x448xf32, #tpu.memory_space<vmem>>, vector<3x448xf32>
    tpu.vector_store %arg6[%c0_124, %c0_125], %113 {strides = array<i32>} : memref<3x448xf32, #tpu.memory_space<vmem>>, vector<3x448xf32>,
    %c0_126 = arith.constant 0 : index
    %c0_127 = arith.constant 0 : index
    %c140 = arith.constant 140 : index
    %115 = vector.load %arg2[%c0_126, %c0_127, %c140] : memref<1x4x840xf32, #tpu.memory_space<vmem>>, vector<1x4x448xf32>
    %116 = vector.shape_cast %115 : vector<1x4x448xf32> to vector<4x448xf32>
    %c0_128 = arith.constant 0 : index
    %c0_129 = arith.constant 0 : index
    %117 = vector.load %arg6[%c0_128, %c0_129] : memref<3x448xf32, #tpu.memory_space<vmem>>, vector<3x448xf32>
    %c14 = arith.constant 14 : index
    %c0_130 = arith.constant 0 : index
    %c0_131 = arith.constant 0 : index
    %118 = vector.load %arg3[%c14, %c0_130, %c0_131] : memref<33x3x4xf32, #tpu.memory_space<vmem>>, vector<1x3x4xf32>
    %119 = vector.shape_cast %118 : vector<1x3x4xf32> to vector<3x4xf32>
    %cst_132 = arith.constant dense<0.000000e+00> : vector<3x448xf32>
    %120 = tpu.matmul %119, %116, %cst_132 {dimension_numbers = #tpu.dot_dimension_numbers<[1], [0], [0], [1], [0, 0, 1, 1], [], []>} : vector<3x4xf32>, vector<4x448xf32>, vector<3x448xf32> -> vector<3x448xf32>
    %121 = arith.addf %117, %120 : vector<3x448xf32>
    %c0_133 = arith.constant 0 : index
    %c0_134 = arith.constant 0 : index
    %122 = vector.load %arg6[%c0_133, %c0_134] : memref<3x448xf32, #tpu.memory_space<vmem>>, vector<3x448xf32>
    tpu.vector_store %arg6[%c0_133, %c0_134], %121 {strides = array<i32>} : memref<3x448xf32, #tpu.memory_space<vmem>>, vector<3x448xf32>,
    %c0_135 = arith.constant 0 : index
    %c0_136 = arith.constant 0 : index
    %c168 = arith.constant 168 : index
    %123 = vector.load %arg2[%c0_135, %c0_136, %c168] : memref<1x4x840xf32, #tpu.memory_space<vmem>>, vector<1x4x448xf32>
    %124 = vector.shape_cast %123 : vector<1x4x448xf32> to vector<4x448xf32>
    %c0_137 = arith.constant 0 : index
    %c0_138 = arith.constant 0 : index
    %125 = vector.load %arg6[%c0_137, %c0_138] : memref<3x448xf32, #tpu.memory_space<vmem>>, vector<3x448xf32>
    %c15 = arith.constant 15 : index
    %c0_139 = arith.constant 0 : index
    %c0_140 = arith.constant 0 : index
    %126 = vector.load %arg3[%c15, %c0_139, %c0_140] : memref<33x3x4xf32, #tpu.memory_space<vmem>>, vector<1x3x4xf32>
    %127 = vector.shape_cast %126 : vector<1x3x4xf32> to vector<3x4xf32>
    %cst_141 = arith.constant dense<0.000000e+00> : vector<3x448xf32>
    %128 = tpu.matmul %127, %124, %cst_141 {dimension_numbers = #tpu.dot_dimension_numbers<[1], [0], [0], [1], [0, 0, 1, 1], [], []>} : vector<3x4xf32>, vector<4x448xf32>, vector<3x448xf32> -> vector<3x448xf32>
    %129 = arith.addf %125, %128 : vector<3x448xf32>
    %c0_142 = arith.constant 0 : index
    %c0_143 = arith.constant 0 : index
    %130 = vector.load %arg6[%c0_142, %c0_143] : memref<3x448xf32, #tpu.memory_space<vmem>>, vector<3x448xf32>
    tpu.vector_store %arg6[%c0_142, %c0_143], %129 {strides = array<i32>} : memref<3x448xf32, #tpu.memory_space<vmem>>, vector<3x448xf32>,
    %c0_144 = arith.constant 0 : index
    %c0_145 = arith.constant 0 : index
    %c196 = arith.constant 196 : index
    %131 = vector.load %arg2[%c0_144, %c0_145, %c196] : memref<1x4x840xf32, #tpu.memory_space<vmem>>, vector<1x4x448xf32>
    %132 = vector.shape_cast %131 : vector<1x4x448xf32> to vector<4x448xf32>
    %c0_146 = arith.constant 0 : index
    %c0_147 = arith.constant 0 : index
    %133 = vector.load %arg6[%c0_146, %c0_147] : memref<3x448xf32, #tpu.memory_space<vmem>>, vector<3x448xf32>
    %c16 = arith.constant 16 : index
    %c0_148 = arith.constant 0 : index
    %c0_149 = arith.constant 0 : index
    %134 = vector.load %arg3[%c16, %c0_148, %c0_149] : memref<33x3x4xf32, #tpu.memory_space<vmem>>, vector<1x3x4xf32>
    %135 = vector.shape_cast %134 : vector<1x3x4xf32> to vector<3x4xf32>
    %cst_150 = arith.constant dense<0.000000e+00> : vector<3x448xf32>
    %136 = tpu.matmul %135, %132, %cst_150 {dimension_numbers = #tpu.dot_dimension_numbers<[1], [0], [0], [1], [0, 0, 1, 1], [], []>} : vector<3x4xf32>, vector<4x448xf32>, vector<3x448xf32> -> vector<3x448xf32>
    %137 = arith.addf %133, %136 : vector<3x448xf32>
    %c0_151 = arith.constant 0 : index
    %c0_152 = arith.constant 0 : index
    %138 = vector.load %arg6[%c0_151, %c0_152] : memref<3x448xf32, #tpu.memory_space<vmem>>, vector<3x448xf32>
    tpu.vector_store %arg6[%c0_151, %c0_152], %137 {strides = array<i32>} : memref<3x448xf32, #tpu.memory_space<vmem>>, vector<3x448xf32>,
    %c0_153 = arith.constant 0 : index
    %c0_154 = arith.constant 0 : index
    %c224 = arith.constant 224 : index
    %139 = vector.load %arg2[%c0_153, %c0_154, %c224] : memref<1x4x840xf32, #tpu.memory_space<vmem>>, vector<1x4x448xf32>
    %140 = vector.shape_cast %139 : vector<1x4x448xf32> to vector<4x448xf32>
    %c0_155 = arith.constant 0 : index
    %c0_156 = arith.constant 0 : index
    %141 = vector.load %arg6[%c0_155, %c0_156] : memref<3x448xf32, #tpu.memory_space<vmem>>, vector<3x448xf32>
    %c17 = arith.constant 17 : index
    %c0_157 = arith.constant 0 : index
    %c0_158 = arith.constant 0 : index
    %142 = vector.load %arg3[%c17, %c0_157, %c0_158] : memref<33x3x4xf32, #tpu.memory_space<vmem>>, vector<1x3x4xf32>
    %143 = vector.shape_cast %142 : vector<1x3x4xf32> to vector<3x4xf32>
    %cst_159 = arith.constant dense<0.000000e+00> : vector<3x448xf32>
    %144 = tpu.matmul %143, %140, %cst_159 {dimension_numbers = #tpu.dot_dimension_numbers<[1], [0], [0], [1], [0, 0, 1, 1], [], []>} : vector<3x4xf32>, vector<4x448xf32>, vector<3x448xf32> -> vector<3x448xf32>
    %145 = arith.addf %141, %144 : vector<3x448xf32>
    %c0_160 = arith.constant 0 : index
    %c0_161 = arith.constant 0 : index
    %146 = vector.load %arg6[%c0_160, %c0_161] : memref<3x448xf32, #tpu.memory_space<vmem>>, vector<3x448xf32>
    tpu.vector_store %arg6[%c0_160, %c0_161], %145 {strides = array<i32>} : memref<3x448xf32, #tpu.memory_space<vmem>>, vector<3x448xf32>,
    %c0_162 = arith.constant 0 : index
    %c0_163 = arith.constant 0 : index
    %c252 = arith.constant 252 : index
    %147 = vector.load %arg2[%c0_162, %c0_163, %c252] : memref<1x4x840xf32, #tpu.memory_space<vmem>>, vector<1x4x448xf32>
    %148 = vector.shape_cast %147 : vector<1x4x448xf32> to vector<4x448xf32>
    %c0_164 = arith.constant 0 : index
    %c0_165 = arith.constant 0 : index
    %149 = vector.load %arg6[%c0_164, %c0_165] : memref<3x448xf32, #tpu.memory_space<vmem>>, vector<3x448xf32>
    %c18 = arith.constant 18 : index
    %c0_166 = arith.constant 0 : index
    %c0_167 = arith.constant 0 : index
    %150 = vector.load %arg3[%c18, %c0_166, %c0_167] : memref<33x3x4xf32, #tpu.memory_space<vmem>>, vector<1x3x4xf32>
    %151 = vector.shape_cast %150 : vector<1x3x4xf32> to vector<3x4xf32>
    %cst_168 = arith.constant dense<0.000000e+00> : vector<3x448xf32>
    %152 = tpu.matmul %151, %148, %cst_168 {dimension_numbers = #tpu.dot_dimension_numbers<[1], [0], [0], [1], [0, 0, 1, 1], [], []>} : vector<3x4xf32>, vector<4x448xf32>, vector<3x448xf32> -> vector<3x448xf32>
    %153 = arith.addf %149, %152 : vector<3x448xf32>
    %c0_169 = arith.constant 0 : index
    %c0_170 = arith.constant 0 : index
    %154 = vector.load %arg6[%c0_169, %c0_170] : memref<3x448xf32, #tpu.memory_space<vmem>>, vector<3x448xf32>
    tpu.vector_store %arg6[%c0_169, %c0_170], %153 {strides = array<i32>} : memref<3x448xf32, #tpu.memory_space<vmem>>, vector<3x448xf32>,
    %c0_171 = arith.constant 0 : index
    %c0_172 = arith.constant 0 : index
    %c280 = arith.constant 280 : index
    %155 = vector.load %arg2[%c0_171, %c0_172, %c280] : memref<1x4x840xf32, #tpu.memory_space<vmem>>, vector<1x4x448xf32>
    %156 = vector.shape_cast %155 : vector<1x4x448xf32> to vector<4x448xf32>
    %c0_173 = arith.constant 0 : index
    %c0_174 = arith.constant 0 : index
    %157 = vector.load %arg6[%c0_173, %c0_174] : memref<3x448xf32, #tpu.memory_space<vmem>>, vector<3x448xf32>
    %c19 = arith.constant 19 : index
    %c0_175 = arith.constant 0 : index
    %c0_176 = arith.constant 0 : index
    %158 = vector.load %arg3[%c19, %c0_175, %c0_176] : memref<33x3x4xf32, #tpu.memory_space<vmem>>, vector<1x3x4xf32>
    %159 = vector.shape_cast %158 : vector<1x3x4xf32> to vector<3x4xf32>
    %cst_177 = arith.constant dense<0.000000e+00> : vector<3x448xf32>
    %160 = tpu.matmul %159, %156, %cst_177 {dimension_numbers = #tpu.dot_dimension_numbers<[1], [0], [0], [1], [0, 0, 1, 1], [], []>} : vector<3x4xf32>, vector<4x448xf32>, vector<3x448xf32> -> vector<3x448xf32>
    %161 = arith.addf %157, %160 : vector<3x448xf32>
    %c0_178 = arith.constant 0 : index
    %c0_179 = arith.constant 0 : index
    %162 = vector.load %arg6[%c0_178, %c0_179] : memref<3x448xf32, #tpu.memory_space<vmem>>, vector<3x448xf32>
    tpu.vector_store %arg6[%c0_178, %c0_179], %161 {strides = array<i32>} : memref<3x448xf32, #tpu.memory_space<vmem>>, vector<3x448xf32>,
    %c0_180 = arith.constant 0 : index
    %c0_181 = arith.constant 0 : index
    %c364 = arith.constant 364 : index
    %163 = vector.load %arg2[%c0_180, %c0_181, %c364] : memref<1x4x840xf32, #tpu.memory_space<vmem>>, vector<1x4x448xf32>
    %164 = vector.shape_cast %163 : vector<1x4x448xf32> to vector<4x448xf32>
    %c0_182 = arith.constant 0 : index
    %c0_183 = arith.constant 0 : index
    %165 = vector.load %arg6[%c0_182, %c0_183] : memref<3x448xf32, #tpu.memory_space<vmem>>, vector<3x448xf32>
    %c20 = arith.constant 20 : index
    %c0_184 = arith.constant 0 : index
    %c0_185 = arith.constant 0 : index
    %166 = vector.load %arg3[%c20, %c0_184, %c0_185] : memref<33x3x4xf32, #tpu.memory_space<vmem>>, vector<1x3x4xf32>
    %167 = vector.shape_cast %166 : vector<1x3x4xf32> to vector<3x4xf32>
    %cst_186 = arith.constant dense<0.000000e+00> : vector<3x448xf32>
    %168 = tpu.matmul %167, %164, %cst_186 {dimension_numbers = #tpu.dot_dimension_numbers<[1], [0], [0], [1], [0, 0, 1, 1], [], []>} : vector<3x4xf32>, vector<4x448xf32>, vector<3x448xf32> -> vector<3x448xf32>
    %169 = arith.addf %165, %168 : vector<3x448xf32>
    %c0_187 = arith.constant 0 : index
    %c0_188 = arith.constant 0 : index
    %170 = vector.load %arg6[%c0_187, %c0_188] : memref<3x448xf32, #tpu.memory_space<vmem>>, vector<3x448xf32>
    tpu.vector_store %arg6[%c0_187, %c0_188], %169 {strides = array<i32>} : memref<3x448xf32, #tpu.memory_space<vmem>>, vector<3x448xf32>,
    %c0_189 = arith.constant 0 : index
    %c0_190 = arith.constant 0 : index
    %c169 = arith.constant 169 : index
    %171 = vector.load %arg2[%c0_189, %c0_190, %c169] : memref<1x4x840xf32, #tpu.memory_space<vmem>>, vector<1x4x448xf32>
    %172 = vector.shape_cast %171 : vector<1x4x448xf32> to vector<4x448xf32>
    %c0_191 = arith.constant 0 : index
    %c0_192 = arith.constant 0 : index
    %173 = vector.load %arg6[%c0_191, %c0_192] : memref<3x448xf32, #tpu.memory_space<vmem>>, vector<3x448xf32>
    %c21 = arith.constant 21 : index
    %c0_193 = arith.constant 0 : index
    %c0_194 = arith.constant 0 : index
    %174 = vector.load %arg3[%c21, %c0_193, %c0_194] : memref<33x3x4xf32, #tpu.memory_space<vmem>>, vector<1x3x4xf32>
    %175 = vector.shape_cast %174 : vector<1x3x4xf32> to vector<3x4xf32>
    %cst_195 = arith.constant dense<0.000000e+00> : vector<3x448xf32>
    %176 = tpu.matmul %175, %172, %cst_195 {dimension_numbers = #tpu.dot_dimension_numbers<[1], [0], [0], [1], [0, 0, 1, 1], [], []>} : vector<3x4xf32>, vector<4x448xf32>, vector<3x448xf32> -> vector<3x448xf32>
    %177 = arith.addf %173, %176 : vector<3x448xf32>
    %c0_196 = arith.constant 0 : index
    %c0_197 = arith.constant 0 : index
    %178 = vector.load %arg6[%c0_196, %c0_197] : memref<3x448xf32, #tpu.memory_space<vmem>>, vector<3x448xf32>
    tpu.vector_store %arg6[%c0_196, %c0_197], %177 {strides = array<i32>} : memref<3x448xf32, #tpu.memory_space<vmem>>, vector<3x448xf32>,
    %c0_198 = arith.constant 0 : index
    %c0_199 = arith.constant 0 : index
    %c197 = arith.constant 197 : index
    %179 = vector.load %arg2[%c0_198, %c0_199, %c197] : memref<1x4x840xf32, #tpu.memory_space<vmem>>, vector<1x4x448xf32>
    %180 = vector.shape_cast %179 : vector<1x4x448xf32> to vector<4x448xf32>
    %c0_200 = arith.constant 0 : index
    %c0_201 = arith.constant 0 : index
    %181 = vector.load %arg6[%c0_200, %c0_201] : memref<3x448xf32, #tpu.memory_space<vmem>>, vector<3x448xf32>
    %c22_202 = arith.constant 22 : index
    %c0_203 = arith.constant 0 : index
    %c0_204 = arith.constant 0 : index
    %182 = vector.load %arg3[%c22_202, %c0_203, %c0_204] : memref<33x3x4xf32, #tpu.memory_space<vmem>>, vector<1x3x4xf32>
    %183 = vector.shape_cast %182 : vector<1x3x4xf32> to vector<3x4xf32>
    %cst_205 = arith.constant dense<0.000000e+00> : vector<3x448xf32>
    %184 = tpu.matmul %183, %180, %cst_205 {dimension_numbers = #tpu.dot_dimension_numbers<[1], [0], [0], [1], [0, 0, 1, 1], [], []>} : vector<3x4xf32>, vector<4x448xf32>, vector<3x448xf32> -> vector<3x448xf32>
    %185 = arith.addf %181, %184 : vector<3x448xf32>
    %c0_206 = arith.constant 0 : index
    %c0_207 = arith.constant 0 : index
    %186 = vector.load %arg6[%c0_206, %c0_207] : memref<3x448xf32, #tpu.memory_space<vmem>>, vector<3x448xf32>
    tpu.vector_store %arg6[%c0_206, %c0_207], %185 {strides = array<i32>} : memref<3x448xf32, #tpu.memory_space<vmem>>, vector<3x448xf32>,
    %c0_208 = arith.constant 0 : index
    %c0_209 = arith.constant 0 : index
    %c225 = arith.constant 225 : index
    %187 = vector.load %arg2[%c0_208, %c0_209, %c225] : memref<1x4x840xf32, #tpu.memory_space<vmem>>, vector<1x4x448xf32>
    %188 = vector.shape_cast %187 : vector<1x4x448xf32> to vector<4x448xf32>
    %c0_210 = arith.constant 0 : index
    %c0_211 = arith.constant 0 : index
    %189 = vector.load %arg6[%c0_210, %c0_211] : memref<3x448xf32, #tpu.memory_space<vmem>>, vector<3x448xf32>
    %c23 = arith.constant 23 : index
    %c0_212 = arith.constant 0 : index
    %c0_213 = arith.constant 0 : index
    %190 = vector.load %arg3[%c23, %c0_212, %c0_213] : memref<33x3x4xf32, #tpu.memory_space<vmem>>, vector<1x3x4xf32>
    %191 = vector.shape_cast %190 : vector<1x3x4xf32> to vector<3x4xf32>
    %cst_214 = arith.constant dense<0.000000e+00> : vector<3x448xf32>
    %192 = tpu.matmul %191, %188, %cst_214 {dimension_numbers = #tpu.dot_dimension_numbers<[1], [0], [0], [1], [0, 0, 1, 1], [], []>} : vector<3x4xf32>, vector<4x448xf32>, vector<3x448xf32> -> vector<3x448xf32>
    %193 = arith.addf %189, %192 : vector<3x448xf32>
    %c0_215 = arith.constant 0 : index
    %c0_216 = arith.constant 0 : index
    %194 = vector.load %arg6[%c0_215, %c0_216] : memref<3x448xf32, #tpu.memory_space<vmem>>, vector<3x448xf32>
    tpu.vector_store %arg6[%c0_215, %c0_216], %193 {strides = array<i32>} : memref<3x448xf32, #tpu.memory_space<vmem>>, vector<3x448xf32>,
    %c0_217 = arith.constant 0 : index
    %c0_218 = arith.constant 0 : index
    %c142 = arith.constant 142 : index
    %195 = vector.load %arg2[%c0_217, %c0_218, %c142] : memref<1x4x840xf32, #tpu.memory_space<vmem>>, vector<1x4x448xf32>
    %196 = vector.shape_cast %195 : vector<1x4x448xf32> to vector<4x448xf32>
    %c0_219 = arith.constant 0 : index
    %c0_220 = arith.constant 0 : index
    %197 = vector.load %arg6[%c0_219, %c0_220] : memref<3x448xf32, #tpu.memory_space<vmem>>, vector<3x448xf32>
    %c24 = arith.constant 24 : index
    %c0_221 = arith.constant 0 : index
    %c0_222 = arith.constant 0 : index
    %198 = vector.load %arg3[%c24, %c0_221, %c0_222] : memref<33x3x4xf32, #tpu.memory_space<vmem>>, vector<1x3x4xf32>
    %199 = vector.shape_cast %198 : vector<1x3x4xf32> to vector<3x4xf32>
    %cst_223 = arith.constant dense<0.000000e+00> : vector<3x448xf32>
    %200 = tpu.matmul %199, %196, %cst_223 {dimension_numbers = #tpu.dot_dimension_numbers<[1], [0], [0], [1], [0, 0, 1, 1], [], []>} : vector<3x4xf32>, vector<4x448xf32>, vector<3x448xf32> -> vector<3x448xf32>
    %201 = arith.addf %197, %200 : vector<3x448xf32>
    %c0_224 = arith.constant 0 : index
    %c0_225 = arith.constant 0 : index
    %202 = vector.load %arg6[%c0_224, %c0_225] : memref<3x448xf32, #tpu.memory_space<vmem>>, vector<3x448xf32>
    tpu.vector_store %arg6[%c0_224, %c0_225], %201 {strides = array<i32>} : memref<3x448xf32, #tpu.memory_space<vmem>>, vector<3x448xf32>,
    %c0_226 = arith.constant 0 : index
    %c0_227 = arith.constant 0 : index
    %c198 = arith.constant 198 : index
    %203 = vector.load %arg2[%c0_226, %c0_227, %c198] : memref<1x4x840xf32, #tpu.memory_space<vmem>>, vector<1x4x448xf32>
    %204 = vector.shape_cast %203 : vector<1x4x448xf32> to vector<4x448xf32>
    %c0_228 = arith.constant 0 : index
    %c0_229 = arith.constant 0 : index
    %205 = vector.load %arg6[%c0_228, %c0_229] : memref<3x448xf32, #tpu.memory_space<vmem>>, vector<3x448xf32>
    %c25 = arith.constant 25 : index
    %c0_230 = arith.constant 0 : index
    %c0_231 = arith.constant 0 : index
    %206 = vector.load %arg3[%c25, %c0_230, %c0_231] : memref<33x3x4xf32, #tpu.memory_space<vmem>>, vector<1x3x4xf32>
    %207 = vector.shape_cast %206 : vector<1x3x4xf32> to vector<3x4xf32>
    %cst_232 = arith.constant dense<0.000000e+00> : vector<3x448xf32>
    %208 = tpu.matmul %207, %204, %cst_232 {dimension_numbers = #tpu.dot_dimension_numbers<[1], [0], [0], [1], [0, 0, 1, 1], [], []>} : vector<3x4xf32>, vector<4x448xf32>, vector<3x448xf32> -> vector<3x448xf32>
    %209 = arith.addf %205, %208 : vector<3x448xf32>
    %c0_233 = arith.constant 0 : index
    %c0_234 = arith.constant 0 : index
    %210 = vector.load %arg6[%c0_233, %c0_234] : memref<3x448xf32, #tpu.memory_space<vmem>>, vector<3x448xf32>
    tpu.vector_store %arg6[%c0_233, %c0_234], %209 {strides = array<i32>} : memref<3x448xf32, #tpu.memory_space<vmem>>, vector<3x448xf32>,
    %c0_235 = arith.constant 0 : index
    %c0_236 = arith.constant 0 : index
    %c254 = arith.constant 254 : index
    %211 = vector.load %arg2[%c0_235, %c0_236, %c254] : memref<1x4x840xf32, #tpu.memory_space<vmem>>, vector<1x4x448xf32>
    %212 = vector.shape_cast %211 : vector<1x4x448xf32> to vector<4x448xf32>
    %c0_237 = arith.constant 0 : index
    %c0_238 = arith.constant 0 : index
    %213 = vector.load %arg6[%c0_237, %c0_238] : memref<3x448xf32, #tpu.memory_space<vmem>>, vector<3x448xf32>
    %c26 = arith.constant 26 : index
    %c0_239 = arith.constant 0 : index
    %c0_240 = arith.constant 0 : index
    %214 = vector.load %arg3[%c26, %c0_239, %c0_240] : memref<33x3x4xf32, #tpu.memory_space<vmem>>, vector<1x3x4xf32>
    %215 = vector.shape_cast %214 : vector<1x3x4xf32> to vector<3x4xf32>
    %cst_241 = arith.constant dense<0.000000e+00> : vector<3x448xf32>
    %216 = tpu.matmul %215, %212, %cst_241 {dimension_numbers = #tpu.dot_dimension_numbers<[1], [0], [0], [1], [0, 0, 1, 1], [], []>} : vector<3x4xf32>, vector<4x448xf32>, vector<3x448xf32> -> vector<3x448xf32>
    %217 = arith.addf %213, %216 : vector<3x448xf32>
    %c0_242 = arith.constant 0 : index
    %c0_243 = arith.constant 0 : index
    %218 = vector.load %arg6[%c0_242, %c0_243] : memref<3x448xf32, #tpu.memory_space<vmem>>, vector<3x448xf32>
    tpu.vector_store %arg6[%c0_242, %c0_243], %217 {strides = array<i32>} : memref<3x448xf32, #tpu.memory_space<vmem>>, vector<3x448xf32>,
    %c0_244 = arith.constant 0 : index
    %c0_245 = arith.constant 0 : index
    %c115 = arith.constant 115 : index
    %219 = vector.load %arg2[%c0_244, %c0_245, %c115] : memref<1x4x840xf32, #tpu.memory_space<vmem>>, vector<1x4x448xf32>
    %220 = vector.shape_cast %219 : vector<1x4x448xf32> to vector<4x448xf32>
    %c0_246 = arith.constant 0 : index
    %c0_247 = arith.constant 0 : index
    %221 = vector.load %arg6[%c0_246, %c0_247] : memref<3x448xf32, #tpu.memory_space<vmem>>, vector<3x448xf32>
    %c27 = arith.constant 27 : index
    %c0_248 = arith.constant 0 : index
    %c0_249 = arith.constant 0 : index
    %222 = vector.load %arg3[%c27, %c0_248, %c0_249] : memref<33x3x4xf32, #tpu.memory_space<vmem>>, vector<1x3x4xf32>
    %223 = vector.shape_cast %222 : vector<1x3x4xf32> to vector<3x4xf32>
    %cst_250 = arith.constant dense<0.000000e+00> : vector<3x448xf32>
    %224 = tpu.matmul %223, %220, %cst_250 {dimension_numbers = #tpu.dot_dimension_numbers<[1], [0], [0], [1], [0, 0, 1, 1], [], []>} : vector<3x4xf32>, vector<4x448xf32>, vector<3x448xf32> -> vector<3x448xf32>
    %225 = arith.addf %221, %224 : vector<3x448xf32>
    %c0_251 = arith.constant 0 : index
    %c0_252 = arith.constant 0 : index
    %226 = vector.load %arg6[%c0_251, %c0_252] : memref<3x448xf32, #tpu.memory_space<vmem>>, vector<3x448xf32>
    tpu.vector_store %arg6[%c0_251, %c0_252], %225 {strides = array<i32>} : memref<3x448xf32, #tpu.memory_space<vmem>>, vector<3x448xf32>,
    %c0_253 = arith.constant 0 : index
    %c0_254 = arith.constant 0 : index
    %c199 = arith.constant 199 : index
    %227 = vector.load %arg2[%c0_253, %c0_254, %c199] : memref<1x4x840xf32, #tpu.memory_space<vmem>>, vector<1x4x448xf32>
    %228 = vector.shape_cast %227 : vector<1x4x448xf32> to vector<4x448xf32>
    %c0_255 = arith.constant 0 : index
    %c0_256 = arith.constant 0 : index
    %229 = vector.load %arg6[%c0_255, %c0_256] : memref<3x448xf32, #tpu.memory_space<vmem>>, vector<3x448xf32>
    %c28_257 = arith.constant 28 : index
    %c0_258 = arith.constant 0 : index
    %c0_259 = arith.constant 0 : index
    %230 = vector.load %arg3[%c28_257, %c0_258, %c0_259] : memref<33x3x4xf32, #tpu.memory_space<vmem>>, vector<1x3x4xf32>
    %231 = vector.shape_cast %230 : vector<1x3x4xf32> to vector<3x4xf32>
    %cst_260 = arith.constant dense<0.000000e+00> : vector<3x448xf32>
    %232 = tpu.matmul %231, %228, %cst_260 {dimension_numbers = #tpu.dot_dimension_numbers<[1], [0], [0], [1], [0, 0, 1, 1], [], []>} : vector<3x4xf32>, vector<4x448xf32>, vector<3x448xf32> -> vector<3x448xf32>
    %233 = arith.addf %229, %232 : vector<3x448xf32>
    %c0_261 = arith.constant 0 : index
    %c0_262 = arith.constant 0 : index
    %234 = vector.load %arg6[%c0_261, %c0_262] : memref<3x448xf32, #tpu.memory_space<vmem>>, vector<3x448xf32>
    tpu.vector_store %arg6[%c0_261, %c0_262], %233 {strides = array<i32>} : memref<3x448xf32, #tpu.memory_space<vmem>>, vector<3x448xf32>,
    %c0_263 = arith.constant 0 : index
    %c0_264 = arith.constant 0 : index
    %c283 = arith.constant 283 : index
    %235 = vector.load %arg2[%c0_263, %c0_264, %c283] : memref<1x4x840xf32, #tpu.memory_space<vmem>>, vector<1x4x448xf32>
    %236 = vector.shape_cast %235 : vector<1x4x448xf32> to vector<4x448xf32>
    %c0_265 = arith.constant 0 : index
    %c0_266 = arith.constant 0 : index
    %237 = vector.load %arg6[%c0_265, %c0_266] : memref<3x448xf32, #tpu.memory_space<vmem>>, vector<3x448xf32>
    %c29 = arith.constant 29 : index
    %c0_267 = arith.constant 0 : index
    %c0_268 = arith.constant 0 : index
    %238 = vector.load %arg3[%c29, %c0_267, %c0_268] : memref<33x3x4xf32, #tpu.memory_space<vmem>>, vector<1x3x4xf32>
    %239 = vector.shape_cast %238 : vector<1x3x4xf32> to vector<3x4xf32>
    %cst_269 = arith.constant dense<0.000000e+00> : vector<3x448xf32>
    %240 = tpu.matmul %239, %236, %cst_269 {dimension_numbers = #tpu.dot_dimension_numbers<[1], [0], [0], [1], [0, 0, 1, 1], [], []>} : vector<3x4xf32>, vector<4x448xf32>, vector<3x448xf32> -> vector<3x448xf32>
    %241 = arith.addf %237, %240 : vector<3x448xf32>
    %c0_270 = arith.constant 0 : index
    %c0_271 = arith.constant 0 : index
    %242 = vector.load %arg6[%c0_270, %c0_271] : memref<3x448xf32, #tpu.memory_space<vmem>>, vector<3x448xf32>
    tpu.vector_store %arg6[%c0_270, %c0_271], %241 {strides = array<i32>} : memref<3x448xf32, #tpu.memory_space<vmem>>, vector<3x448xf32>,
    %c0_272 = arith.constant 0 : index
    %c0_273 = arith.constant 0 : index
    %c34 = arith.constant 34 : index
    %243 = vector.load %arg2[%c0_272, %c0_273, %c34] : memref<1x4x840xf32, #tpu.memory_space<vmem>>, vector<1x4x448xf32>
    %244 = vector.shape_cast %243 : vector<1x4x448xf32> to vector<4x448xf32>
    %c0_274 = arith.constant 0 : index
    %c0_275 = arith.constant 0 : index
    %245 = vector.load %arg6[%c0_274, %c0_275] : memref<3x448xf32, #tpu.memory_space<vmem>>, vector<3x448xf32>
    %c30 = arith.constant 30 : index
    %c0_276 = arith.constant 0 : index
    %c0_277 = arith.constant 0 : index
    %246 = vector.load %arg3[%c30, %c0_276, %c0_277] : memref<33x3x4xf32, #tpu.memory_space<vmem>>, vector<1x3x4xf32>
    %247 = vector.shape_cast %246 : vector<1x3x4xf32> to vector<3x4xf32>
    %cst_278 = arith.constant dense<0.000000e+00> : vector<3x448xf32>
    %248 = tpu.matmul %247, %244, %cst_278 {dimension_numbers = #tpu.dot_dimension_numbers<[1], [0], [0], [1], [0, 0, 1, 1], [], []>} : vector<3x4xf32>, vector<4x448xf32>, vector<3x448xf32> -> vector<3x448xf32>
    %249 = arith.addf %245, %248 : vector<3x448xf32>
    %c0_279 = arith.constant 0 : index
    %c0_280 = arith.constant 0 : index
    %250 = vector.load %arg6[%c0_279, %c0_280] : memref<3x448xf32, #tpu.memory_space<vmem>>, vector<3x448xf32>
    tpu.vector_store %arg6[%c0_279, %c0_280], %249 {strides = array<i32>} : memref<3x448xf32, #tpu.memory_space<vmem>>, vector<3x448xf32>,
    %c0_281 = arith.constant 0 : index
    %c0_282 = arith.constant 0 : index
    %c202 = arith.constant 202 : index
    %251 = vector.load %arg2[%c0_281, %c0_282, %c202] : memref<1x4x840xf32, #tpu.memory_space<vmem>>, vector<1x4x448xf32>
    %252 = vector.shape_cast %251 : vector<1x4x448xf32> to vector<4x448xf32>
    %c0_283 = arith.constant 0 : index
    %c0_284 = arith.constant 0 : index
    %253 = vector.load %arg6[%c0_283, %c0_284] : memref<3x448xf32, #tpu.memory_space<vmem>>, vector<3x448xf32>
    %c31 = arith.constant 31 : index
    %c0_285 = arith.constant 0 : index
    %c0_286 = arith.constant 0 : index
    %254 = vector.load %arg3[%c31, %c0_285, %c0_286] : memref<33x3x4xf32, #tpu.memory_space<vmem>>, vector<1x3x4xf32>
    %255 = vector.shape_cast %254 : vector<1x3x4xf32> to vector<3x4xf32>
    %cst_287 = arith.constant dense<0.000000e+00> : vector<3x448xf32>
    %256 = tpu.matmul %255, %252, %cst_287 {dimension_numbers = #tpu.dot_dimension_numbers<[1], [0], [0], [1], [0, 0, 1, 1], [], []>} : vector<3x4xf32>, vector<4x448xf32>, vector<3x448xf32> -> vector<3x448xf32>
    %257 = arith.addf %253, %256 : vector<3x448xf32>
    %c0_288 = arith.constant 0 : index
    %c0_289 = arith.constant 0 : index
    %258 = vector.load %arg6[%c0_288, %c0_289] : memref<3x448xf32, #tpu.memory_space<vmem>>, vector<3x448xf32>
    tpu.vector_store %arg6[%c0_288, %c0_289], %257 {strides = array<i32>} : memref<3x448xf32, #tpu.memory_space<vmem>>, vector<3x448xf32>,
    %c0_290 = arith.constant 0 : index
    %c0_291 = arith.constant 0 : index
    %c370 = arith.constant 370 : index
    %259 = vector.load %arg2[%c0_290, %c0_291, %c370] : memref<1x4x840xf32, #tpu.memory_space<vmem>>, vector<1x4x448xf32>
    %260 = vector.shape_cast %259 : vector<1x4x448xf32> to vector<4x448xf32>
    %c0_292 = arith.constant 0 : index
    %c0_293 = arith.constant 0 : index
    %261 = vector.load %arg6[%c0_292, %c0_293] : memref<3x448xf32, #tpu.memory_space<vmem>>, vector<3x448xf32>
    %c32 = arith.constant 32 : index
    %c0_294 = arith.constant 0 : index
    %c0_295 = arith.constant 0 : index
    %262 = vector.load %arg3[%c32, %c0_294, %c0_295] : memref<33x3x4xf32, #tpu.memory_space<vmem>>, vector<1x3x4xf32>
    %263 = vector.shape_cast %262 : vector<1x3x4xf32> to vector<3x4xf32>
    %cst_296 = arith.constant dense<0.000000e+00> : vector<3x448xf32>
    %264 = tpu.matmul %263, %260, %cst_296 {dimension_numbers = #tpu.dot_dimension_numbers<[1], [0], [0], [1], [0, 0, 1, 1], [], []>} : vector<3x4xf32>, vector<4x448xf32>, vector<3x448xf32> -> vector<3x448xf32>
    %265 = arith.addf %261, %264 : vector<3x448xf32>
    %c0_297 = arith.constant 0 : index
    %c0_298 = arith.constant 0 : index
    %266 = vector.load %arg6[%c0_297, %c0_298] : memref<3x448xf32, #tpu.memory_space<vmem>>, vector<3x448xf32>
    tpu.vector_store %arg6[%c0_297, %c0_298], %265 {strides = array<i32>} : memref<3x448xf32, #tpu.memory_space<vmem>>, vector<3x448xf32>,
    %c0_i32_299 = arith.constant 0 : i32
    %267 = arith.cmpi eq, %arg1, %c0_i32_299 : i32
    %268 = arith.extui %267 : i1 to i32
    %c0_i32_300 = arith.constant 0 : i32
    %269 = arith.cmpi ne, %268, %c0_i32_300 : i32
    scf.if %269 {
      %c0_301 = arith.constant 0 : index
      %c0_302 = arith.constant 0 : index
      %270 = vector.load %arg6[%c0_301, %c0_302] : memref<3x448xf32, #tpu.memory_space<vmem>>, vector<3x448xf32>
      %c0_303 = arith.constant 0 : index
      %c0_304 = arith.constant 0 : index
      %c0_305 = arith.constant 0 : index
      %271 = vector.load %arg5[%c0_303, %c0_304, %c0_305] : memref<1x3x448xf32, #tpu.memory_space<vmem>>, vector<1x3x448xf32>
      %272 = vector.shape_cast %271 : vector<1x3x448xf32> to vector<3x448xf32>
      %273 = vector.shape_cast %270 : vector<3x448xf32> to vector<1x3x448xf32>
      tpu.vector_store %arg5[%c0_303, %c0_304, %c0_305], %273 {strides = array<i32>} : memref<1x3x448xf32, #tpu.memory_space<vmem>>, vector<1x3x448xf32>,
    } else {
    }
    return
  }
  func.func @transform_0(%arg0: i32, %arg1: i32) -> (i32, i32, i32) {
    %c0_i32 = arith.constant 0 : i32
    %c0_i32_0 = arith.constant 0 : i32
    return %arg0, %arg1, %c0_i32 : i32, i32, i32
  }
  func.func @transform_1(%arg0: i32, %arg1: i32) -> (i32, i32, i32) {
    %c0_i32 = arith.constant 0 : i32
    %c0_i32_0 = arith.constant 0 : i32
    %c0_i32_1 = arith.constant 0 : i32
    return %c0_i32, %c0_i32_0, %arg1 : i32, i32, i32
  }
  func.func @transform_2(%arg0: i32, %arg1: i32) -> (i32, i32) {
    %c0_i32 = arith.constant 0 : i32
    %c0_i32_0 = arith.constant 0 : i32
    %c0_i32_1 = arith.constant 0 : i32
    return %c0_i32, %c0_i32_0 : i32, i32
  }
  func.func @transform_3(%arg0: i32, %arg1: i32) -> (i32, i32, i32) {
    %c0_i32 = arith.constant 0 : i32
    %c0_i32_0 = arith.constant 0 : i32
    %c0_i32_1 = arith.constant 0 : i32
    return %arg0, %c0_i32, %c0_i32_0 : i32, i32, i32
  }
}

</mosaic_0001>

<bundles_post_ra>
// kernel: tpu_custom_call.1
= control target key start
LH: loop header
LB: loop body
LE: loop exit
PB: predicated region body
PF: predicated region fallthrough
CT: control target
= control target key end

     0   :  { %s7000_s12 = smov 0   ;;  %s7002_s13 = smov 0   ;;  %s7824_s0 = inlined_call_operand.vmem [shape: f32[2,4,840], index: 0, kind: input, shape index: {}]   ;;  %s7825_s1 = inlined_call_operand.vmem [shape: f32[33,3,4], index: 1, kind: input, shape index: {}]   ;;  %s7826_s2 = inlined_call_operand.vmem [shape: f32[3,1], index: 2, kind: input, shape index: {}]   ;;  %s7827_s3 = inlined_call_operand.vmem [shape: f32[2,3,448], index: 3, kind: output, shape index: {}]  }
   0x1   :  { %s7004_s14 = smov 0  }
   0x2 LB: > { %s25_s15 = sadd.s32 1, %s6938_s13  ;;  %p6610_p0 = scmp.ge.s32.totalorder %s6942_s14, 1  ;;  %s6942_s14 = sphi %s7004_s14, %s13_s14   ;;  %s6938_s13 = sphi %s7002_s13, %s7831_s13   ;;  %s6934_s12 = sphi %s7000_s12, %s7830_s12  }
   0x3   : > { %p27_p1 = scmp.ge.s32.totalorder %s25_s15, 2  ;;  %p164_p2 = scmp.lt.s32.totalorder %s6942_s14, 3 }
   0x5   : > { %s7833_s15 = smov (%p27_p1, %s25_s15), 0  ;;  %p165_p3 = pnand %p6610_p0, %p164_p2 }
   0x6   : > { %p196_p4 = scmp.lt.s32.totalorder (!%p165_p3), %s6934_s12, 1  ;;  %v6944_v0 = vmov (!%p165_p3), 0.0   ;;  %s6945_s20 = smov (!%p165_p3), 106   ;;  %v6952_v14 = vmov (!%p165_p3), 0   ;;  %vm261_vm0 = vcmask (!%p165_p3), 1043456   ;;  %vm253_vm1 = vcmask (!%p165_p3), 867328  }
   0x7   : > { %168 = sbr.rel (%p165_p3) target bundleno = 690 (0x2b2), region = 32  ;;  %405 = vmatprep.mubr.f32.mxu1 (!%p165_p3), %v6944_v0  ;;  %334 = vmatprep.mubr.f32.mxu0 (!%p165_p3), %v6944_v0  ;;  %s6946_s21 = smov (!%p165_p3), 66   ;;  %v240_v25 = vld [vmem:[%s7825_s1] sm:$0x7] (!%p165_p3)  ;;  %vm257_vm2 = vcmask (!%p165_p3), 31744   ;;  %vm445_vm3 = vcmask (!%p165_p3), 539648  }
   0x8   : > { %s6947_s22 = smov (!%p165_p3), 26   ;;  %s6948_s23 = smov (!%p165_p3), 19   ;;  %6908 = vset.pattern.permute.xlu1 (!%p165_p3), %v6952_v14  ;;  %6909 = vset.pattern.permute.xlu0 (!%p165_p3), %v6952_v14  ;;  %v6620_v32 = vld [vmem:[%s7825_s1 + $0x4] sm:$0x7] (!%p165_p3)  ;;  %vm636_vm4 = vcmask (!%p165_p3), 211968   ;;  %vm828_vm5 = vcmask (!%p165_p3), 154624  }
   0x9   : > { %s6949_s24 = smov (!%p165_p3), 63   ;;  %s6950_s25 = smov (!%p165_p3), 107   ;;  %v6627_v43 = vld [vmem:[%s7825_s1 + $0x8] sm:$0x7] (!%p165_p3)  ;;  %v6634_v52 = vld [vmem:[%s7825_s1 + $0xc] sm:$0x7] (!%p165_p3) }
   0xa   : > { %s6951_s26 = smov (!%p165_p3), 118   ;;  %s6953_s27 = smov (!%p165_p3), 62   ;;  %vm1020_vm6 = vcmask (!%p165_p3), 515072   ;;  %vm1208_vm7 = vcmask (!%p165_p3), 875520   ;;  %vm1395_vm8 = vcmask (!%p165_p3), 965632   ;;  %vm1586_vm9 = vcmask (!%p165_p3), 506880  }
   0xb   : > { %s6954_s28 = smov (!%p165_p3), 6   ;;  %s6955_s29 = smov (!%p165_p3), 89   ;;  %vm1778_vm10 = vcmask (!%p165_p3), 48128   ;;  %vm1966_vm11 = vcmask (!%p165_p3), 728064   ;;  %vm2157_vm12 = vcmask (!%p165_p3), 498688   ;;  %vm2349_vm13 = vcmask (!%p165_p3), 269312  }
   0xc   : > { %s6956_s30 = smov (!%p165_p3), 61   ;;  %s6957_s4 = smov (!%p165_p3), 33   ;;  %vm2537_vm14 = vcmask (!%p165_p3), 818176   ;;  %vm2728_vm15 = vcmask (!%p165_p3), 130048  }
   0xd   : > { %s6958_s5 = smov (!%p165_p3), 100   ;;  %s6959_s6 = smov (!%p165_p3), 16  }
   0xe   : > { %s7835_s12 = smov (!%p196_p4, %s6934_s12), 1  ;;  %s6960_s11 = smov 116  }
   0xf   : > { %s6847_s16 = smul.u32 28, %s7835_s12  ;;  %s6967_s10 = smov 87  }
  0x10   : > { %s6968_s17 = smov 59   ;;  %s6973_s8 = smov 13  }
  0x11   : > { %s7026_s19 = scalar_lea.vmem %s7824_s0, %s6847_s16  ;;  %s6961_s16 = smov 88  }
  0x12   : > { %v7029_v1 = vld [vmem:[%s7026_s19] sm:$0xff]  ;;  %v7032_v2 = vld [vmem:[%s7026_s19 + $0x8] sm:$0xff]  ;;  %v7064_v9 = vld [vmem:[%s7026_s19 + $0x10] sm:$0xff]  ;;  %s6975_s18 = smov 101  }
  0x13   : > { %245 = vrot.lane.b32.xlu1 %v7029_v1, %s6945_s20  ;;  %v7037_v3 = vcombine.high %v7029_v1, %v7029_v1  ;;  %v7041_v4 = vcombine.high %v7032_v2, %v7032_v2  ;;  %v7045_v5 = vld [vmem:[%s7026_s19 + $0x4] sm:$0xff]  ;;  %v7049_v6 = vld [vmem:[%s7026_s19 + $0xc] sm:$0xff]  ;;  %v616_v10 = vld [vmem:[%s7026_s19 + $0x18] sm:$0xf]  ;;  %v7071_v11 = vcombine.high %v7064_v9, %v7064_v9 }
  0x14   : > { %v7054_v7 = vcombine.high %v7045_v5, %v7045_v5  ;;  %v7058_v8 = vcombine.high %v7049_v6, %v7049_v6  ;;  %v808_v12 = vld [vmem:[%s7026_s19 + $0x10] sm:$0xf]  ;;  %v1000_v13 = vld [vmem:[%s7026_s19 + $0x14] sm:$0xf] }
  0x15   : > { %247 = vrot.lane.b32.xlu0 %v7037_v3, %s6945_s20  ;;  %v1566_v15 = vld [vmem:[%s7026_s19 + $0x14] sm:$0xf]  ;;  %v2708_v28 = vld [vmem:[%s7026_s19 + $0x10] sm:$0xf] }
  0x16   : > { %v1758_v16 = vld [vmem:[%s7026_s19 + $0x14] sm:$0xf] }
  0x17   : > { %251 = vrot.lane.b32.xlu1 %v7041_v4, %s6945_s20  ;;  %v2137_v17 = vld [vmem:[%s7026_s19 + $0x14] sm:$0xf] }
  0x18   : > { %v2329_v18 = vld [vmem:[%s7026_s19 + $0x14] sm:$0xf] }
  0x19   : > { %249 = vrot.lane.b32.xlu0 %v7032_v2, %s6945_s20  ;;  %s6962_s20 = smov 60   ;;  %v3274_v50 = vld [vmem:[%s7026_s19 + $0x14] sm:$0xf] }
  0x1b   : > { %441 = vrot.lane.b32.xlu1 %v7049_v6, %s6946_s21 }
  0x1d   : > { %439 = vrot.lane.b32.xlu0 %v7054_v7, %s6946_s21 }
  0x1f   : > { %443 = vrot.lane.b32.xlu1 %v7058_v8, %s6946_s21 }
  0x21   : > { %437 = vrot.lane.b32.xlu0 %v7045_v5, %s6946_s21 }
  0x23   : > { %630 = vrot.lane.b32.xlu1 %v7064_v9, %s6947_s22 }
  0x25   : > { %628 = vrot.lane.b32.xlu0 %v7041_v4, %s6947_s22 }
  0x27   : > { %634 = vrot.lane.b32.xlu1 %v616_v10, %s6947_s22  ;;  %v3466_v10 = vld [vmem:[%s7026_s19 + $0x14] sm:$0xf] }
  0x29   : > { %632 = vrot.lane.b32.xlu0 %v7071_v11, %s6947_s22 }
  0x2b   : > { %820 = vrot.lane.b32.xlu1 %v7037_v3, %s6948_s23 }
  0x2d   : > { %626 = vrot.lane.b32.xlu0 %v7032_v2, %s6947_s22  ;;  %s6976_s22 = smov 94  }
  0x2f   : > { %824 = vrot.lane.b32.xlu1 %v7041_v4, %s6948_s23 }
  0x31   : > { %822 = vrot.lane.b32.xlu0 %v7032_v2, %s6948_s23 }
  0x33   : > { %818 = vrot.lane.b32.xlu1 %v7029_v1, %s6948_s23 }
  0x35   : > { %826 = vrot.lane.b32.xlu0 %v808_v12, %s6948_s23  ;;  %s6963_s23 = smov 32  }
  0x37   : > { %1014 = vrot.lane.b32.xlu1 %v7049_v6, %s6949_s24 }
  0x39   : > { %1012 = vrot.lane.b32.xlu0 %v7054_v7, %s6949_s24 }
  0x3b   : > { %1018 = vrot.lane.b32.xlu1 %v1000_v13, %s6949_s24 }
  0x3d   : > { %1016 = vrot.lane.b32.xlu0 %v7058_v8, %s6949_s24 }
  0x3f   : > { %1202 = vrot.lane.b32.xlu1 %v7041_v4, %s6950_s25 }
  0x41   : > { %1010 = vrot.lane.b32.xlu0 %v7045_v5, %s6949_s24  ;;  %s6970_s24 = smov 114  }
  0x43   : > { %1200 = vrot.lane.b32.xlu1 %v7032_v2, %s6950_s25 }
  0x45   : > { %1204 = vrot.lane.b32.xlu0 %v7064_v9, %s6950_s25 }
  0x47   : > { %1389 = vrot.lane.b32.xlu1 %v7054_v7, %s6951_s26 }
  0x49   : > { %1206 = vrot.lane.b32.xlu0 %v7071_v11, %s6950_s25 }
  0x4b   : > { %1387 = vrot.lane.b32.xlu1 %v7045_v5, %s6951_s26 }
  0x4d   : > { %1391 = vrot.lane.b32.xlu0 %v7049_v6, %s6951_s26 }
  0x4f   : > { %1578 = vrot.lane.b32.xlu1 %v7054_v7, %s6953_s27 }
  0x51   : > { %1393 = vrot.lane.b32.xlu0 %v7058_v8, %s6951_s26  ;;  %s6964_s26 = smov 4  }
  0x53   : > { %1582 = vrot.lane.b32.xlu1 %v7058_v8, %s6953_s27 }
  0x55   : > { %1580 = vrot.lane.b32.xlu0 %v7049_v6, %s6953_s27 }
  0x57   : > { %1576 = vrot.lane.b32.xlu1 %v7045_v5, %s6953_s27 }
  0x59   : > { %1584 = vrot.lane.b32.xlu0 %v1566_v15, %s6953_s27  ;;  %s6971_s27 = smov 58  }
  0x5b   : > { %1772 = vrot.lane.b32.xlu1 %v7049_v6, %s6954_s28 }
  0x5d   : > { %1770 = vrot.lane.b32.xlu0 %v7054_v7, %s6954_s28 }
  0x5f   : > { %1776 = vrot.lane.b32.xlu1 %v1758_v16, %s6954_s28 }
  0x61   : > { %1774 = vrot.lane.b32.xlu0 %v7058_v8, %s6954_s28 }
  0x63   : > { %1960 = vrot.lane.b32.xlu1 %v7054_v7, %s6955_s29 }
  0x65   : > { %1768 = vrot.lane.b32.xlu0 %v7045_v5, %s6954_s28  ;;  %s6978_s28 = smov 14  }
  0x67   : > { %1958 = vrot.lane.b32.xlu1 %v7045_v5, %s6955_s29 }
  0x69   : > { %1962 = vrot.lane.b32.xlu0 %v7049_v6, %s6955_s29 }
  0x6b   : > { %2149 = vrot.lane.b32.xlu1 %v7054_v7, %s6956_s30 }
  0x6d   : > { %1964 = vrot.lane.b32.xlu0 %v7058_v8, %s6955_s29  ;;  %s6965_s29 = smov 104  }
  0x6f   : > { %2153 = vrot.lane.b32.xlu1 %v7058_v8, %s6956_s30 }
  0x71   : > { %2151 = vrot.lane.b32.xlu0 %v7049_v6, %s6956_s30 }
  0x73   : > { %2147 = vrot.lane.b32.xlu1 %v7045_v5, %s6956_s30 }
  0x75   : > { %2155 = vrot.lane.b32.xlu0 %v2137_v17, %s6956_s30 }
  0x77   : > { %2343 = vrot.lane.b32.xlu1 %v7049_v6, %s6957_s4 }
  0x79   : > { %2341 = vrot.lane.b32.xlu0 %v7054_v7, %s6957_s4 }
  0x7b   : > { %2347 = vrot.lane.b32.xlu1 %v2329_v18, %s6957_s4  ;;  %v3658_v18 = vld [vmem:[%s7026_s19 + $0x14] sm:$0xf] }
  0x7d   : > { %2345 = vrot.lane.b32.xlu0 %v7058_v8, %s6957_s4 }
  0x7f   : > { %2531 = vrot.lane.b32.xlu1 %v7037_v3, %s6958_s5 }
  0x81   : > { %2339 = vrot.lane.b32.xlu0 %v7045_v5, %s6957_s4  ;;  %s6846_s4 = sshll.u32 %s7835_s12, 4 }
  0x82   : > { %s213_s7 = scalar_lea.vmem %s7827_s3, %s6846_s4 }
  0x83   : > { %2529 = vrot.lane.b32.xlu1 %v7029_v1, %s6958_s5 }
  0x85   : > { %v246_v19 = vpop.permute.xlu1 %245  ;;  %2533 = vrot.lane.b32.xlu0 %v7032_v2, %s6958_s5 }
  0x87   : > { %2720 = vrot.lane.b32.xlu1 %v7037_v3, %s6959_s6  ;;  %v248_v20 = vpop.permute.xlu0 %247 }
  0x88   : > { %v254_v27 = vsel %vm253_vm1, %v246_v19, %v248_v20  ;;  %v6648_v19 = vld [vmem:[%s7825_s1 + $0x14] sm:$0x7] }
  0x89   : > { %v252_v21 = vpop.permute.xlu1 %251  ;;  %2535 = vrot.lane.b32.xlu0 %v7041_v4, %s6958_s5  ;;  %s6966_s5 = smov 20  }
  0x8a   : > { %6617 = vmatprep.subr.msk.mxu1 %vm261_vm0, %v252_v21 }
  0x8b   : > { %2724 = vrot.lane.b32.xlu1 %v7041_v4, %s6959_s6  ;;  %v250_v22 = vpop.permute.xlu0 %249 }
  0x8c   : > { %v255_v23 = vsel %vm253_vm1, %v248_v20, %v250_v22  ;;  %v256_v24 = vsel %vm253_vm1, %v250_v22, %v252_v21  ;;  %vm2916_vm1 = vcmask 949248  }
  0x8d   : > { %v442_v26 = vpop.permute.xlu1 %441  ;;  %2722 = vrot.lane.b32.xlu0 %v7032_v2, %s6959_s6  ;;  %6614 = vmatprep.subr.msk.mxu0 %vm261_vm0, %v255_v23 }
  0x8e   : > { %6618 = vmatpush1.msk.msra.mxu1 %vm261_vm0, %v256_v24  ;;  %6615 = vmatpush1.msk.msra.mxu0 %vm261_vm0, %v254_v27  ;;  %v6655_v27 = vld [vmem:[%s7825_s1 + $0x18] sm:$0x7] }
  0x8f   : > { %6619 = vmatmul.mubr.msk.f32.vlgmr.msra.gmra.mrb[0].mxu1 %vm257_vm2, %v240_v25  ;;  %2718 = vrot.lane.b32.xlu1 %v7029_v1, %s6959_s6  ;;  %v440_v29 = vpop.permute.xlu0 %439  ;;  %v6641_v1 = vld [vmem:[%s7825_s1 + $0x10] sm:$0x7] }
  0x90   : > { %6616 = vmatmul.mubr.msk.f32.vlgmr.msra.gmra.mrb[0].mxu0 %vm257_vm2, %v240_v25  ;;  %v447_v30 = vsel %vm445_vm3, %v440_v29, %v442_v26  ;;  %595 = vmatprep.mubr.f32.mxu1 %v6944_v0 }
  0x91   : > { %v444_v31 = vpop.permute.xlu1 %443  ;;  %2726 = vrot.lane.b32.xlu0 %v2708_v28, %s6959_s6  ;;  %6621 = vmatprep.subr.msk.mxu0 %vm261_vm0, %v447_v30 }
  0x92   : > { %v448_v33 = vsel %vm445_vm3, %v442_v26, %v444_v31  ;;  %6624 = vmatprep.subr.msk.mxu1 %vm261_vm0, %v444_v31  ;;  %524 = vmatprep.mubr.f32.mxu0 %v6944_v0 }
  0x93   : > { %2912 = vrot.lane.b32.xlu1 %v7049_v6, %s6960_s11  ;;  %6625 = vmatpush1.msk.msra.mxu1 %vm261_vm0, %v448_v33  ;;  %v438_v34 = vpop.permute.xlu0 %437 }
  0x94   : > { %v446_v35 = vsel %vm445_vm3, %v438_v34, %v440_v29  ;;  %6626 = vmatmul.mubr.msk.f32.vlgmr.msra.gmra.mrb[2].mxu1 %vm257_vm2, %v6620_v32  ;;  %vm3103_vm3 = vcmask 719872  }
  0x95   : > { %v631_v36 = vpop.permute.xlu1 %630  ;;  %2910 = vrot.lane.b32.xlu0 %v7054_v7, %s6960_s11  ;;  %6622 = vmatpush1.msk.msra.mxu0 %vm261_vm0, %v446_v35  ;;  %v6662_v35 = vld [vmem:[%s7825_s1 + $0x1c] sm:$0x7] }
  0x96   : > { %6623 = vmatmul.mubr.msk.f32.vlgmr.msra.gmra.mrb[2].mxu0 %vm257_vm2, %v6620_v32  ;;  %787 = vmatprep.mubr.f32.mxu1 %v6944_v0 }
  0x97   : > { %2914 = vrot.lane.b32.xlu1 %v7058_v8, %s6960_s11  ;;  %v629_v37 = vpop.permute.xlu0 %628  ;;  %716 = vmatprep.mubr.f32.mxu0 %v6944_v0 }
  0x98   : > { %v638_v38 = vsel %vm636_vm4, %v629_v37, %v631_v36 }
  0x99   : > { %v635_v39 = vpop.permute.xlu1 %634  ;;  %2908 = vrot.lane.b32.xlu0 %v7045_v5, %s6960_s11  ;;  %6628 = vmatprep.subr.msk.mxu0 %vm261_vm0, %v638_v38  ;;  %s6974_s11 = smov 57  }
  0x9b   : > { %3099 = vrot.lane.b32.xlu1 %v7049_v6, %s6961_s16  ;;  %v633_v40 = vpop.permute.xlu0 %632 }
  0x9c   : > { %v639_v41 = vsel %vm636_vm4, %v631_v36, %v633_v40  ;;  %v640_v42 = vsel %vm636_vm4, %v633_v40, %v635_v39  ;;  %v218_v39 = vld [vmem:[%s7826_s2] sm:$0x7] }
  0x9d   : > { %v821_v44 = vpop.permute.xlu1 %820  ;;  %3097 = vrot.lane.b32.xlu0 %v7054_v7, %s6961_s16  ;;  %6631 = vmatprep.subr.msk.mxu1 %vm261_vm0, %v640_v42 }
  0x9e   : > { %6632 = vmatpush1.msk.msra.mxu1 %vm261_vm0, %v639_v41 }
  0x9f   : > { %3101 = vrot.lane.b32.xlu1 %v7058_v8, %s6961_s16  ;;  %v627_v45 = vpop.permute.xlu0 %626  ;;  %6633 = vmatmul.mubr.msk.f32.vlgmr.msra.gmra.mrb[4].mxu1 %vm257_vm2, %v6627_v43 }
  0xa0   : > { %v637_v46 = vsel %vm636_vm4, %v627_v45, %v629_v37  ;;  %979 = vmatprep.mubr.f32.mxu1 %v6944_v0  ;;  %vm3294_vm4 = vcmask 490496  }
  0xa1   : > { %v825_v47 = vpop.permute.xlu1 %824  ;;  %3095 = vrot.lane.b32.xlu0 %v7045_v5, %s6961_s16  ;;  %6629 = vmatpush1.msk.msra.mxu0 %vm261_vm0, %v637_v46  ;;  %v6669_v46 = vld [vmem:[%s7825_s1 + $0x20] sm:$0x7] }
  0xa2   : > { %6630 = vmatmul.mubr.msk.f32.vlgmr.msra.gmra.mrb[4].mxu0 %vm257_vm2, %v6627_v43 }
  0xa3   : > { %3288 = vrot.lane.b32.xlu1 %v7049_v6, %s6962_s20  ;;  %v823_v48 = vpop.permute.xlu0 %822  ;;  %908 = vmatprep.mubr.f32.mxu0 %v6944_v0 }
  0xa4   : > { %v830_v49 = vsel %vm828_vm5, %v821_v44, %v823_v48  ;;  %v831_v56 = vsel %vm828_vm5, %v823_v48, %v825_v47 }
  0xa5   : > { %v819_v51 = vpop.permute.xlu1 %818  ;;  %3286 = vrot.lane.b32.xlu0 %v7054_v7, %s6962_s20  ;;  %6635 = vmatprep.subr.msk.mxu0 %vm261_vm0, %v830_v49 }
  0xa6   : > { %v829_v53 = vsel %vm828_vm5, %v819_v51, %v821_v44 }
  0xa7   : > { %3292 = vrot.lane.b32.xlu1 %v3274_v50, %s6962_s20  ;;  %6636 = vmatpush1.msk.msra.mxu0 %vm261_vm0, %v829_v53  ;;  %v827_v54 = vpop.permute.xlu0 %826  ;;  %v6676_v53 = vld [vmem:[%s7825_s1 + $0x24] sm:$0x7] }
  0xa8   : > { %v832_v55 = vsel %vm828_vm5, %v825_v47, %v827_v54  ;;  %6637 = vmatmul.mubr.msk.f32.vlgmr.msra.gmra.mrb[6].mxu0 %vm257_vm2, %v6634_v52  ;;  %vm3486_vm5 = vcmask 261120  }
  0xa9   : > { %v1015_v57 = vpop.permute.xlu1 %1014  ;;  %3290 = vrot.lane.b32.xlu0 %v7058_v8, %s6962_s20  ;;  %6638 = vmatprep.subr.msk.mxu1 %vm261_vm0, %v832_v55 }
  0xaa   : > { %6639 = vmatpush1.msk.msra.mxu1 %vm261_vm0, %v831_v56  ;;  %1100 = vmatprep.mubr.f32.mxu0 %v6944_v0 }
  0xab   : > { %3478 = vrot.lane.b32.xlu1 %v7054_v7, %s6963_s23  ;;  %v1013_v58 = vpop.permute.xlu0 %1012  ;;  %6640 = vmatmul.mubr.msk.f32.vlgmr.msra.gmra.mrb[6].mxu1 %vm257_vm2, %v6634_v52 }
  0xac   : > { %v1022_v59 = vsel %vm1020_vm6, %v1013_v58, %v1015_v57  ;;  %1171 = vmatprep.mubr.f32.mxu1 %v6944_v0 }
  0xad   : > { %v1019_v60 = vpop.permute.xlu1 %1018  ;;  %3284 = vrot.lane.b32.xlu0 %v7045_v5, %s6962_s20  ;;  %6642 = vmatprep.subr.msk.mxu0 %vm261_vm0, %v1022_v59 }
  0xaf   : > { %3482 = vrot.lane.b32.xlu1 %v7058_v8, %s6963_s23  ;;  %v1017_v61 = vpop.permute.xlu0 %1016 }
  0xb0   : > { %v1023_v62 = vsel %vm1020_vm6, %v1015_v57, %v1017_v61  ;;  %v1024_v63 = vsel %vm1020_vm6, %v1017_v61, %v1019_v60 }
  0xb1   : > { %v1203_v3 = vpop.permute.xlu1 %1202  ;;  %3480 = vrot.lane.b32.xlu0 %v7049_v6, %s6963_s23  ;;  %6645 = vmatprep.subr.msk.mxu1 %vm261_vm0, %v1024_v63 }
  0xb2   : > { %6646 = vmatpush1.msk.msra.mxu1 %vm261_vm0, %v1023_v62  ;;  %v6683_v62 = vld [vmem:[%s7825_s1 + $0x28] sm:$0x7] }
  0xb3   : > { %3476 = vrot.lane.b32.xlu1 %v7045_v5, %s6963_s23  ;;  %v1011_v12 = vpop.permute.xlu0 %1010  ;;  %6647 = vmatmul.mubr.msk.f32.vlgmr.msra.gmra.mrb[8].mxu1 %vm257_vm2, %v6641_v1 }
  0xb4   : > { %v1021_v13 = vsel %vm1020_vm6, %v1011_v12, %v1013_v58  ;;  %1358 = vmatprep.mubr.f32.mxu1 %v6944_v0  ;;  %v4415_v58 = vld [vmem:[%s7026_s19 + $0x14] sm:$0xf]  ;;  %vm3865_vm6 = vcmask 850944  }
  0xb5   : > { %v1201_v14 = vpop.permute.xlu1 %1200  ;;  %3484 = vrot.lane.b32.xlu0 %v3466_v10, %s6963_s23  ;;  %6643 = vmatpush1.msk.msra.mxu0 %vm261_vm0, %v1021_v13  ;;  %s6969_s23 = smov 31   ;;  %v4607_v12 = vld [vmem:[%s7026_s19 + $0x14] sm:$0xf] }
  0xb6   : > { %6644 = vmatmul.mubr.msk.f32.vlgmr.msra.gmra.mrb[8].mxu0 %vm257_vm2, %v6641_v1  ;;  %v1209_v15 = vsel %vm1208_vm7, %v1201_v14, %v1203_v3 }
  0xb7   : > { %3672 = vrot.lane.b32.xlu1 %v7049_v6, %s6964_s26  ;;  %v1205_v16 = vpop.permute.xlu0 %1204  ;;  %1287 = vmatprep.mubr.f32.mxu0 %v6944_v0 }
  0xb8   : > { %v1210_v17 = vsel %vm1208_vm7, %v1203_v3, %v1205_v16 }
  0xb9   : > { %v1390_v20 = vpop.permute.xlu1 %1389  ;;  %3670 = vrot.lane.b32.xlu0 %v7054_v7, %s6964_s26  ;;  %6649 = vmatprep.subr.msk.mxu0 %vm261_vm0, %v1210_v17 }
  0xba   : > { %6650 = vmatpush1.msk.msra.mxu0 %vm261_vm0, %v1209_v15 }
  0xbb   : > { %3676 = vrot.lane.b32.xlu1 %v3658_v18, %s6964_s26  ;;  %v1207_v21 = vpop.permute.xlu0 %1206  ;;  %6651 = vmatmul.mubr.msk.f32.vlgmr.msra.gmra.mrb[10].mxu0 %vm257_vm2, %v6648_v19 }
  0xbc   : > { %v1211_v22 = vsel %vm1208_vm7, %v1205_v16, %v1207_v21  ;;  %6652 = vmatprep.subr.msk.mxu1 %vm261_vm0, %v1207_v21  ;;  %1474 = vmatprep.mubr.f32.mxu0 %v6944_v0  ;;  %v6690_v21 = vld [vmem:[%s7825_s1 + $0x2c] sm:$0x7]  ;;  %vm4056_vm7 = vcmask 162816  }
  0xbd   : > { %v1388_v23 = vpop.permute.xlu1 %1387  ;;  %3674 = vrot.lane.b32.xlu0 %v7058_v8, %s6964_s26  ;;  %6653 = vmatpush1.msk.msra.mxu1 %vm261_vm0, %v1211_v22 }
  0xbe   : > { %6654 = vmatmul.mubr.msk.f32.vlgmr.msra.gmra.mrb[10].mxu1 %vm257_vm2, %v6648_v19  ;;  %v1396_v24 = vsel %vm1395_vm8, %v1388_v23, %v1390_v20 }
  0xbf   : > { %3859 = vrot.lane.b32.xlu1 %v7041_v4, %s6965_s29  ;;  %v1392_v25 = vpop.permute.xlu0 %1391  ;;  %1545 = vmatprep.mubr.f32.mxu1 %v6944_v0 }
  0xc0   : > { %v1397_v26 = vsel %vm1395_vm8, %v1390_v20, %v1392_v25 }
  0xc1   : > { %v1579_v28 = vpop.permute.xlu1 %1578  ;;  %3668 = vrot.lane.b32.xlu0 %v7045_v5, %s6964_s26  ;;  %6656 = vmatprep.subr.msk.mxu0 %vm261_vm0, %v1397_v26 }
  0xc2   : > { %6657 = vmatpush1.msk.msra.mxu0 %vm261_vm0, %v1396_v24 }
  0xc3   : > { %3857 = vrot.lane.b32.xlu1 %v7032_v2, %s6965_s29  ;;  %v1394_v29 = vpop.permute.xlu0 %1393  ;;  %6658 = vmatmul.mubr.msk.f32.vlgmr.msra.gmra.mrb[12].mxu0 %vm257_vm2, %v6655_v27 }
  0xc4   : > { %v1398_v30 = vsel %vm1395_vm8, %v1392_v25, %v1394_v29  ;;  %6659 = vmatprep.subr.msk.mxu1 %vm261_vm0, %v1394_v29  ;;  %1666 = vmatprep.mubr.f32.mxu0 %v6944_v0  ;;  %vm232_vm8 = vcmask 1042432  }
  0xc5   : > { %v1583_v31 = vpop.permute.xlu1 %1582  ;;  %3861 = vrot.lane.b32.xlu0 %v7064_v9, %s6965_s29  ;;  %6660 = vmatpush1.msk.msra.mxu1 %vm261_vm0, %v1398_v30 }
  0xc6   : > { %6661 = vmatmul.mubr.msk.f32.vlgmr.msra.gmra.mrb[12].mxu1 %vm257_vm2, %v6655_v27 }
  0xc7   : > { %4048 = vrot.lane.b32.xlu1 %v7041_v4, %s6966_s5  ;;  %v1581_v32 = vpop.permute.xlu0 %1580  ;;  %1737 = vmatprep.mubr.f32.mxu1 %v6944_v0 }
  0xc8   : > { %v1588_v33 = vsel %vm1586_vm9, %v1579_v28, %v1581_v32  ;;  %v1589_v37 = vsel %vm1586_vm9, %v1581_v32, %v1583_v31  ;;  %v4986_v32 = vld [vmem:[%s7026_s19 + $0x14] sm:$0xf] }
  0xc9   : > { %v1577_v34 = vpop.permute.xlu1 %1576  ;;  %3863 = vrot.lane.b32.xlu0 %v7071_v11, %s6965_s29  ;;  %6663 = vmatprep.subr.msk.mxu0 %vm261_vm0, %v1588_v33  ;;  %v7375_v33 = vld [vmem:[%s7026_s19 + $0x4] sm:$0xff] }
  0xca   : > { %v1587_v36 = vsel %vm1586_vm9, %v1577_v34, %v1579_v28  ;;  %v6697_v28 = vld [vmem:[%s7825_s1 + $0x30] sm:$0x7] }
  0xcb   : > { %4052 = vrot.lane.b32.xlu1 %v7071_v11, %s6966_s5  ;;  %6664 = vmatpush1.msk.msra.mxu0 %vm261_vm0, %v1587_v36  ;;  %v1585_v4 = vpop.permute.xlu0 %1584  ;;  %v4036_v11 = vld [vmem:[%s7026_s19 + $0x18] sm:$0xf] }
  0xcc   : > { %v1590_v38 = vsel %vm1586_vm9, %v1583_v31, %v1585_v4  ;;  %6665 = vmatmul.mubr.msk.f32.vlgmr.msra.gmra.mrb[14].mxu0 %vm257_vm2, %v6662_v35  ;;  %vm233_vm9 = vcmask 522244  }
  0xcd   : > { %v1773_v40 = vpop.permute.xlu1 %1772  ;;  %4050 = vrot.lane.b32.xlu0 %v7064_v9, %s6966_s5  ;;  %6666 = vmatprep.subr.msk.mxu1 %vm261_vm0, %v1590_v38  ;;  %v6704_v38 = vld [vmem:[%s7825_s1 + $0x34] sm:$0x7] }
  0xce   : > { %6667 = vmatpush1.msk.msra.mxu1 %vm261_vm0, %v1589_v37  ;;  %1858 = vmatprep.mubr.f32.mxu0 %v6944_v0 }
  0xcf   : > { %221 = vperm.xlu1 %6908, %v218_v39   ;;  %v1771_v41 = vpop.permute.xlu0 %1770  ;;  %6668 = vmatmul.mubr.msk.f32.vlgmr.msra.gmra.mrb[14].mxu1 %vm257_vm2, %v6662_v35  ;;  %v7381_v35 = vld [vmem:[%s7026_s19 + $0xc] sm:$0xff] }
  0xd0   : > { %v1780_v42 = vsel %vm1778_vm10, %v1771_v41, %v1773_v40  ;;  %1929 = vmatprep.mubr.f32.mxu1 %v6944_v0 }
  0xd1   : > { %v1777_v43 = vpop.permute.xlu1 %1776  ;;  %4054 = vrot.lane.b32.xlu0 %v4036_v11, %s6966_s5  ;;  %6670 = vmatprep.subr.msk.mxu0 %vm261_vm0, %v1780_v42  ;;  %v7400_v11 = vld [vmem:[%s7026_s19] sm:$0xff]  ;;  %v7407_v42 = vcombine.high %v7381_v35, %v7381_v35 }
  0xd3   : > { %v1775_v9 = vpop.permute.xlu0 %1774  ;;  %4238 = vrot.lane.b32.xlu1 %v7054_v7, %s6967_s10 }
  0xd4   : > { %v1781_v44 = vsel %vm1778_vm10, %v1773_v40, %v1775_v9  ;;  %v1782_v45 = vsel %vm1778_vm10, %v1775_v9, %v1777_v43  ;;  %v5178_v40 = vld [vmem:[%s7026_s19 + $0x14] sm:$0xf]  ;;  %v7415_v9 = vcombine.high %v7400_v11, %v7400_v11 }
  0xd5   : > { %v1961_v47 = vpop.permute.xlu1 %1960  ;;  %4046 = vrot.lane.b32.xlu0 %v7032_v2, %s6966_s5  ;;  %6673 = vmatprep.subr.msk.mxu1 %vm261_vm0, %v1782_v45  ;;  %s6972_s5 = smov 2   ;;  %v7420_v45 = vld [vmem:[%s7026_s19 + $0x8] sm:$0xff] }
  0xd6   : > { %6674 = vmatpush1.msk.msra.mxu1 %vm261_vm0, %v1781_v44 }
  0xd7   : > { %v1769_v48 = vpop.permute.xlu0 %1768  ;;  %6675 = vmatmul.mubr.msk.f32.vlgmr.msra.gmra.mrb[16].mxu1 %vm257_vm2, %v6669_v46  ;;  %4236 = vrot.lane.b32.xlu1 %v7045_v5, %s6967_s10 }
  0xd8   : > { %v1779_v49 = vsel %vm1778_vm10, %v1769_v48, %v1771_v41  ;;  %2116 = vmatprep.mubr.f32.mxu1 %v6944_v0  ;;  %vm7566_vm10 = vmor %vm233_vm9, %vm232_vm8  ;;  %vm6340_vm8 = vcmask 113664  }
  0xd9   : > { %v1959_v50 = vpop.permute.xlu1 %1958  ;;  %6671 = vmatpush1.msk.msra.mxu0 %vm261_vm0, %v1779_v49  ;;  %4240 = vrot.lane.b32.xlu0 %v7049_v6, %s6967_s10 }
  0xda   : > { %6672 = vmatmul.mubr.msk.f32.vlgmr.msra.gmra.mrb[16].mxu0 %vm257_vm2, %v6669_v46  ;;  %v1967_v2 = vsel %vm1966_vm11, %v1959_v50, %v1961_v47  ;;  %v7434_v50 = vcombine.high %v7420_v45, %v7420_v45 }
  0xdb   : > { %v1963_v51 = vpop.permute.xlu0 %1962  ;;  %2045 = vmatprep.mubr.f32.mxu0 %v6944_v0  ;;  %4427 = vrot.lane.b32.xlu1 %v7054_v7, %s6968_s17 }
  0xdc   : > { %v1968_v52 = vsel %vm1966_vm11, %v1961_v47, %v1963_v51  ;;  %v6711_v47 = vld [vmem:[%s7825_s1 + $0x38] sm:$0x7] }
  0xdd   : > { %v2150_v54 = vpop.permute.xlu1 %2149  ;;  %6677 = vmatprep.subr.msk.mxu0 %vm261_vm0, %v1968_v52  ;;  %4242 = vrot.lane.b32.xlu0 %v7058_v8, %s6967_s10 }
  0xde   : > { %6678 = vmatpush1.msk.msra.mxu0 %vm261_vm0, %v1967_v2 }
  0xdf   : > { %v1965_v55 = vpop.permute.xlu0 %1964  ;;  %6679 = vmatmul.mubr.msk.f32.vlgmr.msra.gmra.mrb[18].mxu0 %vm257_vm2, %v6676_v53  ;;  %4431 = vrot.lane.b32.xlu1 %v7058_v8, %s6968_s17 }
  0xe0   : > { %v1969_v56 = vsel %vm1966_vm11, %v1963_v51, %v1965_v55  ;;  %6680 = vmatprep.subr.msk.mxu1 %vm261_vm0, %v1965_v55  ;;  %2237 = vmatprep.mubr.f32.mxu0 %v6944_v0  ;;  %v6718_v55 = vld [vmem:[%s7825_s1 + $0x3c] sm:$0x7]  ;;  %vm4244_vm11 = vcmask 711680  }
  0xe1   : > { %v2154_v57 = vpop.permute.xlu1 %2153  ;;  %6681 = vmatpush1.msk.msra.mxu1 %vm261_vm0, %v1969_v56  ;;  %4429 = vrot.lane.b32.xlu0 %v7049_v6, %s6968_s17 }
  0xe2   : > { %6682 = vmatmul.mubr.msk.f32.vlgmr.msra.gmra.mrb[18].mxu1 %vm257_vm2, %v6676_v53 }
  0xe3   : > { %v2152_v59 = vpop.permute.xlu0 %2151  ;;  %4425 = vrot.lane.b32.xlu1 %v7045_v5, %s6968_s17  ;;  %2308 = vmatprep.mubr.f32.mxu1 %v6944_v0 }
  0xe4   : > { %v2159_v60 = vsel %vm2157_vm12, %v2150_v54, %v2152_v59  ;;  %v2160_v1 = vsel %vm2157_vm12, %v2152_v59, %v2154_v57 }
  0xe5   : > { %v2148_v61 = vpop.permute.xlu1 %2147  ;;  %6684 = vmatprep.subr.msk.mxu0 %vm261_vm0, %v2159_v60  ;;  %4433 = vrot.lane.b32.xlu0 %v4415_v58, %s6968_s17 }
  0xe6   : > { %v2158_v63 = vsel %vm2157_vm12, %v2148_v61, %v2150_v54 }
  0xe7   : > { %6685 = vmatpush1.msk.msra.mxu0 %vm261_vm0, %v2158_v63  ;;  %v2156_v3 = vpop.permute.xlu0 %2155  ;;  %4621 = vrot.lane.b32.xlu1 %v7049_v6, %s6969_s23  ;;  %v5562_v63 = vld [vmem:[%s7026_s19 + $0x14] sm:$0xf] }
  0xe8   : > { %v2161_v10 = vsel %vm2157_vm12, %v2154_v57, %v2156_v3  ;;  %6686 = vmatmul.mubr.msk.f32.vlgmr.msra.gmra.mrb[20].mxu0 %vm257_vm2, %v6683_v62  ;;  %v5370_v57 = vld [vmem:[%s7026_s19 + $0x10] sm:$0xf]  ;;  %vm4435_vm12 = vcmask 482304  }
  0xe9   : > { %v2344_v13 = vpop.permute.xlu1 %2343  ;;  %6687 = vmatprep.subr.msk.mxu1 %vm261_vm0, %v2161_v10  ;;  %4619 = vrot.lane.b32.xlu0 %v7054_v7, %s6969_s23 }
  0xea   : > { %6688 = vmatpush1.msk.msra.mxu1 %vm261_vm0, %v2160_v1  ;;  %2429 = vmatprep.mubr.f32.mxu0 %v6944_v0 }
  0xeb   : > { %v2342_v14 = vpop.permute.xlu0 %2341  ;;  %6689 = vmatmul.mubr.msk.f32.vlgmr.msra.gmra.mrb[20].mxu1 %vm257_vm2, %v6683_v62  ;;  %4625 = vrot.lane.b32.xlu1 %v4607_v12, %s6969_s23 }
  0xec   : > { %v2351_v15 = vsel %vm2349_vm13, %v2342_v14, %v2344_v13  ;;  %2500 = vmatprep.mubr.f32.mxu1 %v6944_v0 }
  0xed   : > { %v2348_v16 = vpop.permute.xlu1 %2347  ;;  %6691 = vmatprep.subr.msk.mxu0 %vm261_vm0, %v2351_v15  ;;  %4623 = vrot.lane.b32.xlu0 %v7058_v8, %s6969_s23 }
  0xef   : > { %v2346_v17 = vpop.permute.xlu0 %2345  ;;  %4809 = vrot.lane.b32.xlu1 %v7054_v7, %s6970_s24 }
  0xf0   : > { %v2352_v18 = vsel %vm2349_vm13, %v2344_v13, %v2346_v17  ;;  %v2353_v19 = vsel %vm2349_vm13, %v2346_v17, %v2348_v16 }
  0xf1   : > { %v2532_v20 = vpop.permute.xlu1 %2531  ;;  %6694 = vmatprep.subr.msk.mxu1 %vm261_vm0, %v2353_v19  ;;  %4617 = vrot.lane.b32.xlu0 %v7045_v5, %s6969_s23  ;;  %s6977_s23 = smov 54  }
  0xf2   : > { %6695 = vmatpush1.msk.msra.mxu1 %vm261_vm0, %v2352_v18  ;;  %v7483_v18 = vld [vmem:[%s7026_s19 + $0x10] sm:$0xff] }
  0xf3   : > { %v2340_v22 = vpop.permute.xlu0 %2339  ;;  %6696 = vmatmul.mubr.msk.f32.vlgmr.msra.gmra.mrb[22].mxu1 %vm257_vm2, %v6690_v21  ;;  %4807 = vrot.lane.b32.xlu1 %v7045_v5, %s6970_s24 }
  0xf4   : > { %v2350_v23 = vsel %vm2349_vm13, %v2340_v22, %v2342_v14  ;;  %2687 = vmatprep.mubr.f32.mxu1 %v6944_v0  ;;  %v6725_v14 = vld [vmem:[%s7825_s1 + $0x40] sm:$0x7]  ;;  %v7491_v22 = vcombine.high %v7483_v18, %v7483_v18  ;;  %vm4627_vm13 = vcmask 252928  }
  0xf5   : > { %v2530_v24 = vpop.permute.xlu1 %2529  ;;  %6692 = vmatpush1.msk.msra.mxu0 %vm261_vm0, %v2350_v23  ;;  %4811 = vrot.lane.b32.xlu0 %v7049_v6, %s6970_s24 }
  0xf6   : > { %6693 = vmatmul.mubr.msk.f32.vlgmr.msra.gmra.mrb[22].mxu0 %vm257_vm2, %v6690_v21  ;;  %v2538_v25 = vsel %vm2537_vm14, %v2530_v24, %v2532_v20 }
  0xf7   : > { %v2534_v26 = vpop.permute.xlu0 %2533  ;;  %2616 = vmatprep.mubr.f32.mxu0 %v6944_v0  ;;  %4998 = vrot.lane.b32.xlu1 %v7054_v7, %s6971_s27 }
  0xf8   : > { %v2539_v27 = vsel %vm2537_vm14, %v2532_v20, %v2534_v26 }
  0xf9   : > { %v2721_v29 = vpop.permute.xlu1 %2720  ;;  %6698 = vmatprep.subr.msk.mxu0 %vm261_vm0, %v2539_v27  ;;  %4813 = vrot.lane.b32.xlu0 %v7058_v8, %s6970_s24 }
  0xfa   : > { %6699 = vmatpush1.msk.msra.mxu0 %vm261_vm0, %v2538_v25 }
  0xfb   : > { %v2536_v30 = vpop.permute.xlu0 %2535  ;;  %6700 = vmatmul.mubr.msk.f32.vlgmr.msra.gmra.mrb[24].mxu0 %vm257_vm2, %v6697_v28  ;;  %5002 = vrot.lane.b32.xlu1 %v7058_v8, %s6971_s27 }
  0xfc   : > { %v2540_v7 = vsel %vm2537_vm14, %v2534_v26, %v2536_v30  ;;  %6701 = vmatprep.subr.msk.mxu1 %vm261_vm0, %v2536_v30  ;;  %2808 = vmatprep.mubr.f32.mxu0 %v6944_v0  ;;  %v6732_v26 = vld [vmem:[%s7825_s1 + $0x44] sm:$0x7]  ;;  %vm4815_vm14 = vcmask 932864  }
  0xfd   : > { %v2725_v31 = vpop.permute.xlu1 %2724  ;;  %6702 = vmatpush1.msk.msra.mxu1 %vm261_vm0, %v2540_v7  ;;  %5000 = vrot.lane.b32.xlu0 %v7049_v6, %s6971_s27  ;;  %v7386_v6 = vcombine.high %v7375_v33, %v7375_v33 }
  0xfe   : > { %6703 = vmatmul.mubr.msk.f32.vlgmr.msra.gmra.mrb[24].mxu1 %vm257_vm2, %v6697_v28 }
  0xff   : > { %v2723_v34 = vpop.permute.xlu0 %2722  ;;  %2879 = vmatprep.mubr.f32.mxu1 %v6944_v0  ;;  %4996 = vrot.lane.b32.xlu1 %v7045_v5, %s6971_s27 }
 0x100   : > { %v2730_v8 = vsel %vm2728_vm15, %v2721_v29, %v2723_v34  ;;  %v2731_v4 = vsel %vm2728_vm15, %v2723_v34, %v2725_v31 }
 0x101   : > { %v2719_v36 = vpop.permute.xlu1 %2718  ;;  %6705 = vmatprep.subr.msk.mxu0 %vm261_vm0, %v2730_v8  ;;  %5004 = vrot.lane.b32.xlu0 %v4986_v32, %s6971_s27 }
 0x102   : > { %v2729_v37 = vsel %vm2728_vm15, %v2719_v36, %v2721_v29  ;;  %v6739_v36 = vld [vmem:[%s7825_s1 + $0x48] sm:$0x7] }
 0x103   : > { %6706 = vmatpush1.msk.msra.mxu0 %vm261_vm0, %v2729_v37  ;;  %v2727_v5 = vpop.permute.xlu0 %2726  ;;  %5192 = vrot.lane.b32.xlu1 %v7381_v35, %s6972_s5 }
 0x104   : > { %v2732_v39 = vsel %vm2728_vm15, %v2725_v31, %v2727_v5  ;;  %6707 = vmatmul.mubr.msk.f32.vlgmr.msra.gmra.mrb[26].mxu0 %vm257_vm2, %v6704_v38  ;;  %v6128_v5 = vld [vmem:[%s7026_s19 + $0x14] sm:$0xf]  ;;  %vm5006_vm15 = vcmask 474112  }
 0x105   : > { %v2913_v41 = vpop.permute.xlu1 %2912  ;;  %6708 = vmatprep.subr.msk.mxu1 %vm261_vm0, %v2732_v39  ;;  %5190 = vrot.lane.b32.xlu0 %v7386_v6, %s6972_s5 }
 0x106   : > { %6709 = vmatpush1.msk.msra.mxu1 %vm261_vm0, %v2731_v4  ;;  %2995 = vmatprep.mubr.f32.mxu0 %v6944_v0 }
 0x107   : > { %v2911_v43 = vpop.permute.xlu0 %2910  ;;  %6710 = vmatmul.mubr.msk.f32.vlgmr.msra.gmra.mrb[26].mxu1 %vm257_vm2, %v6704_v38  ;;  %5196 = vrot.lane.b32.xlu1 %v5178_v40, %s6972_s5 }
 0x108   : > { %v2918_v44 = vsel %vm2916_vm1, %v2911_v43, %v2913_v41  ;;  %3066 = vmatprep.mubr.f32.mxu1 %v6944_v0 }
 0x109   : > { %v2915_v46 = vpop.permute.xlu1 %2914  ;;  %6712 = vmatprep.subr.msk.mxu0 %vm261_vm0, %v2918_v44  ;;  %5194 = vrot.lane.b32.xlu0 %v7407_v42, %s6972_s5 }
 0x10a   : > { %v2919_v48 = vsel %vm2916_vm1, %v2913_v41, %v2915_v46  ;;  %6715 = vmatprep.subr.msk.mxu1 %vm261_vm0, %v2915_v46 }
 0x10b   : > { %v2909_v49 = vpop.permute.xlu0 %2908  ;;  %6716 = vmatpush1.msk.msra.mxu1 %vm261_vm0, %v2919_v48  ;;  %5382 = vrot.lane.b32.xlu1 %v7415_v9, %s6973_s8  ;;  %v6979_v48 = vmov 839922192  }
 0x10c   : > { %v2917_v2 = vsel %vm2916_vm1, %v2909_v49, %v2911_v43  ;;  %6717 = vmatmul.mubr.msk.f32.vlgmr.msra.gmra.mrb[28].mxu1 %vm257_vm2, %v6711_v47  ;;  %v224_v49 = vunpack.c.l.s4 %v6979_v48  ;;  %v6781_v48 = vld [vmem:[%s7825_s1 + $0x60] sm:$0x7]  ;;  %vm5198_vm1 = vcmask 15360  }
 0x10d   : > { %v3100_v51 = vpop.permute.xlu1 %3099  ;;  %6713 = vmatpush1.msk.msra.mxu0 %vm261_vm0, %v2917_v2  ;;  %5188 = vrot.lane.b32.xlu0 %v7375_v33, %s6972_s5  ;;  %v226_v2 = vlaneseq }
 0x10e   : > { %6714 = vmatmul.mubr.msk.f32.vlgmr.msra.gmra.mrb[28].mxu0 %vm257_vm2, %v6711_v47  ;;  %3253 = vmatprep.mubr.f32.mxu1 %v6944_v0 }
 0x10f   : > { %v3098_v52 = vpop.permute.xlu0 %3097  ;;  %5386 = vrot.lane.b32.xlu1 %v7434_v50, %s6973_s8  ;;  %3182 = vmatprep.mubr.f32.mxu0 %v6944_v0 }
 0x110   : > { %v3105_v53 = vsel %vm3103_vm3, %v3098_v52, %v3100_v51 }
 0x111   : > { %v3102_v54 = vpop.permute.xlu1 %3101  ;;  %6719 = vmatprep.subr.msk.mxu0 %vm261_vm0, %v3105_v53  ;;  %5384 = vrot.lane.b32.xlu0 %v7420_v45, %s6973_s8  ;;  %v225_v53 = vunpack.c.0.s8 %v224_v49 }
 0x112   : > { %v3106_v56 = vsel %vm3103_vm3, %v3100_v51, %v3102_v54  ;;  %6722 = vmatprep.subr.msk.mxu1 %vm261_vm0, %v3102_v54  ;;  %v6753_v51 = vld [vmem:[%s7825_s1 + $0x50] sm:$0x7]  ;;  %v227_v54 = vshrl.u32 %v226_v2, 7 }
 0x113   : > { %v3096_v58 = vpop.permute.xlu0 %3095  ;;  %6723 = vmatpush1.msk.msra.mxu1 %vm261_vm0, %v3106_v56  ;;  %5380 = vrot.lane.b32.xlu1 %v7400_v11, %s6973_s8 }
 0x114   : > { %v3104_v59 = vsel %vm3103_vm3, %v3096_v58, %v3098_v52  ;;  %6724 = vmatmul.mubr.msk.f32.vlgmr.msra.gmra.mrb[30].mxu1 %vm257_vm2, %v6718_v55  ;;  %v228_v56 = vsub.s32 %v225_v53, %v227_v54  ;;  %vm5390_vm3 = vcmask 105472  }
 0x115   : > { %v3289_v60 = vpop.permute.xlu1 %3288  ;;  %6720 = vmatpush1.msk.msra.mxu0 %vm261_vm0, %v3104_v59  ;;  %5388 = vrot.lane.b32.xlu0 %v5370_v57, %s6973_s8 }
 0x116   : > { %6721 = vmatmul.mubr.msk.f32.vlgmr.msra.gmra.mrb[30].mxu0 %vm257_vm2, %v6718_v55  ;;  %3445 = vmatprep.mubr.f32.mxu1 %v6944_v0 }
 0x117   : > { %v3287_v61 = vpop.permute.xlu0 %3286  ;;  %3374 = vmatprep.mubr.f32.mxu0 %v6944_v0  ;;  %5576 = vrot.lane.b32.xlu1 %v7381_v35, %s6974_s11 }
 0x118   : > { %v3296_v62 = vsel %vm3294_vm4, %v3287_v61, %v3289_v60 }
 0x119   : > { %v3293_v1 = vpop.permute.xlu1 %3292  ;;  %6726 = vmatprep.subr.msk.mxu0 %vm261_vm0, %v3296_v62  ;;  %5574 = vrot.lane.b32.xlu0 %v7386_v6, %s6974_s11 }
 0x11b   : > { %v3291_v3 = vpop.permute.xlu0 %3290  ;;  %5580 = vrot.lane.b32.xlu1 %v5562_v63, %s6974_s11 }
 0x11c   : > { %v3297_v10 = vsel %vm3294_vm4, %v3289_v60, %v3291_v3  ;;  %v3298_v12 = vsel %vm3294_vm4, %v3291_v3, %v3293_v1 }
 0x11d   : > { %v3479_v13 = vpop.permute.xlu1 %3478  ;;  %6729 = vmatprep.subr.msk.mxu1 %vm261_vm0, %v3298_v12  ;;  %5578 = vrot.lane.b32.xlu0 %v7407_v42, %s6974_s11 }
 0x11e   : > { %6730 = vmatpush1.msk.msra.mxu1 %vm261_vm0, %v3297_v10 }
 0x11f   : > { %v3285_v15 = vpop.permute.xlu0 %3284  ;;  %6731 = vmatmul.mubr.msk.f32.vlgmr.msra.gmra.mrb[32].mxu1 %vm257_vm2, %v6725_v14  ;;  %5764 = vrot.lane.b32.xlu1 %v7434_v50, %s6975_s18 }
 0x120   : > { %v3295_v16 = vsel %vm3294_vm4, %v3285_v15, %v3287_v61  ;;  %3637 = vmatprep.mubr.f32.mxu1 %v6944_v0  ;;  %v6760_v61 = vld [vmem:[%s7825_s1 + $0x54] sm:$0x7]  ;;  %vm5582_vm4 = vcmask 465920  }
 0x121   : > { %v3483_v17 = vpop.permute.xlu1 %3482  ;;  %6727 = vmatpush1.msk.msra.mxu0 %vm261_vm0, %v3295_v16  ;;  %5572 = vrot.lane.b32.xlu0 %v7375_v33, %s6974_s11 }
 0x122   : > { %6728 = vmatmul.mubr.msk.f32.vlgmr.msra.gmra.mrb[32].mxu0 %vm257_vm2, %v6725_v14 }
 0x123   : > { %v3481_v19 = vpop.permute.xlu0 %3480  ;;  %5762 = vrot.lane.b32.xlu1 %v7420_v45, %s6975_s18  ;;  %3566 = vmatprep.mubr.f32.mxu0 %v6944_v0 }
 0x124   : > { %v3488_v20 = vsel %vm3486_vm5, %v3479_v13, %v3481_v19  ;;  %v3489_v24 = vsel %vm3486_vm5, %v3481_v19, %v3483_v17 }
 0x125   : > { %v3477_v21 = vpop.permute.xlu1 %3476  ;;  %6733 = vmatprep.subr.msk.mxu0 %vm261_vm0, %v3488_v20  ;;  %5766 = vrot.lane.b32.xlu0 %v7483_v18, %s6975_s18 }
 0x126   : > { %v3487_v23 = vsel %vm3486_vm5, %v3477_v21, %v3479_v13  ;;  %v6767_v21 = vld [vmem:[%s7825_s1 + $0x58] sm:$0x7] }
 0x127   : > { %6734 = vmatpush1.msk.msra.mxu0 %vm261_vm0, %v3487_v23  ;;  %v3485_v25 = vpop.permute.xlu0 %3484  ;;  %5951 = vrot.lane.b32.xlu1 %v7415_v9, %s6976_s22 }
 0x128   : > { %v3490_v27 = vsel %vm3486_vm5, %v3483_v17, %v3485_v25  ;;  %6735 = vmatmul.mubr.msk.f32.vlgmr.msra.gmra.mrb[34].mxu0 %vm257_vm2, %v6732_v26  ;;  %vm5770_vm5 = vcmask 826368  }
 0x129   : > { %6736 = vmatprep.subr.msk.mxu1 %vm261_vm0, %v3490_v27  ;;  %v3673_v28 = vpop.permute.xlu1 %3672  ;;  %5768 = vrot.lane.b32.xlu0 %v7491_v22, %s6975_s18 }
 0x12a   : > { %6737 = vmatpush1.msk.msra.mxu1 %vm261_vm0, %v3489_v24  ;;  %3757 = vmatprep.mubr.f32.mxu0 %v6944_v0 }
 0x12b   : > { %v3671_v29 = vpop.permute.xlu0 %3670  ;;  %6738 = vmatmul.mubr.msk.f32.vlgmr.msra.gmra.mrb[34].mxu1 %vm257_vm2, %v6732_v26  ;;  %5949 = vrot.lane.b32.xlu1 %v7400_v11, %s6976_s22 }
 0x12c   : > { %v3679_v30 = vsel %vm257_vm2, %v3671_v29, %v3673_v28  ;;  %3828 = vmatprep.mubr.f32.mxu1 %v6944_v0 }
 0x12d   : > { %v3677_v7 = vpop.permute.xlu1 %3676  ;;  %6740 = vmatprep.subr.msk.mxu0 %vm261_vm0, %v3679_v30  ;;  %5953 = vrot.lane.b32.xlu0 %v7420_v45, %s6976_s22 }
 0x12f   : > { %v3675_v31 = vpop.permute.xlu0 %3674  ;;  %6140 = vrot.lane.b32.xlu1 %v7386_v6, %s6977_s23 }
 0x130   : > { %v3680_v32 = vsel %vm257_vm2, %v3673_v28, %v3675_v31  ;;  %v3681_v34 = vsel %vm257_vm2, %v3675_v31, %v3677_v7 }
 0x131   : > { %6743 = vmatprep.subr.msk.mxu1 %vm261_vm0, %v3681_v34  ;;  %v3860_v8 = vpop.permute.xlu1 %3859  ;;  %5955 = vrot.lane.b32.xlu0 %v7434_v50, %s6976_s22 }
 0x132   : > { %6744 = vmatpush1.msk.msra.mxu1 %vm261_vm0, %v3680_v32 }
 0x133   : > { %v3669_v37 = vpop.permute.xlu0 %3668  ;;  %6745 = vmatmul.mubr.msk.f32.vlgmr.msra.gmra.mrb[36].mxu1 %vm257_vm2, %v6739_v36  ;;  %6144 = vrot.lane.b32.xlu1 %v7407_v42, %s6977_s23  ;;  %v6320_v42 = vld [vmem:[%s7026_s19 + $0x18] sm:$0xf] }
 0x134   : > { %v3678_v6 = vsel %vm257_vm2, %v3669_v37, %v3671_v29  ;;  %4015 = vmatprep.mubr.f32.mxu1 %v6944_v0 }
 0x135   : > { %v3858_v4 = vpop.permute.xlu1 %3857  ;;  %6741 = vmatpush1.msk.msra.mxu0 %vm261_vm0, %v3678_v6  ;;  %6142 = vrot.lane.b32.xlu0 %v7381_v35, %s6977_s23  ;;  %v6746_v35 = vld [vmem:[%s7825_s1 + $0x4c] sm:$0x7] }
 0x136   : > { %6742 = vmatmul.mubr.msk.f32.vlgmr.msra.gmra.mrb[36].mxu0 %vm257_vm2, %v6739_v36  ;;  %v3866_v38 = vsel %vm3865_vm6, %v3858_v4, %v3860_v8  ;;  %v6774_v4 = vld [vmem:[%s7825_s1 + $0x5c] sm:$0x7] }
 0x137   : > { %v3862_v39 = vpop.permute.xlu0 %3861  ;;  %6138 = vrot.lane.b32.xlu1 %v7375_v33, %s6977_s23  ;;  %3944 = vmatprep.mubr.f32.mxu0 %v6944_v0 }
 0x138   : > { %v3867_v40 = vsel %vm3865_vm6, %v3860_v8, %v3862_v39 }
 0x139   : > { %6747 = vmatprep.subr.msk.mxu0 %vm261_vm0, %v3867_v40  ;;  %6146 = vrot.lane.b32.xlu0 %v6128_v5, %s6977_s23  ;;  %v4049_v11 = vpop.permute.xlu1 %4048 }
 0x13a   : > { %6748 = vmatpush1.msk.msra.mxu0 %vm261_vm0, %v3866_v38 }
 0x13b   : > { %v3864_v41 = vpop.permute.xlu0 %3863  ;;  %6749 = vmatmul.mubr.msk.f32.vlgmr.msra.gmra.mrb[38].mxu0 %vm257_vm2, %v6746_v35  ;;  %6334 = vrot.lane.b32.xlu1 %v7483_v18, %s6978_s28 }
 0x13c   : > { %v3868_v33 = vsel %vm3865_vm6, %v3862_v39, %v3864_v41  ;;  %6750 = vmatprep.subr.msk.mxu1 %vm261_vm0, %v3864_v41  ;;  %4136 = vmatprep.mubr.f32.mxu0 %v6944_v0  ;;  %vm5957_vm6 = vcmask 769024  }
 0x13d   : > { %6751 = vmatpush1.msk.msra.mxu1 %vm261_vm0, %v3868_v33  ;;  %6332 = vrot.lane.b32.xlu0 %v7434_v50, %s6978_s28  ;;  %v4053_v44 = vpop.permute.xlu1 %4052 }
 0x13e   : > { %6752 = vmatmul.mubr.msk.f32.vlgmr.msra.gmra.mrb[38].mxu1 %vm257_vm2, %v6746_v35 }
 0x13f   : > { %v4051_v43 = vpop.permute.xlu0 %4050  ;;  %6338 = vrot.lane.b32.xlu1 %v6320_v42, %s6978_s28  ;;  %4207 = vmatprep.mubr.f32.mxu1 %v6944_v0 }
 0x140   : > { %v4058_v9 = vsel %vm4056_vm7, %v4049_v11, %v4051_v43  ;;  %v4059_v46 = vsel %vm4056_vm7, %v4051_v43, %v4053_v44 }
 0x141   : > { %6754 = vmatprep.subr.msk.mxu0 %vm261_vm0, %v4058_v9  ;;  %6336 = vrot.lane.b32.xlu0 %v7491_v22, %s6978_s28 }
 0x143   : > { %v4055_v47 = vpop.permute.xlu0 %4054 }
 0x144   : > { %v4060_v50 = vsel %vm4056_vm7, %v4053_v44, %v4055_v47 }
 0x145   : > { %6757 = vmatprep.subr.msk.mxu1 %vm261_vm0, %v4060_v50  ;;  %6330 = vrot.lane.b32.xlu0 %v7420_v45, %s6978_s28 }
 0x146   : > { %6758 = vmatpush1.msk.msra.mxu1 %vm261_vm0, %v4059_v46 }
 0x147   : > { %v4047_v52 = vpop.permute.xlu0 %4046  ;;  %6759 = vmatmul.mubr.msk.f32.vlgmr.msra.gmra.mrb[40].mxu1 %vm257_vm2, %v6753_v51 }
 0x148   : > { %v4057_v55 = vsel %vm4056_vm7, %v4047_v52, %v4049_v11  ;;  %4394 = vmatprep.mubr.f32.mxu1 %v6944_v0  ;;  %vm6148_vm7 = vcmask 441344  }
 0x149   : > { %6755 = vmatpush1.msk.msra.mxu0 %vm261_vm0, %v4057_v55 }
 0x14a   : > { %6756 = vmatmul.mubr.msk.f32.vlgmr.msra.gmra.mrb[40].mxu0 %vm257_vm2, %v6753_v51 }
 0x14b   : > { %v4241_v57 = vpop.permute.xlu0 %4240  ;;  %4323 = vmatprep.mubr.f32.mxu0 %v6944_v0 }
 0x14e   : > { %v222_v58 = vpop.permute.xlu1 %221 }
 0x14f   : > { %v229_v59 = vrot.slane %v222_v58, %v228_v56  ;;  %v4243_v60 = vpop.permute.xlu0 %4242 }
 0x150   : > { %v4247_v62 = vsel %vm4244_vm11, %v4241_v57, %v4243_v60  ;;  %6764 = vmatprep.subr.msk.mxu1 %vm261_vm0, %v4243_v60 }
 0x151   : > { %231 = vst [vmem:[#allocation2] sm:$0x77] %v229_v59  ;;  %235 = vst.msk [vmem:[#allocation2 + $0x8] sm:$0x77] %vm7566_vm10, %v229_v59  ;;  %6765 = vmatpush1.msk.msra.mxu1 %vm261_vm0, %v4247_v62 }
 0x152   : > { %v4239_v63 = vpop.permute.xlu1 %4238  ;;  %6766 = vmatmul.mubr.msk.f32.vlgmr.msra.gmra.mrb[42].mxu1 %vm257_vm2, %v6760_v61 }
 0x153   : > { %v4246_v1 = vsel %vm4244_vm11, %v4239_v63, %v4241_v57  ;;  %v4430_v3 = vpop.permute.xlu0 %4429  ;;  %4586 = vmatprep.mubr.f32.mxu1 %v6944_v0 }
 0x154   : > { %6761 = vmatprep.subr.msk.mxu0 %vm261_vm0, %v4246_v1 }
 0x156   : > { %v4237_v10 = vpop.permute.xlu1 %4236 }
 0x157   : > { %v4245_v12 = vsel %vm4244_vm11, %v4237_v10, %v4239_v63  ;;  %v4434_v13 = vpop.permute.xlu0 %4433 }
 0x158   : > { %6762 = vmatpush1.msk.msra.mxu0 %vm261_vm0, %v4245_v12  ;;  %v239_v30 = vld [vmem:[#allocation2 + $0x8] sm:$0x77]  ;;  %v238_v31 = vld [vmem:[#allocation2] sm:$0x77] }
 0x159   : > { %6763 = vmatmul.mubr.msk.f32.vlgmr.msra.gmra.mrb[42].mxu0 %vm257_vm2, %v6760_v61 }
 0x15a   : > { %v4428_v14 = vpop.permute.xlu1 %4427  ;;  %4515 = vmatprep.mubr.f32.mxu0 %v6944_v0 }
 0x15b   : > { %v4437_v15 = vsel %vm4435_vm12, %v4428_v14, %v4430_v3  ;;  %v4620_v16 = vpop.permute.xlu0 %4619 }
 0x15c   : > { %6768 = vmatprep.subr.msk.mxu0 %vm261_vm0, %v4437_v15 }
 0x15e   : > { %v4432_v17 = vpop.permute.xlu1 %4431 }
 0x15f   : > { %v4438_v18 = vsel %vm4435_vm12, %v4430_v3, %v4432_v17  ;;  %v4439_v19 = vsel %vm4435_vm12, %v4432_v17, %v4434_v13  ;;  %v4624_v20 = vpop.permute.xlu0 %4623  ;;  %v6788_v17 = vld [vmem:[%s7825_s1 + $0x64] sm:$0x7] }
 0x160   : > { %6771 = vmatprep.subr.msk.mxu1 %vm261_vm0, %v4439_v19 }
 0x161   : > { %6772 = vmatpush1.msk.msra.mxu1 %vm261_vm0, %v4438_v18 }
 0x162   : > { %v407_v22 = vpop.f32.mrb[0].mxu1  ;;  %v4426_v23 = vpop.permute.xlu1 %4425  ;;  %6773 = vmatmul.mubr.msk.f32.vlgmr.msra.gmra.mrb[44].mxu1 %vm257_vm2, %v6767_v21 }
 0x163   : > { %v4436_v24 = vsel %vm4435_vm12, %v4426_v23, %v4428_v14  ;;  %v336_v25 = vpop.f32.mrb[0].mxu0  ;;  %v409_v26 = vpop.f32.mrb[1].mxu1  ;;  %4778 = vmatprep.mubr.f32.mxu1 %v6944_v0 }
 0x164   : > { %v417_v27 = vcombine.low %v407_v22, %v409_v26  ;;  %v338_v28 = vpop.f32.mrb[1].mxu0  ;;  %6769 = vmatpush1.msk.msra.mxu0 %vm261_vm0, %v4436_v24  ;;  %v4618_v29 = vpop.permute.xlu0 %4617 }
 0x165   : > { %v416_v7 = vcombine.low %v336_v25, %v338_v28  ;;  %6770 = vmatmul.mubr.msk.f32.vlgmr.msra.gmra.mrb[44].mxu0 %vm257_vm2, %v6767_v21  ;;  %v4628_v8 = vsel %vm4627_vm13, %v4618_v29, %v4620_v16 }
 0x166   : > { %v421_v32 = vadd.f32 %v417_v27, %v239_v30  ;;  %v4622_v34 = vpop.permute.xlu1 %4621  ;;  %4707 = vmatprep.mubr.f32.mxu0 %v6944_v0 }
 0x167   : > { %v420_v36 = vadd.f32 %v416_v7, %v238_v31  ;;  %v4629_v37 = vsel %vm4627_vm13, %v4620_v16, %v4622_v34  ;;  %v597_v6 = vpop.f32.mrb[2].mxu1  ;;  %v4630_v11 = vsel %vm4627_vm13, %v4622_v34, %v4624_v20  ;;  %v6795_v7 = vld [vmem:[%s7825_s1 + $0x68] sm:$0x7] }
 0x168   : > { %426 = vst.msk [vmem:[#allocation2 + $0x8] sm:$0x77] %vm7566_vm10, %v421_v32  ;;  %6775 = vmatprep.subr.msk.mxu0 %vm261_vm0, %v4629_v37  ;;  %v599_v5 = vpop.f32.mrb[3].mxu1  ;;  %v4812_v38 = vpop.permute.xlu0 %4811 }
 0x169   : > { %422 = vst [vmem:[#allocation2] sm:$0x77] %v420_v36  ;;  %6776 = vmatpush1.msk.msra.mxu0 %vm261_vm0, %v4628_v8  ;;  %v526_v39 = vpop.f32.mrb[2].mxu0  ;;  %v607_v40 = vcombine.low %v597_v6, %v599_v5 }
 0x16a   : > { %v4626_v35 = vpop.permute.xlu1 %4625  ;;  %v528_v41 = vpop.f32.mrb[3].mxu0  ;;  %6777 = vmatmul.mubr.msk.f32.vlgmr.msra.gmra.mrb[46].mxu0 %vm257_vm2, %v6774_v4 }
 0x16b   : > { %v4631_v33 = vsel %vm4627_vm13, %v4624_v20, %v4626_v35  ;;  %v606_v42 = vcombine.low %v526_v39, %v528_v41  ;;  %4894 = vmatprep.mubr.f32.mxu0 %v6944_v0 }
 0x16c   : > { %6778 = vmatprep.subr.msk.mxu1 %vm261_vm0, %v4631_v33  ;;  %v4814_v43 = vpop.permute.xlu0 %4813 }
 0x16d   : > { %6779 = vmatpush1.msk.msra.mxu1 %vm261_vm0, %v4630_v11  ;;  %v4818_v9 = vsel %vm4815_vm14, %v4812_v38, %v4814_v43 }
 0x16e   : > { %v4810_v44 = vpop.permute.xlu1 %4809  ;;  %6780 = vmatmul.mubr.msk.f32.vlgmr.msra.gmra.mrb[46].mxu1 %vm257_vm2, %v6774_v4  ;;  %6785 = vmatprep.subr.msk.mxu1 %vm261_vm0, %v4814_v43 }
 0x16f   : > { %v430_v46 = vld [vmem:[#allocation2 + $0x8] sm:$0x77]  ;;  %v4817_v47 = vsel %vm4815_vm14, %v4810_v44, %v4812_v38  ;;  %6786 = vmatpush1.msk.msra.mxu1 %vm261_vm0, %v4818_v9  ;;  %4965 = vmatprep.mubr.f32.mxu1 %v6944_v0 }
 0x170   : > { %v429_v49 = vld [vmem:[#allocation2] sm:$0x77]  ;;  %v611_v2 = vadd.f32 %v607_v40, %v430_v46  ;;  %6782 = vmatprep.subr.msk.mxu0 %vm261_vm0, %v4817_v47  ;;  %v5001_v50 = vpop.permute.xlu0 %5000 }
 0x171   : > { %v610_v51 = vadd.f32 %v606_v42, %v429_v49 }
 0x172   : > { %613 = vst.msk [vmem:[#allocation2 + $0x8] sm:$0x77] %vm7566_vm10, %v611_v2  ;;  %v4808_v52 = vpop.permute.xlu1 %4807  ;;  %v789_v53 = vpop.f32.mrb[4].mxu1  ;;  %6787 = vmatmul.mubr.msk.f32.vlgmr.msra.gmra.mrb[48].mxu1 %vm257_vm2, %v6781_v48 }
 0x173   : > { %612 = vst [vmem:[#allocation2] sm:$0x77] %v610_v51  ;;  %v4816_v54 = vsel %vm4815_vm14, %v4808_v52, %v4810_v44  ;;  %v791_v55 = vpop.f32.mrb[5].mxu1  ;;  %5157 = vmatprep.mubr.f32.mxu1 %v6944_v0  ;;  %v6802_v51 = vld [vmem:[%s7825_s1 + $0x6c] sm:$0x7] }
 0x174   : > { %v799_v56 = vcombine.low %v789_v53, %v791_v55  ;;  %6783 = vmatpush1.msk.msra.mxu0 %vm261_vm0, %v4816_v54  ;;  %v5005_v57 = vpop.permute.xlu0 %5004 }
 0x175   : > { %v718_v58 = vpop.f32.mrb[4].mxu0  ;;  %6784 = vmatmul.mubr.msk.f32.vlgmr.msra.gmra.mrb[48].mxu0 %vm257_vm2, %v6781_v48 }
 0x176   : > { %v4999_v59 = vpop.permute.xlu1 %4998  ;;  %v720_v60 = vpop.f32.mrb[5].mxu0  ;;  %5086 = vmatprep.mubr.f32.mxu0 %v6944_v0 }
 0x177   : > { %v798_v61 = vcombine.low %v718_v58, %v720_v60  ;;  %v5008_v62 = vsel %vm5006_vm15, %v4999_v59, %v5001_v50 }
 0x178   : > { %6789 = vmatprep.subr.msk.mxu0 %vm261_vm0, %v5008_v62  ;;  %v5191_v63 = vpop.permute.xlu0 %5190 }
 0x179   : > { %v618_v1 = vld [vmem:[#allocation2 + $0x8] sm:$0x77] }
 0x17a   : > { %v617_v3 = vld [vmem:[#allocation2] sm:$0x77]  ;;  %v803_v10 = vadd.f32 %v799_v56, %v618_v1  ;;  %v5003_v12 = vpop.permute.xlu1 %5002 }
 0x17b   : > { %v802_v13 = vadd.f32 %v798_v61, %v617_v3  ;;  %v5009_v14 = vsel %vm5006_vm15, %v5001_v50, %v5003_v12  ;;  %v5010_v15 = vsel %vm5006_vm15, %v5003_v12, %v5005_v57  ;;  %v910_v16 = vpop.f32.mrb[6].mxu0 }
 0x17c   : > { %805 = vst.msk [vmem:[#allocation2 + $0x8] sm:$0x77] %vm7566_vm10, %v803_v10  ;;  %6792 = vmatprep.subr.msk.mxu1 %vm261_vm0, %v5010_v15  ;;  %v912_v18 = vpop.f32.mrb[7].mxu0  ;;  %v5195_v19 = vpop.permute.xlu0 %5194  ;;  %v6809_v10 = vld [vmem:[%s7825_s1 + $0x70] sm:$0x7] }
 0x17d   : > { %804 = vst [vmem:[#allocation2] sm:$0x77] %v802_v13  ;;  %v990_v20 = vcombine.low %v910_v16, %v912_v18  ;;  %6793 = vmatpush1.msk.msra.mxu1 %vm261_vm0, %v5009_v14 }
 0x17e   : > { %v4997_v21 = vpop.permute.xlu1 %4996  ;;  %v981_v22 = vpop.f32.mrb[6].mxu1  ;;  %6794 = vmatmul.mubr.msk.f32.vlgmr.msra.gmra.mrb[50].mxu1 %vm257_vm2, %v6788_v17 }
 0x17f   : > { %v5007_v23 = vsel %vm5006_vm15, %v4997_v21, %v4999_v59  ;;  %v983_v24 = vpop.f32.mrb[7].mxu1  ;;  %5349 = vmatprep.mubr.f32.mxu1 %v6944_v0 }
 0x180   : > { %v991_v25 = vcombine.low %v981_v22, %v983_v24  ;;  %6790 = vmatpush1.msk.msra.mxu0 %vm261_vm0, %v5007_v23  ;;  %v5189_v26 = vpop.permute.xlu0 %5188 }
 0x181   : > { %6791 = vmatmul.mubr.msk.f32.vlgmr.msra.gmra.mrb[50].mxu0 %vm257_vm2, %v6788_v17  ;;  %v5199_v28 = vsel %vm5198_vm1, %v5189_v26, %v5191_v63 }
 0x182   : > { %v5193_v27 = vpop.permute.xlu1 %5192  ;;  %5278 = vmatprep.mubr.f32.mxu0 %v6944_v0 }
 0x183   : > { %v810_v29 = vld [vmem:[#allocation2 + $0x8] sm:$0x77]  ;;  %v5200_v30 = vsel %vm5198_vm1, %v5191_v63, %v5193_v27  ;;  %v5201_v36 = vsel %vm5198_vm1, %v5193_v27, %v5195_v19 }
 0x184   : > { %v809_v31 = vld [vmem:[#allocation2] sm:$0x77]  ;;  %v995_v32 = vadd.f32 %v991_v25, %v810_v29  ;;  %6796 = vmatprep.subr.msk.mxu0 %vm261_vm0, %v5200_v30  ;;  %v5385_v34 = vpop.permute.xlu0 %5384 }
 0x185   : > { %v994_v8 = vadd.f32 %v990_v20, %v809_v31  ;;  %6797 = vmatpush1.msk.msra.mxu0 %vm261_vm0, %v5199_v28  ;;  %v6816_v28 = vld [vmem:[%s7825_s1 + $0x74] sm:$0x7] }
 0x186   : > { %997 = vst.msk [vmem:[#allocation2 + $0x8] sm:$0x77] %vm7566_vm10, %v995_v32  ;;  %v5197_v37 = vpop.permute.xlu1 %5196  ;;  %v1173_v6 = vpop.f32.mrb[8].mxu1  ;;  %6798 = vmatmul.mubr.msk.f32.vlgmr.msra.gmra.mrb[52].mxu0 %vm257_vm2, %v6795_v7 }
 0x187   : > { %996 = vst [vmem:[#allocation2] sm:$0x77] %v994_v8  ;;  %v5202_v4 = vsel %vm5198_vm1, %v5195_v19, %v5197_v37  ;;  %v1175_v5 = vpop.f32.mrb[9].mxu1  ;;  %5470 = vmatprep.mubr.f32.mxu0 %v6944_v0 }
 0x188   : > { %v1183_v38 = vcombine.low %v1173_v6, %v1175_v5  ;;  %6799 = vmatprep.subr.msk.mxu1 %vm261_vm0, %v5202_v4  ;;  %v5389_v39 = vpop.permute.xlu0 %5388 }
 0x189   : > { %v1102_v40 = vpop.f32.mrb[8].mxu0  ;;  %6800 = vmatpush1.msk.msra.mxu1 %vm261_vm0, %v5201_v36 }
 0x18a   : > { %v5383_v11 = vpop.permute.xlu1 %5382  ;;  %v1104_v35 = vpop.f32.mrb[9].mxu0  ;;  %6801 = vmatmul.mubr.msk.f32.vlgmr.msra.gmra.mrb[52].mxu1 %vm257_vm2, %v6795_v7 }
 0x18b   : > { %v1182_v41 = vcombine.low %v1102_v40, %v1104_v35  ;;  %v5392_v33 = vsel %vm5390_vm3, %v5383_v11, %v5385_v34  ;;  %5541 = vmatprep.mubr.f32.mxu1 %v6944_v0 }
 0x18c   : > { %6803 = vmatprep.subr.msk.mxu0 %vm261_vm0, %v5392_v33  ;;  %v5575_v42 = vpop.permute.xlu0 %5574 }
 0x18d   : > { %v1002_v43 = vld [vmem:[#allocation2 + $0x8] sm:$0x77] }
 0x18e   : > { %v1001_v9 = vld [vmem:[#allocation2] sm:$0x77]  ;;  %v1187_v44 = vadd.f32 %v1183_v38, %v1002_v43  ;;  %v5387_v46 = vpop.permute.xlu1 %5386  ;;  %v1289_v47 = vpop.f32.mrb[10].mxu0 }
 0x18f   : > { %v1186_v48 = vadd.f32 %v1182_v41, %v1001_v9  ;;  %v5393_v49 = vsel %vm5390_vm3, %v5385_v34, %v5387_v46  ;;  %v5394_v2 = vsel %vm5390_vm3, %v5387_v46, %v5389_v39  ;;  %v1291_v50 = vpop.f32.mrb[11].mxu0  ;;  %v6823_v39 = vld [vmem:[%s7825_s1 + $0x78] sm:$0x7] }
 0x190   : > { %1189 = vst.msk [vmem:[#allocation2 + $0x8] sm:$0x77] %vm7566_vm10, %v1187_v44  ;;  %6806 = vmatprep.subr.msk.mxu1 %vm261_vm0, %v5394_v2  ;;  %v1369_v52 = vcombine.low %v1289_v47, %v1291_v50  ;;  %v5579_v53 = vpop.permute.xlu0 %5578 }
 0x191   : > { %1188 = vst [vmem:[#allocation2] sm:$0x77] %v1186_v48  ;;  %v1360_v54 = vpop.f32.mrb[10].mxu1  ;;  %6807 = vmatpush1.msk.msra.mxu1 %vm261_vm0, %v5393_v49 }
 0x192   : > { %v5381_v55 = vpop.permute.xlu1 %5380  ;;  %v1362_v56 = vpop.f32.mrb[11].mxu1  ;;  %6808 = vmatmul.mubr.msk.f32.vlgmr.msra.gmra.mrb[54].mxu1 %vm257_vm2, %v6802_v51 }
 0x193   : > { %v5391_v57 = vsel %vm5390_vm3, %v5381_v55, %v5383_v11  ;;  %v1370_v58 = vcombine.low %v1360_v54, %v1362_v56  ;;  %5733 = vmatprep.mubr.f32.mxu1 %v6944_v0 }
 0x194   : > { %6804 = vmatpush1.msk.msra.mxu0 %vm261_vm0, %v5391_v57  ;;  %v5573_v59 = vpop.permute.xlu0 %5572 }
 0x195   : > { %6805 = vmatmul.mubr.msk.f32.vlgmr.msra.gmra.mrb[54].mxu0 %vm257_vm2, %v6802_v51  ;;  %v5583_v61 = vsel %vm5582_vm4, %v5573_v59, %v5575_v42 }
 0x196   : > { %v5577_v60 = vpop.permute.xlu1 %5576  ;;  %v1476_v62 = vpop.f32.mrb[12].mxu0  ;;  %5662 = vmatprep.mubr.f32.mxu0 %v6944_v0 }
 0x197   : > { %v1193_v63 = vld [vmem:[#allocation2 + $0x8] sm:$0x77]  ;;  %v5584_v1 = vsel %vm5582_vm4, %v5575_v42, %v5577_v60  ;;  %v1478_v3 = vpop.f32.mrb[13].mxu0  ;;  %v5585_v18 = vsel %vm5582_vm4, %v5577_v60, %v5579_v53 }
 0x198   : > { %v1192_v12 = vld [vmem:[#allocation2] sm:$0x77]  ;;  %v1374_v13 = vadd.f32 %v1370_v58, %v1193_v63  ;;  %6810 = vmatprep.subr.msk.mxu0 %vm261_vm0, %v5584_v1  ;;  %v1556_v14 = vcombine.low %v1476_v62, %v1478_v3  ;;  %v5767_v15 = vpop.permute.xlu0 %5766 }
 0x199   : > { %v1373_v16 = vadd.f32 %v1369_v52, %v1192_v12  ;;  %v1547_v17 = vpop.f32.mrb[12].mxu1  ;;  %6811 = vmatpush1.msk.msra.mxu0 %vm261_vm0, %v5583_v61  ;;  %v6830_v61 = vld [vmem:[%s7825_s1 + $0x7c] sm:$0x7] }
 0x19a   : > { %1376 = vst.msk [vmem:[#allocation2 + $0x8] sm:$0x77] %vm7566_vm10, %v1374_v13  ;;  %v5581_v19 = vpop.permute.xlu1 %5580  ;;  %v1549_v20 = vpop.f32.mrb[13].mxu1  ;;  %6812 = vmatmul.mubr.msk.f32.vlgmr.msra.gmra.mrb[56].mxu0 %vm257_vm2, %v6809_v10 }
 0x19b   : > { %1375 = vst [vmem:[#allocation2] sm:$0x77] %v1373_v16  ;;  %v5586_v21 = vsel %vm5582_vm4, %v5579_v53, %v5581_v19  ;;  %v1557_v22 = vcombine.low %v1547_v17, %v1549_v20  ;;  %5849 = vmatprep.mubr.f32.mxu0 %v6944_v0 }
 0x19c   : > { %6813 = vmatprep.subr.msk.mxu1 %vm261_vm0, %v5586_v21  ;;  %v5769_v23 = vpop.permute.xlu0 %5768 }
 0x19d   : > { %6814 = vmatpush1.msk.msra.mxu1 %vm261_vm0, %v5585_v18  ;;  %v5773_v24 = vsel %vm5770_vm5, %v5767_v15, %v5769_v23 }
 0x19e   : > { %v5765_v25 = vpop.permute.xlu1 %5764  ;;  %6815 = vmatmul.mubr.msk.f32.vlgmr.msra.gmra.mrb[56].mxu1 %vm257_vm2, %v6809_v10  ;;  %6820 = vmatprep.subr.msk.mxu1 %vm261_vm0, %v5769_v23  ;;  %v6837_v23 = vld [vmem:[%s7825_s1 + $0x80] sm:$0x7] }
 0x19f   : > { %v5772_v26 = vsel %vm5770_vm5, %v5765_v25, %v5767_v15  ;;  %v1668_v27 = vpop.f32.mrb[14].mxu0  ;;  %6821 = vmatpush1.msk.msra.mxu1 %vm261_vm0, %v5773_v24  ;;  %5920 = vmatprep.mubr.f32.mxu1 %v6944_v0 }
 0x1a0   : > { %v1670_v29 = vpop.f32.mrb[15].mxu0  ;;  %6817 = vmatprep.subr.msk.mxu0 %vm261_vm0, %v5772_v26  ;;  %v5954_v30 = vpop.permute.xlu0 %5953 }
 0x1a1   : > { %v1380_v7 = vld [vmem:[#allocation2 + $0x8] sm:$0x77]  ;;  %v1748_v31 = vcombine.low %v1668_v27, %v1670_v29 }
 0x1a2   : > { %v1379_v32 = vld [vmem:[#allocation2] sm:$0x77]  ;;  %v1561_v34 = vadd.f32 %v1557_v22, %v1380_v7  ;;  %v5763_v8 = vpop.permute.xlu1 %5762  ;;  %v1739_v36 = vpop.f32.mrb[14].mxu1  ;;  %6822 = vmatmul.mubr.msk.f32.vlgmr.msra.gmra.mrb[58].mxu1 %vm257_vm2, %v6816_v28 }
 0x1a3   : > { %v1560_v37 = vadd.f32 %v1556_v14, %v1379_v32  ;;  %v5771_v6 = vsel %vm5770_vm5, %v5763_v8, %v5765_v25  ;;  %v1741_v4 = vpop.f32.mrb[15].mxu1  ;;  %6107 = vmatprep.mubr.f32.mxu1 %v6944_v0 }
 0x1a4   : > { %1563 = vst.msk [vmem:[#allocation2 + $0x8] sm:$0x77] %vm7566_vm10, %v1561_v34  ;;  %v1749_v5 = vcombine.low %v1739_v36, %v1741_v4  ;;  %6818 = vmatpush1.msk.msra.mxu0 %vm261_vm0, %v5771_v6  ;;  %v5956_v38 = vpop.permute.xlu0 %5955 }
 0x1a5   : > { %1562 = vst [vmem:[#allocation2] sm:$0x77] %v1560_v37  ;;  %v5960_v40 = vsel %vm5957_vm6, %v5954_v30, %v5956_v38  ;;  %6819 = vmatmul.mubr.msk.f32.vlgmr.msra.gmra.mrb[58].mxu0 %vm257_vm2, %v6816_v28  ;;  %6827 = vmatprep.subr.msk.mxu1 %vm261_vm0, %v5956_v38 }
 0x1a6   : > { %v5952_v11 = vpop.permute.xlu1 %5951  ;;  %6828 = vmatpush1.msk.msra.mxu1 %vm261_vm0, %v5960_v40  ;;  %6036 = vmatprep.mubr.f32.mxu0 %v6944_v0 }
 0x1a7   : > { %v5959_v35 = vsel %vm5957_vm6, %v5952_v11, %v5954_v30  ;;  %6829 = vmatmul.mubr.msk.f32.vlgmr.msra.gmra.mrb[60].mxu1 %vm257_vm2, %v6823_v39 }
 0x1a8   : > { %6824 = vmatprep.subr.msk.mxu0 %vm261_vm0, %v5959_v35  ;;  %v6143_v41 = vpop.permute.xlu0 %6142  ;;  %6299 = vmatprep.mubr.f32.mxu1 %v6944_v0 }
 0x1aa   : > { %v5950_v33 = vpop.permute.xlu1 %5949  ;;  %v1931_v42 = vpop.f32.mrb[16].mxu1 }
 0x1ab   : > { %v1568_v43 = vld [vmem:[#allocation2 + $0x8] sm:$0x77]  ;;  %v5958_v9 = vsel %vm5957_vm6, %v5950_v33, %v5952_v11  ;;  %v1933_v44 = vpop.f32.mrb[17].mxu1 }
 0x1ac   : > { %v1567_v46 = vld [vmem:[#allocation2] sm:$0x77]  ;;  %v1753_v47 = vadd.f32 %v1749_v5, %v1568_v43  ;;  %v1941_v48 = vcombine.low %v1931_v42, %v1933_v44  ;;  %6825 = vmatpush1.msk.msra.mxu0 %vm261_vm0, %v5958_v9  ;;  %v6147_v49 = vpop.permute.xlu0 %6146 }
 0x1ad   : > { %v1752_v2 = vadd.f32 %v1748_v31, %v1567_v46  ;;  %v1860_v50 = vpop.f32.mrb[16].mxu0  ;;  %6826 = vmatmul.mubr.msk.f32.vlgmr.msra.gmra.mrb[60].mxu0 %vm257_vm2, %v6823_v39 }
 0x1ae   : > { %1755 = vst.msk [vmem:[#allocation2 + $0x8] sm:$0x77] %vm7566_vm10, %v1753_v47  ;;  %v6141_v51 = vpop.permute.xlu1 %6140  ;;  %v1862_v52 = vpop.f32.mrb[17].mxu0  ;;  %6228 = vmatprep.mubr.f32.mxu0 %v6944_v0 }
 0x1af   : > { %1754 = vst [vmem:[#allocation2] sm:$0x77] %v1752_v2  ;;  %v1940_v53 = vcombine.low %v1860_v50, %v1862_v52  ;;  %v6150_v54 = vsel %vm6148_vm7, %v6141_v51, %v6143_v41 }
 0x1b0   : > { %6831 = vmatprep.subr.msk.mxu0 %vm261_vm0, %v6150_v54  ;;  %v6333_v55 = vpop.permute.xlu0 %6332 }
 0x1b2   : > { %v6145_v56 = vpop.permute.xlu1 %6144  ;;  %v2047_v57 = vpop.f32.mrb[18].mxu0 }
 0x1b3   : > { %v6151_v58 = vsel %vm6148_vm7, %v6143_v41, %v6145_v56  ;;  %v6152_v59 = vsel %vm6148_vm7, %v6145_v56, %v6147_v49  ;;  %v2049_v60 = vpop.f32.mrb[19].mxu0 }
 0x1b4   : > { %6834 = vmatprep.subr.msk.mxu1 %vm261_vm0, %v6152_v59  ;;  %v2127_v62 = vcombine.low %v2047_v57, %v2049_v60  ;;  %v6337_v63 = vpop.permute.xlu0 %6336 }
 0x1b5   : > { %v1760_v1 = vld [vmem:[#allocation2 + $0x8] sm:$0x77]  ;;  %v2118_v3 = vpop.f32.mrb[18].mxu1  ;;  %6835 = vmatpush1.msk.msra.mxu1 %vm261_vm0, %v6151_v58 }
 0x1b6   : > { %v1759_v10 = vld [vmem:[#allocation2] sm:$0x77]  ;;  %v1945_v12 = vadd.f32 %v1941_v48, %v1760_v1  ;;  %v6139_v13 = vpop.permute.xlu1 %6138  ;;  %v2120_v14 = vpop.f32.mrb[19].mxu1  ;;  %6836 = vmatmul.mubr.msk.f32.vlgmr.msra.gmra.mrb[62].mxu1 %vm257_vm2, %v6830_v61 }
 0x1b7   : > { %v1944_v15 = vadd.f32 %v1940_v53, %v1759_v10  ;;  %v6149_v16 = vsel %vm6148_vm7, %v6139_v13, %v6141_v51  ;;  %v2128_v17 = vcombine.low %v2118_v3, %v2120_v14  ;;  %6491 = vmatprep.mubr.f32.mxu1 %v6944_v0 }
 0x1b8   : > { %1947 = vst.msk [vmem:[#allocation2 + $0x8] sm:$0x77] %vm7566_vm10, %v1945_v12  ;;  %6832 = vmatpush1.msk.msra.mxu0 %vm261_vm0, %v6149_v16  ;;  %v6331_v18 = vpop.permute.xlu0 %6330 }
 0x1b9   : > { %1946 = vst [vmem:[#allocation2] sm:$0x77] %v1944_v15  ;;  %6833 = vmatmul.mubr.msk.f32.vlgmr.msra.gmra.mrb[62].mxu0 %vm257_vm2, %v6830_v61  ;;  %v6341_v20 = vsel %vm6340_vm8, %v6331_v18, %v6333_v55 }
 0x1ba   : > { %v6335_v19 = vpop.permute.xlu1 %6334  ;;  %6420 = vmatprep.mubr.f32.mxu0 %v6944_v0 }
 0x1bb   : > { %v6342_v21 = vsel %vm6340_vm8, %v6333_v55, %v6335_v19  ;;  %v2239_v22 = vpop.f32.mrb[20].mxu0  ;;  %v6343_v26 = vsel %vm6340_vm8, %v6335_v19, %v6337_v63 }
 0x1bc   : > { %6838 = vmatprep.subr.msk.mxu0 %vm261_vm0, %v6342_v21  ;;  %v2241_v24 = vpop.f32.mrb[21].mxu0 }
 0x1bd   : > { %6839 = vmatpush1.msk.msra.mxu0 %vm261_vm0, %v6341_v20  ;;  %v2319_v25 = vcombine.low %v2239_v22, %v2241_v24 }
 0x1be   : > { %v6339_v27 = vpop.permute.xlu1 %6338  ;;  %v2310_v28 = vpop.f32.mrb[20].mxu1  ;;  %6840 = vmatmul.mubr.msk.f32.vlgmr.msra.gmra.mrb[64].mxu0 %vm257_vm2, %v6837_v23 }
 0x1bf   : > { %v1951_v0 = vld [vmem:[#allocation2 + $0x8] sm:$0x77]  ;;  %v6344_v29 = vsel %vm6340_vm8, %v6337_v63, %v6339_v27  ;;  %v2312_v30 = vpop.f32.mrb[21].mxu1 }
 0x1c0   : > { %v1950_v7 = vld [vmem:[#allocation2] sm:$0x77]  ;;  %v2132_v31 = vadd.f32 %v2128_v17, %v1951_v0  ;;  %v2320_v32 = vcombine.low %v2310_v28, %v2312_v30  ;;  %6841 = vmatprep.subr.msk.mxu1 %vm261_vm0, %v6344_v29 }
 0x1c1   : > { %v2131_v34 = vadd.f32 %v2127_v62, %v1950_v7  ;;  %6842 = vmatpush1.msk.msra.mxu1 %vm261_vm0, %v6343_v26 }
 0x1c2   : > { %2134 = vst.msk [vmem:[#allocation2 + $0x8] sm:$0x77] %vm7566_vm10, %v2132_v31  ;;  %6843 = vmatmul.mubr.msk.f32.vlgmr.msra.gmra.mrb[64].mxu1 %vm257_vm2, %v6837_v23 }
 0x1c3   : > { %2133 = vst [vmem:[#allocation2] sm:$0x77] %v2131_v34 }
 0x1c6   : > { %v2502_v8 = vpop.f32.mrb[22].mxu1 }
 0x1c7   : > { %v2504_v36 = vpop.f32.mrb[23].mxu1 }
 0x1c8   : > { %v2512_v37 = vcombine.low %v2502_v8, %v2504_v36 }
 0x1c9   : > { %v2139_v6 = vld [vmem:[#allocation2 + $0x8] sm:$0x77]  ;;  %v2431_v4 = vpop.f32.mrb[22].mxu0 }
 0x1ca   : > { %v2138_v5 = vld [vmem:[#allocation2] sm:$0x77]  ;;  %v2324_v38 = vadd.f32 %v2320_v32, %v2139_v6  ;;  %v2433_v39 = vpop.f32.mrb[23].mxu0 }
 0x1cb   : > { %v2323_v40 = vadd.f32 %v2319_v25, %v2138_v5  ;;  %v2511_v11 = vcombine.low %v2431_v4, %v2433_v39 }
 0x1cc   : > { %2326 = vst.msk [vmem:[#allocation2 + $0x8] sm:$0x77] %vm7566_vm10, %v2324_v38 }
 0x1cd   : > { %2325 = vst [vmem:[#allocation2] sm:$0x77] %v2323_v40 }
 0x1ce   : > { %v2618_v35 = vpop.f32.mrb[24].mxu0 }
 0x1cf   : > { %v2620_v41 = vpop.f32.mrb[25].mxu0 }
 0x1d0   : > { %v2698_v33 = vcombine.low %v2618_v35, %v2620_v41 }
 0x1d1   : > { %v2689_v42 = vpop.f32.mrb[24].mxu1 }
 0x1d2   : > { %v2691_v43 = vpop.f32.mrb[25].mxu1 }
 0x1d3   : > { %v2331_v9 = vld [vmem:[#allocation2 + $0x8] sm:$0x77]  ;;  %v2699_v44 = vcombine.low %v2689_v42, %v2691_v43 }
 0x1d4   : > { %v2330_v46 = vld [vmem:[#allocation2] sm:$0x77]  ;;  %v2516_v47 = vadd.f32 %v2512_v37, %v2331_v9 }
 0x1d5   : > { %v2515_v48 = vadd.f32 %v2511_v11, %v2330_v46 }
 0x1d6   : > { %2518 = vst.msk [vmem:[#allocation2 + $0x8] sm:$0x77] %vm7566_vm10, %v2516_v47 }
 0x1d7   : > { %2517 = vst [vmem:[#allocation2] sm:$0x77] %v2515_v48  ;;  %v2810_v49 = vpop.f32.mrb[26].mxu0 }
 0x1d8   : > { %v2812_v2 = vpop.f32.mrb[27].mxu0 }
 0x1d9   : > { %v2890_v50 = vcombine.low %v2810_v49, %v2812_v2 }
 0x1da   : > { %v2881_v51 = vpop.f32.mrb[26].mxu1 }
 0x1db   : > { %v2883_v52 = vpop.f32.mrb[27].mxu1 }
 0x1dc   : > { %v2891_v53 = vcombine.low %v2881_v51, %v2883_v52 }
 0x1dd   : > { %v2522_v54 = vld [vmem:[#allocation2 + $0x8] sm:$0x77] }
 0x1de   : > { %v2703_v55 = vadd.f32 %v2699_v44, %v2522_v54  ;;  %v2521_v56 = vld [vmem:[#allocation2] sm:$0x77] }
 0x1df   : > { %v2702_v57 = vadd.f32 %v2698_v33, %v2521_v56  ;;  %v3068_v58 = vpop.f32.mrb[28].mxu1 }
 0x1e0   : > { %2705 = vst.msk [vmem:[#allocation2 + $0x8] sm:$0x77] %vm7566_vm10, %v2703_v55  ;;  %v3070_v59 = vpop.f32.mrb[29].mxu1 }
 0x1e1   : > { %2704 = vst [vmem:[#allocation2] sm:$0x77] %v2702_v57  ;;  %v2997_v60 = vpop.f32.mrb[28].mxu0  ;;  %v3078_v61 = vcombine.low %v3068_v58, %v3070_v59 }
 0x1e2   : > { %v2999_v62 = vpop.f32.mrb[29].mxu0 }
 0x1e3   : > { %v3077_v63 = vcombine.low %v2997_v60, %v2999_v62 }
 0x1e7   : > { %v2710_v1 = vld [vmem:[#allocation2 + $0x8] sm:$0x77]  ;;  %v3255_v3 = vpop.f32.mrb[30].mxu1 }
 0x1e8   : > { %v2895_v10 = vadd.f32 %v2891_v53, %v2710_v1  ;;  %v2709_v12 = vld [vmem:[#allocation2] sm:$0x77]  ;;  %v3257_v13 = vpop.f32.mrb[31].mxu1 }
 0x1e9   : > { %v2894_v14 = vadd.f32 %v2890_v50, %v2709_v12  ;;  %v3184_v15 = vpop.f32.mrb[30].mxu0  ;;  %v3265_v16 = vcombine.low %v3255_v3, %v3257_v13 }
 0x1ea   : > { %2897 = vst.msk [vmem:[#allocation2 + $0x8] sm:$0x77] %vm7566_vm10, %v2895_v10  ;;  %v3186_v17 = vpop.f32.mrb[31].mxu0 }
 0x1eb   : > { %2896 = vst [vmem:[#allocation2] sm:$0x77] %v2894_v14  ;;  %v3264_v18 = vcombine.low %v3184_v15, %v3186_v17 }
 0x1f1   : > { %v2901_v19 = vld [vmem:[#allocation2 + $0x8] sm:$0x77] }
 0x1f2   : > { %v3082_v20 = vadd.f32 %v3078_v61, %v2901_v19  ;;  %v2900_v21 = vld [vmem:[#allocation2] sm:$0x77]  ;;  %v3447_v22 = vpop.f32.mrb[32].mxu1 }
 0x1f3   : > { %v3081_v23 = vadd.f32 %v3077_v63, %v2900_v21  ;;  %v3449_v24 = vpop.f32.mrb[33].mxu1 }
 0x1f4   : > { %3084 = vst.msk [vmem:[#allocation2 + $0x8] sm:$0x77] %vm7566_vm10, %v3082_v20  ;;  %v3457_v25 = vcombine.low %v3447_v22, %v3449_v24 }
 0x1f5   : > { %3083 = vst [vmem:[#allocation2] sm:$0x77] %v3081_v23  ;;  %v3376_v26 = vpop.f32.mrb[32].mxu0 }
 0x1f6   : > { %v3378_v27 = vpop.f32.mrb[33].mxu0 }
 0x1f7   : > { %v3456_v28 = vcombine.low %v3376_v26, %v3378_v27 }
 0x1fb   : > { %v3088_v0 = vld [vmem:[#allocation2 + $0x8] sm:$0x77]  ;;  %v3568_v29 = vpop.f32.mrb[34].mxu0 }
 0x1fc   : > { %v3269_v30 = vadd.f32 %v3265_v16, %v3088_v0  ;;  %v3087_v7 = vld [vmem:[#allocation2] sm:$0x77]  ;;  %v3570_v31 = vpop.f32.mrb[35].mxu0 }
 0x1fd   : > { %v3268_v32 = vadd.f32 %v3264_v18, %v3087_v7  ;;  %v3648_v34 = vcombine.low %v3568_v29, %v3570_v31 }
 0x1fe   : > { %3271 = vst.msk [vmem:[#allocation2 + $0x8] sm:$0x77] %vm7566_vm10, %v3269_v30  ;;  %v3639_v8 = vpop.f32.mrb[34].mxu1 }
 0x1ff   : > { %3270 = vst [vmem:[#allocation2] sm:$0x77] %v3268_v32  ;;  %v3641_v36 = vpop.f32.mrb[35].mxu1 }
 0x200   : > { %v3649_v37 = vcombine.low %v3639_v8, %v3641_v36 }
 0x205   : > { %v3276_v6 = vld [vmem:[#allocation2 + $0x8] sm:$0x77] }
 0x206   : > { %v3461_v4 = vadd.f32 %v3457_v25, %v3276_v6  ;;  %v3275_v5 = vld [vmem:[#allocation2] sm:$0x77]  ;;  %v3830_v38 = vpop.f32.mrb[36].mxu1 }
 0x207   : > { %v3460_v39 = vadd.f32 %v3456_v28, %v3275_v5  ;;  %v3832_v40 = vpop.f32.mrb[37].mxu1 }
 0x208   : > { %3463 = vst.msk [vmem:[#allocation2 + $0x8] sm:$0x77] %vm7566_vm10, %v3461_v4  ;;  %v3840_v11 = vcombine.low %v3830_v38, %v3832_v40 }
 0x209   : > { %3462 = vst [vmem:[#allocation2] sm:$0x77] %v3460_v39  ;;  %v3759_v35 = vpop.f32.mrb[36].mxu0 }
 0x20a   : > { %v3761_v41 = vpop.f32.mrb[37].mxu0 }
 0x20b   : > { %v3839_v33 = vcombine.low %v3759_v35, %v3761_v41 }
 0x20e   : > { %v3946_v42 = vpop.f32.mrb[38].mxu0 }
 0x20f   : > { %v3468_v43 = vld [vmem:[#allocation2 + $0x8] sm:$0x77]  ;;  %v3948_v9 = vpop.f32.mrb[39].mxu0 }
 0x210   : > { %v3653_v44 = vadd.f32 %v3649_v37, %v3468_v43  ;;  %v3467_v46 = vld [vmem:[#allocation2] sm:$0x77]  ;;  %v4026_v47 = vcombine.low %v3946_v42, %v3948_v9 }
 0x211   : > { %v3652_v48 = vadd.f32 %v3648_v34, %v3467_v46  ;;  %v4017_v49 = vpop.f32.mrb[38].mxu1 }
 0x212   : > { %3655 = vst.msk [vmem:[#allocation2 + $0x8] sm:$0x77] %vm7566_vm10, %v3653_v44  ;;  %v4019_v2 = vpop.f32.mrb[39].mxu1 }
 0x213   : > { %3654 = vst [vmem:[#allocation2] sm:$0x77] %v3652_v48  ;;  %v4027_v50 = vcombine.low %v4017_v49, %v4019_v2 }
 0x219   : > { %v3660_v51 = vld [vmem:[#allocation2 + $0x8] sm:$0x77] }
 0x21a   : > { %v3844_v52 = vadd.f32 %v3840_v11, %v3660_v51  ;;  %v3659_v53 = vld [vmem:[#allocation2] sm:$0x77]  ;;  %v4209_v54 = vpop.f32.mrb[40].mxu1 }
 0x21b   : > { %v3843_v55 = vadd.f32 %v3839_v33, %v3659_v53  ;;  %v4211_v56 = vpop.f32.mrb[41].mxu1 }
 0x21c   : > { %3846 = vst.msk [vmem:[#allocation2 + $0x8] sm:$0x77] %vm7566_vm10, %v3844_v52  ;;  %v4219_v57 = vcombine.low %v4209_v54, %v4211_v56 }
 0x21d   : > { %3845 = vst [vmem:[#allocation2] sm:$0x77] %v3843_v55  ;;  %v4138_v58 = vpop.f32.mrb[40].mxu0 }
 0x21e   : > { %v4140_v59 = vpop.f32.mrb[41].mxu0 }
 0x21f   : > { %v4218_v60 = vcombine.low %v4138_v58, %v4140_v59 }
 0x223   : > { %v3850_v61 = vld [vmem:[#allocation2 + $0x8] sm:$0x77] }
 0x224   : > { %v4031_v62 = vadd.f32 %v4027_v50, %v3850_v61  ;;  %v3849_v63 = vld [vmem:[#allocation2] sm:$0x77] }
 0x225   : > { %v4030_v1 = vadd.f32 %v4026_v47, %v3849_v63  ;;  %v4396_v3 = vpop.f32.mrb[42].mxu1 }
 0x226   : > { %4033 = vst.msk [vmem:[#allocation2 + $0x8] sm:$0x77] %vm7566_vm10, %v4031_v62  ;;  %v4398_v10 = vpop.f32.mrb[43].mxu1 }
 0x227   : > { %4032 = vst [vmem:[#allocation2] sm:$0x77] %v4030_v1  ;;  %v4406_v12 = vcombine.low %v4396_v3, %v4398_v10 }
 0x22c   : > { %v4325_v13 = vpop.f32.mrb[42].mxu0 }
 0x22d   : > { %v4038_v14 = vld [vmem:[#allocation2 + $0x8] sm:$0x77]  ;;  %v4327_v15 = vpop.f32.mrb[43].mxu0 }
 0x22e   : > { %v4223_v16 = vadd.f32 %v4219_v57, %v4038_v14  ;;  %v4037_v17 = vld [vmem:[#allocation2] sm:$0x77]  ;;  %v4405_v18 = vcombine.low %v4325_v13, %v4327_v15 }
 0x22f   : > { %v4222_v19 = vadd.f32 %v4218_v60, %v4037_v17 }
 0x230   : > { %4225 = vst.msk [vmem:[#allocation2 + $0x8] sm:$0x77] %vm7566_vm10, %v4223_v16 }
 0x231   : > { %4224 = vst [vmem:[#allocation2] sm:$0x77] %v4222_v19 }
 0x235   : > { %v4588_v20 = vpop.f32.mrb[44].mxu1 }
 0x236   : > { %v4590_v21 = vpop.f32.mrb[45].mxu1 }
 0x237   : > { %v4229_v22 = vld [vmem:[#allocation2 + $0x8] sm:$0x77]  ;;  %v4598_v23 = vcombine.low %v4588_v20, %v4590_v21 }
 0x238   : > { %v4410_v24 = vadd.f32 %v4406_v12, %v4229_v22  ;;  %v4228_v25 = vld [vmem:[#allocation2] sm:$0x77]  ;;  %v4517_v26 = vpop.f32.mrb[44].mxu0 }
 0x239   : > { %v4409_v27 = vadd.f32 %v4405_v18, %v4228_v25  ;;  %v4519_v28 = vpop.f32.mrb[45].mxu0 }
 0x23a   : > { %4412 = vst.msk [vmem:[#allocation2 + $0x8] sm:$0x77] %vm7566_vm10, %v4410_v24  ;;  %v4597_v0 = vcombine.low %v4517_v26, %v4519_v28 }
 0x23b   : > { %4411 = vst [vmem:[#allocation2] sm:$0x77] %v4409_v27 }
 0x23d   : > { %v4709_v29 = vpop.f32.mrb[46].mxu0 }
 0x23e   : > { %v4711_v30 = vpop.f32.mrb[47].mxu0 }
 0x23f   : > { %v4789_v7 = vcombine.low %v4709_v29, %v4711_v30 }
 0x241   : > { %v4417_v31 = vld [vmem:[#allocation2 + $0x8] sm:$0x77]  ;;  %v4780_v32 = vpop.f32.mrb[46].mxu1 }
 0x242   : > { %v4602_v34 = vadd.f32 %v4598_v23, %v4417_v31  ;;  %v4416_v8 = vld [vmem:[#allocation2] sm:$0x77]  ;;  %v4782_v36 = vpop.f32.mrb[47].mxu1 }
 0x243   : > { %v4601_v37 = vadd.f32 %v4597_v0, %v4416_v8  ;;  %v4790_v6 = vcombine.low %v4780_v32, %v4782_v36 }
 0x244   : > { %4604 = vst.msk [vmem:[#allocation2 + $0x8] sm:$0x77] %vm7566_vm10, %v4602_v34 }
 0x245   : > { %4603 = vst [vmem:[#allocation2] sm:$0x77] %v4601_v37  ;;  %v4967_v4 = vpop.f32.mrb[48].mxu1 }
 0x246   : > { %v4969_v5 = vpop.f32.mrb[49].mxu1 }
 0x247   : > { %v4977_v38 = vcombine.low %v4967_v4, %v4969_v5 }
 0x248   : > { %v4896_v39 = vpop.f32.mrb[48].mxu0 }
 0x249   : > { %v4898_v40 = vpop.f32.mrb[49].mxu0 }
 0x24a   : > { %v4976_v11 = vcombine.low %v4896_v39, %v4898_v40 }
 0x24b   : > { %v4609_v35 = vld [vmem:[#allocation2 + $0x8] sm:$0x77] }
 0x24c   : > { %v4794_v41 = vadd.f32 %v4790_v6, %v4609_v35  ;;  %v4608_v33 = vld [vmem:[#allocation2] sm:$0x77] }
 0x24d   : > { %v4793_v42 = vadd.f32 %v4789_v7, %v4608_v33 }
 0x24e   : > { %4796 = vst.msk [vmem:[#allocation2 + $0x8] sm:$0x77] %vm7566_vm10, %v4794_v41 }
 0x24f   : > { %4795 = vst [vmem:[#allocation2] sm:$0x77] %v4793_v42 }
 0x251   : > { %v5159_v43 = vpop.f32.mrb[50].mxu1 }
 0x252   : > { %v5161_v9 = vpop.f32.mrb[51].mxu1 }
 0x253   : > { %v5169_v44 = vcombine.low %v5159_v43, %v5161_v9 }
 0x254   : > { %v5088_v46 = vpop.f32.mrb[50].mxu0 }
 0x255   : > { %v4800_v47 = vld [vmem:[#allocation2 + $0x8] sm:$0x77]  ;;  %v5090_v48 = vpop.f32.mrb[51].mxu0 }
 0x256   : > { %v4981_v49 = vadd.f32 %v4977_v38, %v4800_v47  ;;  %v4799_v2 = vld [vmem:[#allocation2] sm:$0x77]  ;;  %v5168_v50 = vcombine.low %v5088_v46, %v5090_v48 }
 0x257   : > { %v4980_v51 = vadd.f32 %v4976_v11, %v4799_v2 }
 0x258   : > { %4983 = vst.msk [vmem:[#allocation2 + $0x8] sm:$0x77] %vm7566_vm10, %v4981_v49 }
 0x259   : > { %4982 = vst [vmem:[#allocation2] sm:$0x77] %v4980_v51  ;;  %v5280_v52 = vpop.f32.mrb[52].mxu0 }
 0x25a   : > { %v5282_v53 = vpop.f32.mrb[53].mxu0 }
 0x25b   : > { %v5360_v54 = vcombine.low %v5280_v52, %v5282_v53 }
 0x25d   : > { %v5351_v55 = vpop.f32.mrb[52].mxu1 }
 0x25e   : > { %v5353_v56 = vpop.f32.mrb[53].mxu1 }
 0x25f   : > { %v4988_v57 = vld [vmem:[#allocation2 + $0x8] sm:$0x77]  ;;  %v5361_v58 = vcombine.low %v5351_v55, %v5353_v56 }
 0x260   : > { %v5173_v59 = vadd.f32 %v5169_v44, %v4988_v57  ;;  %v4987_v60 = vld [vmem:[#allocation2] sm:$0x77] }
 0x261   : > { %v5172_v61 = vadd.f32 %v5168_v50, %v4987_v60 }
 0x262   : > { %5175 = vst.msk [vmem:[#allocation2 + $0x8] sm:$0x77] %vm7566_vm10, %v5173_v59 }
 0x263   : > { %5174 = vst [vmem:[#allocation2] sm:$0x77] %v5172_v61 }
 0x265   : > { %v5543_v62 = vpop.f32.mrb[54].mxu1 }
 0x266   : > { %v5545_v63 = vpop.f32.mrb[55].mxu1 }
 0x267   : > { %v5553_v1 = vcombine.low %v5543_v62, %v5545_v63 }
 0x268   : > { %v5472_v3 = vpop.f32.mrb[54].mxu0 }
 0x269   : > { %v5180_v10 = vld [vmem:[#allocation2 + $0x8] sm:$0x77]  ;;  %v5474_v12 = vpop.f32.mrb[55].mxu0 }
 0x26a   : > { %v5365_v13 = vadd.f32 %v5361_v58, %v5180_v10  ;;  %v5179_v14 = vld [vmem:[#allocation2] sm:$0x77]  ;;  %v5552_v15 = vcombine.low %v5472_v3, %v5474_v12 }
 0x26b   : > { %v5364_v16 = vadd.f32 %v5360_v54, %v5179_v14 }
 0x26c   : > { %5367 = vst.msk [vmem:[#allocation2 + $0x8] sm:$0x77] %vm7566_vm10, %v5365_v13 }
 0x26d   : > { %5366 = vst [vmem:[#allocation2] sm:$0x77] %v5364_v16  ;;  %v5664_v17 = vpop.f32.mrb[56].mxu0 }
 0x26e   : > { %v5666_v18 = vpop.f32.mrb[57].mxu0 }
 0x26f   : > { %v5744_v19 = vcombine.low %v5664_v17, %v5666_v18 }
 0x271   : > { %v5735_v20 = vpop.f32.mrb[56].mxu1 }
 0x272   : > { %v5737_v21 = vpop.f32.mrb[57].mxu1 }
 0x273   : > { %v5372_v22 = vld [vmem:[#allocation2 + $0x8] sm:$0x77]  ;;  %v5745_v23 = vcombine.low %v5735_v20, %v5737_v21 }
 0x274   : > { %v5557_v24 = vadd.f32 %v5553_v1, %v5372_v22  ;;  %v5371_v25 = vld [vmem:[#allocation2] sm:$0x77] }
 0x275   : > { %v5556_v26 = vadd.f32 %v5552_v15, %v5371_v25  ;;  %v5922_v27 = vpop.f32.mrb[58].mxu1 }
 0x276   : > { %5559 = vst.msk [vmem:[#allocation2 + $0x8] sm:$0x77] %vm7566_vm10, %v5557_v24  ;;  %v5924_v28 = vpop.f32.mrb[59].mxu1 }
 0x277   : > { %5558 = vst [vmem:[#allocation2] sm:$0x77] %v5556_v26  ;;  %v5932_v0 = vcombine.low %v5922_v27, %v5924_v28 }
 0x278   : > { %v5851_v29 = vpop.f32.mrb[58].mxu0 }
 0x279   : > { %v5853_v30 = vpop.f32.mrb[59].mxu0 }
 0x27a   : > { %v5931_v7 = vcombine.low %v5851_v29, %v5853_v30  ;;  %v6109_v31 = vpop.f32.mrb[60].mxu1 }
 0x27b   : > { %v6111_v32 = vpop.f32.mrb[61].mxu1 }
 0x27c   : > { %v6119_v34 = vcombine.low %v6109_v31, %v6111_v32 }
 0x27d   : > { %v5564_v8 = vld [vmem:[#allocation2 + $0x8] sm:$0x77] }
 0x27e   : > { %v5749_v36 = vadd.f32 %v5745_v23, %v5564_v8  ;;  %v5563_v37 = vld [vmem:[#allocation2] sm:$0x77] }
 0x27f   : > { %v5748_v6 = vadd.f32 %v5744_v19, %v5563_v37 }
 0x280   : > { %5751 = vst.msk [vmem:[#allocation2 + $0x8] sm:$0x77] %vm7566_vm10, %v5749_v36  ;;  %v6038_v4 = vpop.f32.mrb[60].mxu0 }
 0x281   : > { %5750 = vst [vmem:[#allocation2] sm:$0x77] %v5748_v6  ;;  %v6040_v5 = vpop.f32.mrb[61].mxu0 }
 0x282   : > { %v6118_v38 = vcombine.low %v6038_v4, %v6040_v5 }
 0x287   : > { %v5755_v39 = vld [vmem:[#allocation2 + $0x8] sm:$0x77] }
 0x288   : > { %v5936_v40 = vadd.f32 %v5932_v0, %v5755_v39  ;;  %v5754_v11 = vld [vmem:[#allocation2] sm:$0x77] }
 0x289   : > { %v5935_v35 = vadd.f32 %v5931_v7, %v5754_v11  ;;  %v6301_v41 = vpop.f32.mrb[62].mxu1 }
 0x28a   : > { %5938 = vst.msk [vmem:[#allocation2 + $0x8] sm:$0x77] %vm7566_vm10, %v5936_v40  ;;  %v6303_v33 = vpop.f32.mrb[63].mxu1 }
 0x28b   : > { %5937 = vst [vmem:[#allocation2] sm:$0x77] %v5935_v35  ;;  %v6311_v42 = vcombine.low %v6301_v41, %v6303_v33 }
 0x28c   : > { %v6230_v43 = vpop.f32.mrb[62].mxu0 }
 0x28d   : > { %v6232_v9 = vpop.f32.mrb[63].mxu0 }
 0x28e   : > { %v6310_v44 = vcombine.low %v6230_v43, %v6232_v9 }
 0x291   : > { %v5942_v46 = vld [vmem:[#allocation2 + $0x8] sm:$0x77]  ;;  %v6422_v47 = vpop.f32.mrb[64].mxu0 }
 0x292   : > { %v6123_v48 = vadd.f32 %v6119_v34, %v5942_v46  ;;  %v5941_v49 = vld [vmem:[#allocation2] sm:$0x77]  ;;  %v6424_v2 = vpop.f32.mrb[65].mxu0 }
 0x293   : > { %v6122_v50 = vadd.f32 %v6118_v38, %v5941_v49  ;;  %v6502_v51 = vcombine.low %v6422_v47, %v6424_v2 }
 0x294   : > { %6125 = vst.msk [vmem:[#allocation2 + $0x8] sm:$0x77] %vm7566_vm10, %v6123_v48 }
 0x295   : > { %6124 = vst [vmem:[#allocation2] sm:$0x77] %v6122_v50  ;;  %v6493_v52 = vpop.f32.mrb[64].mxu1 }
 0x296   : > { %v6495_v53 = vpop.f32.mrb[65].mxu1 }
 0x297   : > { %v6503_v54 = vcombine.low %v6493_v52, %v6495_v53 }
 0x29b   : > { %v6130_v55 = vld [vmem:[#allocation2 + $0x8] sm:$0x77] }
 0x29c   : > { %v6315_v56 = vadd.f32 %v6311_v42, %v6130_v55  ;;  %v6129_v57 = vld [vmem:[#allocation2] sm:$0x77] }
 0x29d   : > { %v6314_v58 = vadd.f32 %v6310_v44, %v6129_v57 }
 0x29e   : > { %6317 = vst.msk [vmem:[#allocation2 + $0x8] sm:$0x77] %vm7566_vm10, %v6315_v56 }
 0x29f   : > { %6316 = vst [vmem:[#allocation2] sm:$0x77] %v6314_v58 }
 0x2a5   : > { %v6322_v59 = vld [vmem:[#allocation2 + $0x8] sm:$0x77] }
 0x2a6   : > { %v6507_v60 = vadd.f32 %v6503_v54, %v6322_v59  ;;  %v6321_v61 = vld [vmem:[#allocation2] sm:$0x77] }
 0x2a7   : > { %v6506_v62 = vadd.f32 %v6502_v51, %v6321_v61 }
 0x2a8   : > { %6509 = vst.msk [vmem:[#allocation2 + $0x8] sm:$0x77] %vm7566_vm10, %v6507_v60 }
 0x2a9   : > { %6508 = vst [vmem:[#allocation2] sm:$0x77] %v6506_v62 }
 0x2af   : > { %v6514_v63 = vld [vmem:[#allocation2 + $0x8] sm:$0x77] }
 0x2b0   : > { %v6513_v1 = vld [vmem:[#allocation2] sm:$0x77]  ;;  %6516 = vst.msk [vmem:[%s213_s7 + $0x8] sm:$0x77] %vm7566_vm10, %v6514_v63 }
 0x2b1   : > { %6515 = vst [vmem:[%s213_s7] sm:$0x77] %v6513_v1 }
 0x2b2 PF: > { %s13_s14 = sadd.s32 1, %s6942_s14   ;;  %s7830_s12 = smov %s6938_s13 }
 0x2b3   : > { %p10_p5 = scmp.ge.s32.totalorder %s13_s14, 4   ;;  %s7831_s13 = smov %s7833_s15 }
 0x2b5   :  { %12 = sbr.rel (!%p10_p5) target bundleno = 2 (0x2), region = 105 }

</bundles_post_ra>
